<compile_context>
chip_gen: v7x
topology: tpu7x:2x2x1
jax: 0.10.0
libtpu: 0.0.40
codegen_flags: <defaults>
</compile_context>

<pallas_src>
import math

import jax
import jax.numpy as jnp
from jax.experimental import pallas as pl
from jax.experimental.pallas import tpu as pltpu

# ----------------------------- model sizes (small) ---------------------------
VOCAB = 50       # vocab_size
EMB = 32         # emb_size
HID = 32         # hidden_size  (enc_size = 2 * HID)
OUT = 5          # output_size (categorical / SST-style LogSoftmax head)
B, T = 2, 8
PAD_IDX = 1

# HardKuma support used by KumaGate in the reference repo
SUPPORT_LO, SUPPORT_HI = -0.1, 1.1


# ----------------------------- in-kernel math helpers ------------------------
def _sigmoid_approx(x):
    # EUP exp + approx EUP reciprocal (keeps the serial recurrence path short)
    return pl.reciprocal(1.0 + jnp.exp(-x), approx=True)


def _softplus(x):
    # numerically-safe softplus using only exp/log (Pallas-friendly)
    return jnp.where(x > 20.0, x, jnp.log(1.0 + jnp.exp(jnp.minimum(x, 20.0))))


_LANCZOS_G = 7.0
_LANCZOS_P = (0.99999999999980993, 676.5203681218851, -1259.1392167224028,
              771.32342877765313, -176.61502916214059, 12.507343278686905,
              -0.13857109526572012, 9.9843695780195716e-6, 1.5056327351493116e-7)


def _lgamma_pos(z):
    """lgamma(z) for z > 0 via Lanczos (g=7, n=9); recurrence for z < 0.5."""
    small = z < 0.5
    zz = jnp.where(small, z + 1.0, z)
    y = zz - 1.0
    acc = jnp.full_like(zz, _LANCZOS_P[0])
    for i in range(1, 9):
        acc = acc + _LANCZOS_P[i] / (y + float(i))
    t = y + _LANCZOS_G + 0.5
    lg = (0.5 * math.log(2.0 * math.pi)
          + (y + 0.5) * jnp.log(t) - t + jnp.log(acc))
    return jnp.where(small, lg - jnp.log(z), lg)


# ----------------------------- fused forward kernel --------------------------
def _fused_kernel(emb_ref, maskf_ref,
                  wih_ref, gwhh_ref, gb_ref,
                  kw_ref, kb_ref,
                  cwhh_ref, cb_ref,
                  ow_ref, ob_ref,
                  y_ref, z_ref):
    Bk = y_ref.shape[0]
    TB = maskf_ref.shape[0]
    Tk = TB // Bk
    H = gwhh_ref.shape[0]            # gen_whh is [H, 8H]

    emb_flat = emb_ref[...]          # [T*B, E]   time-major rows (row = t*B+b)
    mask_flat = maskf_ref[...]       # [T*B, 1]   1.0 for real tokens

    # ---- one-time, off-recurrence prep (shared by both BiLSTMs) -------------
    # fwd/bwd directions are stacked along sublanes: rows [0,B) fwd, [B,2B) bwd
    row4 = jax.lax.broadcasted_iota(jnp.int32, (2 * Bk, 4 * H), 0)
    sel_fwd = row4 < Bk              # pick fwd/bwd 4H half of the rec. matmul

    def stack_steps(flat, width):
        """[T*B, 2*width] (fwd cols | bwd cols, time-major rows) ->
        [T*2B, width] where block t = [fwd rows @ t ; bwd rows @ T-1-t]."""
        blocks = []
        for t in range(Tk):
            blocks.append(flat[t * Bk:(t + 1) * Bk, 0:width])
            blocks.append(flat[(Tk - 1 - t) * Bk:(Tk - t) * Bk, width:2 * width])
        return jnp.concatenate(blocks, axis=0)

    # per-step mask, pre-stacked and pre-broadcast to H lanes (one pass)
    m_stk = stack_steps(jnp.concatenate([mask_flat, mask_flat], axis=1), 1)
    m_all = jnp.broadcast_to(m_stk, (Tk * 2 * Bk, H))       # [T*2B, H]
    om_all = 1.0 - m_all

    def bilstm(G_stk, whh_side, collect):
        """Bidirectional LSTM, both directions in the same time loop.

        G_stk   : [T*2B, 4H] pre-stacked gate pre-activations (bias included,
                  gate order (i,f,o,g), g columns pre-scaled by 2).
        whh_side: [H, 8H] = [whh_fwd | whh_bwd] (same gate packing).
        Packed-sequence semantics: state frozen past each sequence length.
        Returns final stacked state [2B, H] and (optionally) per-step outputs.
        """
        h = jnp.zeros((2 * Bk, H), jnp.float32)
        c = jnp.zeros((2 * Bk, H), jnp.float32)
        hs = []
        for t in range(Tk):
            r0 = t * 2 * Bk
            xg = G_stk[r0:r0 + 2 * Bk, :]            # [2B, 4H] static slice
            m = m_all[r0:r0 + 2 * Bk, :]             # [2B, H]
            om = om_all[r0:r0 + 2 * Bk, :]
            rec = jnp.dot(h, whh_side,
                          preferred_element_type=jnp.float32)        # [2B, 8H]
            gates = xg + jnp.where(sel_fwd, rec[:, 0:4 * H], rec[:, 4 * H:8 * H])
            # one contiguous 128-lane EUP push for all 4 gates;
            # tanh(g) = 2*sigmoid(2g)-1 (g columns were pre-scaled by 2)
            sig = _sigmoid_approx(gates)
            i = sig[:, 0:H]
            f = sig[:, H:2 * H]
            o = sig[:, 2 * H:3 * H]
            g = 2.0 * sig[:, 3 * H:4 * H] - 1.0
            c_new = f * c + i * g
            h_new = o * jnp.tanh(c_new)
            h = m * h_new + om * h                   # freeze state past length
            c = m * c_new + om * c
            if collect:
                hs.append(h * m)                     # pad positions -> 0
        return h, hs

    # ---- fused input projection for BOTH BiLSTMs (one MXU matmul) -----------
    P = jnp.dot(emb_flat, wih_ref[...],
                preferred_element_type=jnp.float32)  # [T*B, 16H]

    # ---------------- generator ("latent model"): p(z | x) -------------------
    Gg = P[:, 0:8 * H] + gb_ref[...]                                 # [T*B, 8H]
    _, hs = bilstm(stack_steps(Gg, 4 * H), gwhh_ref[...], True)

    # assemble per-position hidden states [T*B, 2H] (vreg-only, no scratch)
    h_rows = [jnp.concatenate([hs[t][0:Bk, :],
                               hs[Tk - 1 - t][Bk:2 * Bk, :]], axis=1)
              for t in range(Tk)]
    h_all = jnp.concatenate(h_rows, axis=0)                          # [T*B, 2H]

    # KumaGate: one matmul gives (a_pre, b_pre); Softplus; clamp(1e-6, 100)
    ab_pre = jnp.dot(h_all, kw_ref[...],
                     preferred_element_type=jnp.float32) + kb_ref[...]
    ab = jnp.clip(_softplus(ab_pre), 1e-6, 100.0)
    a = ab[:, 0:1]
    b = ab[:, 1:2]

    lo, hi = SUPPORT_LO, SUPPORT_HI
    scale = hi - lo
    t0 = (0.0 - lo) / scale
    t1 = (1.0 - lo) / scale

    def q_of(tc):   # (1 - tc**a)**b for a python float constant tc in (0,1)
        ta = jnp.exp(a * math.log(tc))
        return jnp.exp(b * jnp.log(jnp.maximum(1.0 - ta, 1e-30)))

    q0 = q_of(t0)
    q1 = q_of(t1)
    p0 = 1.0 - q0                       # HardKuma P(z == 0)
    p1 = q1                             # HardKuma P(z == 1)
    pc = jnp.maximum(q0 - q1, 0.0)      # P(0 < z < 1), cancellation-free

    # Kuma mean: E[X] = b * B(1 + 1/a, b); HardKuma mean approximated by the
    # clamped stretched-Kuma mean (as in the reference repo); the 3 lgamma
    # evaluations are batched into a single Lanczos call.
    arg1 = 1.0 + 1.0 / a
    lg = _lgamma_pos(jnp.concatenate([arg1, b, arg1 + b], axis=1))   # [T*B, 3]
    kmean = b * jnp.exp(lg[:, 0:1] + lg[:, 1:2] - lg[:, 2:3])
    hk_mean = jnp.clip(kmean * scale + lo, 0.0, 1.0)

    z = jnp.where(p0 > p1, 0.0, 1.0)
    z = jnp.where((pc > p0) & (pc > p1), hk_mean, z)
    z = jnp.where(mask_flat > 0.5, z, 0.0)
    z_ref[...] = z                                                   # [T*B, 1]

    # ---------------- classifier ("Encoder"): p(y | x, z) --------------------
    zscale = mask_flat * z                                           # z_mask
    Gc = P[:, 8 * H:16 * H] * zscale + cb_ref[...]   # scale commutes with the
    #                                                  linear; bias added after
    hfin, _ = bilstm(stack_steps(Gc, 4 * H), cwhh_ref[...], False)   # [2B, H]
    final = jnp.concatenate([hfin[0:Bk, :], hfin[Bk:2 * Bk, :]], axis=1)

    logits = jnp.dot(final, ow_ref[...],
                     preferred_element_type=jnp.float32) + ob_ref[...]
    mx = jnp.max(logits, axis=-1, keepdims=True)
    s = logits - mx
    lse = jnp.log(jnp.sum(jnp.exp(s), axis=-1, keepdims=True))
    y_ref[...] = s - lse                 # log_softmax(dim=-1)


# ----------------------------- weight packing (one-time) ---------------------
def _perm_scale_gates(w):
    """PyTorch gate order (i,f,g,o) -> (i,f,o,g); scale g columns by 2 so
    tanh(g) can be recovered from the fused sigmoid as 2*sigmoid(2g)-1."""
    h = w.shape[-1] // 4
    return jnp.concatenate([w[..., 0:2 * h], w[..., 3 * h:4 * h],
                            2.0 * w[..., 2 * h:3 * h]], axis=-1)


def pack_params(raw):
    """Hoisted out of the forward: run ONCE, pass packed arrays to pallas_call."""
    gen, clf = raw['gen_lstm'], raw['clf_lstm']
    wih_all = jnp.concatenate(
        [_perm_scale_gates(gen['wih_f']), _perm_scale_gates(gen['wih_b']),
         _perm_scale_gates(clf['wih_f']), _perm_scale_gates(clf['wih_b'])],
        axis=1)                                                     # [E, 16H]
    gen_whh = jnp.concatenate([_perm_scale_gates(gen['whh_f']),
                               _perm_scale_gates(gen['whh_b'])], axis=1)  # [H,8H]
    clf_whh = jnp.concatenate([_perm_scale_gates(clf['whh_f']),
                               _perm_scale_gates(clf['whh_b'])], axis=1)  # [H,8H]
    gen_b = jnp.concatenate([_perm_scale_gates(gen['b_f']),
                             _perm_scale_gates(gen['b_b'])], axis=1)      # [1,8H]
    clf_b = jnp.concatenate([_perm_scale_gates(clf['b_f']),
                             _perm_scale_gates(clf['b_b'])], axis=1)      # [1,8H]
    kuma_w = jnp.concatenate([raw['kuma']['wa'], raw['kuma']['wb']],
                             axis=0).T                                    # [2H,2]
    kuma_b = jnp.concatenate([raw['kuma']['ba'], raw['kuma']['bb']],
                             axis=1)                                      # [1,2]
    return dict(embed=raw['embed'], wih_all=wih_all,
                gen_whh=gen_whh, gen_b=gen_b,
                clf_whh=clf_whh, clf_b=clf_b,
                kuma_w=kuma_w, kuma_b=kuma_b,
                out_w=raw['out']['w'], out_b=raw['out']['b'])


# ----------------------------- full forward (eval) ---------------------------
@jax.jit
def latent_rationale_forward(x, params):
    """x: [B, T] int32 token ids. params: pre-packed dict from pack_params()."""
    Bx, Tx = x.shape
    mask = (x != PAD_IDX)
    # time-major flat layout (row = t*B + b) keeps all in-kernel ops 2-D
    mask_flat = mask.T.astype(jnp.float32).reshape(Tx * Bx, 1)
    emb_flat = jnp.take(params['embed'], x.T.reshape(-1), axis=0)   # [T*B, E]

    vmem = pl.BlockSpec(memory_space=pltpu.MemorySpace.VMEM)
    y, z_flat = pl.pallas_call(
        _fused_kernel,
        out_shape=(jax.ShapeDtypeStruct((Bx, OUT), jnp.float32),
                   jax.ShapeDtypeStruct((Tx * Bx, 1), jnp.float32)),
        in_specs=[vmem] * 11,
        out_specs=(vmem, vmem),
    )(emb_flat, mask_flat,
      params['wih_all'], params['gen_whh'], params['gen_b'],
      params['kuma_w'], params['kuma_b'],
      params['clf_whh'], params['clf_b'],
      params['out_w'], params['out_b'])

    z = z_flat.reshape(Tx, Bx).T          # back to [B, T]
    return y, z


# ----------------------------- deterministic params --------------------------
def init_params(key):
    keys = iter(jax.random.split(key, 32))

    def unif(shape, bound):
        return jax.random.uniform(next(keys), shape, jnp.float32, -bound, bound)

    embed = 0.1 * jax.random.normal(next(keys), (VOCAB, EMB), jnp.float32)
    embed = embed.at[PAD_IDX].set(0.0)                  # padding_idx = 1

    k_h = 1.0 / math.sqrt(HID)

    def lstm_params():
        # per-direction weights, PyTorch gate order (i, f, g, o), [in, out]
        return dict(
            wih_f=unif((EMB, 4 * HID), k_h), whh_f=unif((HID, 4 * HID), k_h),
            b_f=unif((1, 4 * HID), k_h),
            wih_b=unif((EMB, 4 * HID), k_h), whh_b=unif((HID, 4 * HID), k_h),
            b_b=unif((1, 4 * HID), k_h))

    k_z = 1.0 / math.sqrt(2 * HID)
    kuma = dict(wa=unif((1, 2 * HID), k_z), ba=unif((1, 1), k_z),
                wb=unif((1, 2 * HID), k_z), bb=unif((1, 1), k_z))
    out = dict(w=unif((2 * HID, OUT), k_z), b=unif((1, OUT), k_z))

    return dict(embed=embed, gen_lstm=lstm_params(), clf_lstm=lstm_params(),
                kuma=kuma, out=out)


# ----------------------------------- main -------------------------------------
if __name__ == "__main__":
    key = jax.random.PRNGKey(0)
    kp, kx = jax.random.split(key)
    params = pack_params(init_params(kp))   # one-time packing, outside the jit

    # x: [B, T] token ids; pad the tail of the second sequence with PAD_IDX=1
    x = jax.random.randint(kx, (B, T), 2, VOCAB, dtype=jnp.int32)
    x = x.at[1, T - 3:].set(PAD_IDX)

    y, z = latent_rationale_forward(x, params)
    y = jax.block_until_ready(y)
    z = jax.block_until_ready(z)

    assert y.shape == (B, OUT) and z.shape == (B, T)
    assert bool(jnp.all(jnp.isfinite(y))) and bool(jnp.all(jnp.isfinite(z)))
    # log-softmax rows should (approximately) sum to 1 in prob space
    assert bool(jnp.all(jnp.abs(jnp.sum(jnp.exp(y), axis=-1) - 1.0) < 1e-4))
    # z must be zero at pad positions and in [0, 1] everywhere
    assert bool(jnp.all(z[1, T - 3:] == 0.0))
    assert bool(jnp.all((z >= 0.0) & (z <= 1.0)))
    print("KERNEL_OK")
</pallas_src>

<mosaic_0001>
module attributes {stable_mosaic.version = 11 : i64} {
  func.func @_fused_kernel(%arg0: memref<16x32xf32, #tpu.memory_space<vmem>>, %arg1: memref<16x1xf32, #tpu.memory_space<vmem>>, %arg2: memref<32x512xf32, #tpu.memory_space<vmem>>, %arg3: memref<32x256xf32, #tpu.memory_space<vmem>>, %arg4: memref<1x256xf32, #tpu.memory_space<vmem>>, %arg5: memref<64x2xf32, #tpu.memory_space<vmem>>, %arg6: memref<1x2xf32, #tpu.memory_space<vmem>>, %arg7: memref<32x256xf32, #tpu.memory_space<vmem>>, %arg8: memref<1x256xf32, #tpu.memory_space<vmem>>, %arg9: memref<64x5xf32, #tpu.memory_space<vmem>>, %arg10: memref<1x5xf32, #tpu.memory_space<vmem>>, %arg11: memref<2x5xf32, #tpu.memory_space<vmem>>, %arg12: memref<16x1xf32, #tpu.memory_space<vmem>>) attributes {dimension_semantics = [], scalar_prefetch = 0 : i64, scratch_operands = 0 : i64, tpu.core_type = #tpu.core_type<tc>} {
    %c0 = arith.constant 0 : index
    %c0_0 = arith.constant 0 : index
    %0 = vector.load %arg0[%c0, %c0_0] : memref<16x32xf32, #tpu.memory_space<vmem>>, vector<16x32xf32>
    %c0_1 = arith.constant 0 : index
    %c0_2 = arith.constant 0 : index
    %1 = vector.load %arg1[%c0_1, %c0_2] : memref<16x1xf32, #tpu.memory_space<vmem>>, vector<16x1xf32>
    %2 = tpu.iota {dimensions = array<i32: 0>} : vector<4x128xi32>
    %c2_i32 = arith.constant 2 : i32
    %3 = vector.broadcast %c2_i32 : i32 to vector<4x128xi32>
    %4 = arith.cmpi slt, %2, %3 : vector<4x128xi32>
    %5 = tpu.concatenate %1, %1 in 1 : vector<16x1xf32>, vector<16x1xf32> -> vector<16x2xf32>
    %6 = vector.extract_strided_slice %5 {offsets = [0, 0], sizes = [2, 1], strides = [1, 1]} : vector<16x2xf32> to vector<2x1xf32>
    %7 = vector.extract_strided_slice %5 {offsets = [14, 1], sizes = [2, 1], strides = [1, 1]} : vector<16x2xf32> to vector<2x1xf32>
    %8 = vector.extract_strided_slice %5 {offsets = [2, 0], sizes = [2, 1], strides = [1, 1]} : vector<16x2xf32> to vector<2x1xf32>
    %9 = vector.extract_strided_slice %5 {offsets = [12, 1], sizes = [2, 1], strides = [1, 1]} : vector<16x2xf32> to vector<2x1xf32>
    %10 = vector.extract_strided_slice %5 {offsets = [4, 0], sizes = [2, 1], strides = [1, 1]} : vector<16x2xf32> to vector<2x1xf32>
    %11 = vector.extract_strided_slice %5 {offsets = [10, 1], sizes = [2, 1], strides = [1, 1]} : vector<16x2xf32> to vector<2x1xf32>
    %12 = vector.extract_strided_slice %5 {offsets = [6, 0], sizes = [2, 1], strides = [1, 1]} : vector<16x2xf32> to vector<2x1xf32>
    %13 = vector.extract_strided_slice %5 {offsets = [8, 1], sizes = [2, 1], strides = [1, 1]} : vector<16x2xf32> to vector<2x1xf32>
    %14 = vector.extract_strided_slice %5 {offsets = [8, 0], sizes = [2, 1], strides = [1, 1]} : vector<16x2xf32> to vector<2x1xf32>
    %15 = vector.extract_strided_slice %5 {offsets = [6, 1], sizes = [2, 1], strides = [1, 1]} : vector<16x2xf32> to vector<2x1xf32>
    %16 = vector.extract_strided_slice %5 {offsets = [10, 0], sizes = [2, 1], strides = [1, 1]} : vector<16x2xf32> to vector<2x1xf32>
    %17 = vector.extract_strided_slice %5 {offsets = [4, 1], sizes = [2, 1], strides = [1, 1]} : vector<16x2xf32> to vector<2x1xf32>
    %18 = vector.extract_strided_slice %5 {offsets = [12, 0], sizes = [2, 1], strides = [1, 1]} : vector<16x2xf32> to vector<2x1xf32>
    %19 = vector.extract_strided_slice %5 {offsets = [2, 1], sizes = [2, 1], strides = [1, 1]} : vector<16x2xf32> to vector<2x1xf32>
    %20 = vector.extract_strided_slice %5 {offsets = [14, 0], sizes = [2, 1], strides = [1, 1]} : vector<16x2xf32> to vector<2x1xf32>
    %21 = vector.extract_strided_slice %5 {offsets = [0, 1], sizes = [2, 1], strides = [1, 1]} : vector<16x2xf32> to vector<2x1xf32>
    %22 = tpu.concatenate %6, %7, %8, %9, %10, %11, %12, %13, %14, %15, %16, %17, %18, %19, %20, %21 in 0 : vector<2x1xf32>, vector<2x1xf32>, vector<2x1xf32>, vector<2x1xf32>, vector<2x1xf32>, vector<2x1xf32>, vector<2x1xf32>, vector<2x1xf32>, vector<2x1xf32>, vector<2x1xf32>, vector<2x1xf32>, vector<2x1xf32>, vector<2x1xf32>, vector<2x1xf32>, vector<2x1xf32>, vector<2x1xf32> -> vector<32x1xf32>
    %23 = vector.shape_cast %22 : vector<32x1xf32> to vector<32x1xf32>
    %24 = vector.broadcast %23 : vector<32x1xf32> to vector<32x32xf32>
    %cst = arith.constant 1.000000e+00 : f32
    %25 = vector.broadcast %cst : f32 to vector<32x32xf32>
    %26 = arith.subf %25, %24 : vector<32x32xf32>
    %c0_3 = arith.constant 0 : index
    %c0_4 = arith.constant 0 : index
    %27 = vector.load %arg2[%c0_3, %c0_4] : memref<32x512xf32, #tpu.memory_space<vmem>>, vector<32x512xf32>
    %cst_5 = arith.constant dense<0.000000e+00> : vector<16x512xf32>
    %28 = tpu.matmul %0, %27, %cst_5 {dimension_numbers = #tpu.dot_dimension_numbers<[1], [0], [0], [1], [0, 0, 1, 1], [], []>} : vector<16x32xf32>, vector<32x512xf32>, vector<16x512xf32> -> vector<16x512xf32>
    %29 = vector.extract_strided_slice %28 {offsets = [0, 0], sizes = [16, 256], strides = [1, 1]} : vector<16x512xf32> to vector<16x256xf32>
    %c0_6 = arith.constant 0 : index
    %c0_7 = arith.constant 0 : index
    %30 = vector.load %arg4[%c0_6, %c0_7] : memref<1x256xf32, #tpu.memory_space<vmem>>, vector<1x256xf32>
    %31 = vector.broadcast %30 : vector<1x256xf32> to vector<16x256xf32>
    %32 = arith.addf %29, %31 : vector<16x256xf32>
    %33 = vector.extract_strided_slice %32 {offsets = [0, 0], sizes = [2, 128], strides = [1, 1]} : vector<16x256xf32> to vector<2x128xf32>
    %34 = vector.extract_strided_slice %32 {offsets = [14, 128], sizes = [2, 128], strides = [1, 1]} : vector<16x256xf32> to vector<2x128xf32>
    %35 = vector.extract_strided_slice %32 {offsets = [2, 0], sizes = [2, 128], strides = [1, 1]} : vector<16x256xf32> to vector<2x128xf32>
    %36 = vector.extract_strided_slice %32 {offsets = [12, 128], sizes = [2, 128], strides = [1, 1]} : vector<16x256xf32> to vector<2x128xf32>
    %37 = vector.extract_strided_slice %32 {offsets = [4, 0], sizes = [2, 128], strides = [1, 1]} : vector<16x256xf32> to vector<2x128xf32>
    %38 = vector.extract_strided_slice %32 {offsets = [10, 128], sizes = [2, 128], strides = [1, 1]} : vector<16x256xf32> to vector<2x128xf32>
    %39 = vector.extract_strided_slice %32 {offsets = [6, 0], sizes = [2, 128], strides = [1, 1]} : vector<16x256xf32> to vector<2x128xf32>
    %40 = vector.extract_strided_slice %32 {offsets = [8, 128], sizes = [2, 128], strides = [1, 1]} : vector<16x256xf32> to vector<2x128xf32>
    %41 = vector.extract_strided_slice %32 {offsets = [8, 0], sizes = [2, 128], strides = [1, 1]} : vector<16x256xf32> to vector<2x128xf32>
    %42 = vector.extract_strided_slice %32 {offsets = [6, 128], sizes = [2, 128], strides = [1, 1]} : vector<16x256xf32> to vector<2x128xf32>
    %43 = vector.extract_strided_slice %32 {offsets = [10, 0], sizes = [2, 128], strides = [1, 1]} : vector<16x256xf32> to vector<2x128xf32>
    %44 = vector.extract_strided_slice %32 {offsets = [4, 128], sizes = [2, 128], strides = [1, 1]} : vector<16x256xf32> to vector<2x128xf32>
    %45 = vector.extract_strided_slice %32 {offsets = [12, 0], sizes = [2, 128], strides = [1, 1]} : vector<16x256xf32> to vector<2x128xf32>
    %46 = vector.extract_strided_slice %32 {offsets = [2, 128], sizes = [2, 128], strides = [1, 1]} : vector<16x256xf32> to vector<2x128xf32>
    %47 = vector.extract_strided_slice %32 {offsets = [14, 0], sizes = [2, 128], strides = [1, 1]} : vector<16x256xf32> to vector<2x128xf32>
    %48 = vector.extract_strided_slice %32 {offsets = [0, 128], sizes = [2, 128], strides = [1, 1]} : vector<16x256xf32> to vector<2x128xf32>
    %49 = tpu.concatenate %33, %34, %35, %36, %37, %38, %39, %40, %41, %42, %43, %44, %45, %46, %47, %48 in 0 : vector<2x128xf32>, vector<2x128xf32>, vector<2x128xf32>, vector<2x128xf32>, vector<2x128xf32>, vector<2x128xf32>, vector<2x128xf32>, vector<2x128xf32>, vector<2x128xf32>, vector<2x128xf32>, vector<2x128xf32>, vector<2x128xf32>, vector<2x128xf32>, vector<2x128xf32>, vector<2x128xf32>, vector<2x128xf32> -> vector<32x128xf32>
    %c0_8 = arith.constant 0 : index
    %c0_9 = arith.constant 0 : index
    %50 = vector.load %arg3[%c0_8, %c0_9] : memref<32x256xf32, #tpu.memory_space<vmem>>, vector<32x256xf32>
    %cst_10 = arith.constant 0.000000e+00 : f32
    %51 = vector.broadcast %cst_10 : f32 to vector<4x32xf32>
    %cst_11 = arith.constant 0.000000e+00 : f32
    %52 = vector.broadcast %cst_11 : f32 to vector<4x32xf32>
    %53 = vector.extract_strided_slice %49 {offsets = [0, 0], sizes = [4, 128], strides = [1, 1]} : vector<32x128xf32> to vector<4x128xf32>
    %54 = vector.extract_strided_slice %24 {offsets = [0, 0], sizes = [4, 32], strides = [1, 1]} : vector<32x32xf32> to vector<4x32xf32>
    %55 = vector.extract_strided_slice %26 {offsets = [0, 0], sizes = [4, 32], strides = [1, 1]} : vector<32x32xf32> to vector<4x32xf32>
    %cst_12 = arith.constant dense<0.000000e+00> : vector<4x256xf32>
    %56 = tpu.matmul %51, %50, %cst_12 {dimension_numbers = #tpu.dot_dimension_numbers<[1], [0], [0], [1], [0, 0, 1, 1], [], []>} : vector<4x32xf32>, vector<32x256xf32>, vector<4x256xf32> -> vector<4x256xf32>
    %57 = vector.extract_strided_slice %56 {offsets = [0, 0], sizes = [4, 128], strides = [1, 1]} : vector<4x256xf32> to vector<4x128xf32>
    %58 = vector.extract_strided_slice %56 {offsets = [0, 128], sizes = [4, 128], strides = [1, 1]} : vector<4x256xf32> to vector<4x128xf32>
    %59 = arith.select %4, %57, %58 : vector<4x128xi1>, vector<4x128xf32>
    %60 = arith.addf %53, %59 : vector<4x128xf32>
    %cst_13 = arith.constant 0.000000e+00 : f32
    %61 = vector.broadcast %cst_13 : f32 to vector<4x128xf32>
    %62 = arith.subf %61, %60 : vector<4x128xf32>
    %63 = math.exp %62 : vector<4x128xf32>
    %cst_14 = arith.constant 1.000000e+00 : f32
    %64 = vector.broadcast %cst_14 : f32 to vector<4x128xf32>
    %65 = arith.addf %64, %63 : vector<4x128xf32>
    %66 = tpu.reciprocal %65 {approx = true} : vector<4x128xf32> -> vector<4x128xf32>
    %67 = vector.extract_strided_slice %66 {offsets = [0, 0], sizes = [4, 32], strides = [1, 1]} : vector<4x128xf32> to vector<4x32xf32>
    %68 = vector.extract_strided_slice %66 {offsets = [0, 32], sizes = [4, 32], strides = [1, 1]} : vector<4x128xf32> to vector<4x32xf32>
    %69 = vector.extract_strided_slice %66 {offsets = [0, 64], sizes = [4, 32], strides = [1, 1]} : vector<4x128xf32> to vector<4x32xf32>
    %70 = vector.extract_strided_slice %66 {offsets = [0, 96], sizes = [4, 32], strides = [1, 1]} : vector<4x128xf32> to vector<4x32xf32>
    %cst_15 = arith.constant 2.000000e+00 : f32
    %71 = vector.broadcast %cst_15 : f32 to vector<4x32xf32>
    %72 = arith.mulf %71, %70 : vector<4x32xf32>
    %cst_16 = arith.constant 1.000000e+00 : f32
    %73 = vector.broadcast %cst_16 : f32 to vector<4x32xf32>
    %74 = arith.subf %72, %73 : vector<4x32xf32>
    %75 = arith.mulf %68, %52 : vector<4x32xf32>
    %76 = arith.mulf %67, %74 : vector<4x32xf32>
    %77 = arith.addf %75, %76 : vector<4x32xf32>
    %78 = math.tanh %77 : vector<4x32xf32>
    %79 = arith.mulf %69, %78 : vector<4x32xf32>
    %80 = arith.mulf %54, %79 : vector<4x32xf32>
    %81 = arith.mulf %55, %51 : vector<4x32xf32>
    %82 = arith.addf %80, %81 : vector<4x32xf32>
    %83 = arith.mulf %54, %77 : vector<4x32xf32>
    %84 = arith.mulf %55, %52 : vector<4x32xf32>
    %85 = arith.addf %83, %84 : vector<4x32xf32>
    %86 = arith.mulf %82, %54 : vector<4x32xf32>
    %87 = vector.extract_strided_slice %49 {offsets = [4, 0], sizes = [4, 128], strides = [1, 1]} : vector<32x128xf32> to vector<4x128xf32>
    %88 = vector.extract_strided_slice %24 {offsets = [4, 0], sizes = [4, 32], strides = [1, 1]} : vector<32x32xf32> to vector<4x32xf32>
    %89 = vector.extract_strided_slice %26 {offsets = [4, 0], sizes = [4, 32], strides = [1, 1]} : vector<32x32xf32> to vector<4x32xf32>
    %cst_17 = arith.constant dense<0.000000e+00> : vector<4x256xf32>
    %90 = tpu.matmul %82, %50, %cst_17 {dimension_numbers = #tpu.dot_dimension_numbers<[1], [0], [0], [1], [0, 0, 1, 1], [], []>} : vector<4x32xf32>, vector<32x256xf32>, vector<4x256xf32> -> vector<4x256xf32>
    %91 = vector.extract_strided_slice %90 {offsets = [0, 0], sizes = [4, 128], strides = [1, 1]} : vector<4x256xf32> to vector<4x128xf32>
    %92 = vector.extract_strided_slice %90 {offsets = [0, 128], sizes = [4, 128], strides = [1, 1]} : vector<4x256xf32> to vector<4x128xf32>
    %93 = arith.select %4, %91, %92 : vector<4x128xi1>, vector<4x128xf32>
    %94 = arith.addf %87, %93 : vector<4x128xf32>
    %cst_18 = arith.constant 0.000000e+00 : f32
    %95 = vector.broadcast %cst_18 : f32 to vector<4x128xf32>
    %96 = arith.subf %95, %94 : vector<4x128xf32>
    %97 = math.exp %96 : vector<4x128xf32>
    %cst_19 = arith.constant 1.000000e+00 : f32
    %98 = vector.broadcast %cst_19 : f32 to vector<4x128xf32>
    %99 = arith.addf %98, %97 : vector<4x128xf32>
    %100 = tpu.reciprocal %99 {approx = true} : vector<4x128xf32> -> vector<4x128xf32>
    %101 = vector.extract_strided_slice %100 {offsets = [0, 0], sizes = [4, 32], strides = [1, 1]} : vector<4x128xf32> to vector<4x32xf32>
    %102 = vector.extract_strided_slice %100 {offsets = [0, 32], sizes = [4, 32], strides = [1, 1]} : vector<4x128xf32> to vector<4x32xf32>
    %103 = vector.extract_strided_slice %100 {offsets = [0, 64], sizes = [4, 32], strides = [1, 1]} : vector<4x128xf32> to vector<4x32xf32>
    %104 = vector.extract_strided_slice %100 {offsets = [0, 96], sizes = [4, 32], strides = [1, 1]} : vector<4x128xf32> to vector<4x32xf32>
    %cst_20 = arith.constant 2.000000e+00 : f32
    %105 = vector.broadcast %cst_20 : f32 to vector<4x32xf32>
    %106 = arith.mulf %105, %104 : vector<4x32xf32>
    %cst_21 = arith.constant 1.000000e+00 : f32
    %107 = vector.broadcast %cst_21 : f32 to vector<4x32xf32>
    %108 = arith.subf %106, %107 : vector<4x32xf32>
    %109 = arith.mulf %102, %85 : vector<4x32xf32>
    %110 = arith.mulf %101, %108 : vector<4x32xf32>
    %111 = arith.addf %109, %110 : vector<4x32xf32>
    %112 = math.tanh %111 : vector<4x32xf32>
    %113 = arith.mulf %103, %112 : vector<4x32xf32>
    %114 = arith.mulf %88, %113 : vector<4x32xf32>
    %115 = arith.mulf %89, %82 : vector<4x32xf32>
    %116 = arith.addf %114, %115 : vector<4x32xf32>
    %117 = arith.mulf %88, %111 : vector<4x32xf32>
    %118 = arith.mulf %89, %85 : vector<4x32xf32>
    %119 = arith.addf %117, %118 : vector<4x32xf32>
    %120 = arith.mulf %116, %88 : vector<4x32xf32>
    %121 = vector.extract_strided_slice %49 {offsets = [8, 0], sizes = [4, 128], strides = [1, 1]} : vector<32x128xf32> to vector<4x128xf32>
    %122 = vector.extract_strided_slice %24 {offsets = [8, 0], sizes = [4, 32], strides = [1, 1]} : vector<32x32xf32> to vector<4x32xf32>
    %123 = vector.extract_strided_slice %26 {offsets = [8, 0], sizes = [4, 32], strides = [1, 1]} : vector<32x32xf32> to vector<4x32xf32>
    %cst_22 = arith.constant dense<0.000000e+00> : vector<4x256xf32>
    %124 = tpu.matmul %116, %50, %cst_22 {dimension_numbers = #tpu.dot_dimension_numbers<[1], [0], [0], [1], [0, 0, 1, 1], [], []>} : vector<4x32xf32>, vector<32x256xf32>, vector<4x256xf32> -> vector<4x256xf32>
    %125 = vector.extract_strided_slice %124 {offsets = [0, 0], sizes = [4, 128], strides = [1, 1]} : vector<4x256xf32> to vector<4x128xf32>
    %126 = vector.extract_strided_slice %124 {offsets = [0, 128], sizes = [4, 128], strides = [1, 1]} : vector<4x256xf32> to vector<4x128xf32>
    %127 = arith.select %4, %125, %126 : vector<4x128xi1>, vector<4x128xf32>
    %128 = arith.addf %121, %127 : vector<4x128xf32>
    %cst_23 = arith.constant 0.000000e+00 : f32
    %129 = vector.broadcast %cst_23 : f32 to vector<4x128xf32>
    %130 = arith.subf %129, %128 : vector<4x128xf32>
    %131 = math.exp %130 : vector<4x128xf32>
    %cst_24 = arith.constant 1.000000e+00 : f32
    %132 = vector.broadcast %cst_24 : f32 to vector<4x128xf32>
    %133 = arith.addf %132, %131 : vector<4x128xf32>
    %134 = tpu.reciprocal %133 {approx = true} : vector<4x128xf32> -> vector<4x128xf32>
    %135 = vector.extract_strided_slice %134 {offsets = [0, 0], sizes = [4, 32], strides = [1, 1]} : vector<4x128xf32> to vector<4x32xf32>
    %136 = vector.extract_strided_slice %134 {offsets = [0, 32], sizes = [4, 32], strides = [1, 1]} : vector<4x128xf32> to vector<4x32xf32>
    %137 = vector.extract_strided_slice %134 {offsets = [0, 64], sizes = [4, 32], strides = [1, 1]} : vector<4x128xf32> to vector<4x32xf32>
    %138 = vector.extract_strided_slice %134 {offsets = [0, 96], sizes = [4, 32], strides = [1, 1]} : vector<4x128xf32> to vector<4x32xf32>
    %cst_25 = arith.constant 2.000000e+00 : f32
    %139 = vector.broadcast %cst_25 : f32 to vector<4x32xf32>
    %140 = arith.mulf %139, %138 : vector<4x32xf32>
    %cst_26 = arith.constant 1.000000e+00 : f32
    %141 = vector.broadcast %cst_26 : f32 to vector<4x32xf32>
    %142 = arith.subf %140, %141 : vector<4x32xf32>
    %143 = arith.mulf %136, %119 : vector<4x32xf32>
    %144 = arith.mulf %135, %142 : vector<4x32xf32>
    %145 = arith.addf %143, %144 : vector<4x32xf32>
    %146 = math.tanh %145 : vector<4x32xf32>
    %147 = arith.mulf %137, %146 : vector<4x32xf32>
    %148 = arith.mulf %122, %147 : vector<4x32xf32>
    %149 = arith.mulf %123, %116 : vector<4x32xf32>
    %150 = arith.addf %148, %149 : vector<4x32xf32>
    %151 = arith.mulf %122, %145 : vector<4x32xf32>
    %152 = arith.mulf %123, %119 : vector<4x32xf32>
    %153 = arith.addf %151, %152 : vector<4x32xf32>
    %154 = arith.mulf %150, %122 : vector<4x32xf32>
    %155 = vector.extract_strided_slice %49 {offsets = [12, 0], sizes = [4, 128], strides = [1, 1]} : vector<32x128xf32> to vector<4x128xf32>
    %156 = vector.extract_strided_slice %24 {offsets = [12, 0], sizes = [4, 32], strides = [1, 1]} : vector<32x32xf32> to vector<4x32xf32>
    %157 = vector.extract_strided_slice %26 {offsets = [12, 0], sizes = [4, 32], strides = [1, 1]} : vector<32x32xf32> to vector<4x32xf32>
    %cst_27 = arith.constant dense<0.000000e+00> : vector<4x256xf32>
    %158 = tpu.matmul %150, %50, %cst_27 {dimension_numbers = #tpu.dot_dimension_numbers<[1], [0], [0], [1], [0, 0, 1, 1], [], []>} : vector<4x32xf32>, vector<32x256xf32>, vector<4x256xf32> -> vector<4x256xf32>
    %159 = vector.extract_strided_slice %158 {offsets = [0, 0], sizes = [4, 128], strides = [1, 1]} : vector<4x256xf32> to vector<4x128xf32>
    %160 = vector.extract_strided_slice %158 {offsets = [0, 128], sizes = [4, 128], strides = [1, 1]} : vector<4x256xf32> to vector<4x128xf32>
    %161 = arith.select %4, %159, %160 : vector<4x128xi1>, vector<4x128xf32>
    %162 = arith.addf %155, %161 : vector<4x128xf32>
    %cst_28 = arith.constant 0.000000e+00 : f32
    %163 = vector.broadcast %cst_28 : f32 to vector<4x128xf32>
    %164 = arith.subf %163, %162 : vector<4x128xf32>
    %165 = math.exp %164 : vector<4x128xf32>
    %cst_29 = arith.constant 1.000000e+00 : f32
    %166 = vector.broadcast %cst_29 : f32 to vector<4x128xf32>
    %167 = arith.addf %166, %165 : vector<4x128xf32>
    %168 = tpu.reciprocal %167 {approx = true} : vector<4x128xf32> -> vector<4x128xf32>
    %169 = vector.extract_strided_slice %168 {offsets = [0, 0], sizes = [4, 32], strides = [1, 1]} : vector<4x128xf32> to vector<4x32xf32>
    %170 = vector.extract_strided_slice %168 {offsets = [0, 32], sizes = [4, 32], strides = [1, 1]} : vector<4x128xf32> to vector<4x32xf32>
    %171 = vector.extract_strided_slice %168 {offsets = [0, 64], sizes = [4, 32], strides = [1, 1]} : vector<4x128xf32> to vector<4x32xf32>
    %172 = vector.extract_strided_slice %168 {offsets = [0, 96], sizes = [4, 32], strides = [1, 1]} : vector<4x128xf32> to vector<4x32xf32>
    %cst_30 = arith.constant 2.000000e+00 : f32
    %173 = vector.broadcast %cst_30 : f32 to vector<4x32xf32>
    %174 = arith.mulf %173, %172 : vector<4x32xf32>
    %cst_31 = arith.constant 1.000000e+00 : f32
    %175 = vector.broadcast %cst_31 : f32 to vector<4x32xf32>
    %176 = arith.subf %174, %175 : vector<4x32xf32>
    %177 = arith.mulf %170, %153 : vector<4x32xf32>
    %178 = arith.mulf %169, %176 : vector<4x32xf32>
    %179 = arith.addf %177, %178 : vector<4x32xf32>
    %180 = math.tanh %179 : vector<4x32xf32>
    %181 = arith.mulf %171, %180 : vector<4x32xf32>
    %182 = arith.mulf %156, %181 : vector<4x32xf32>
    %183 = arith.mulf %157, %150 : vector<4x32xf32>
    %184 = arith.addf %182, %183 : vector<4x32xf32>
    %185 = arith.mulf %156, %179 : vector<4x32xf32>
    %186 = arith.mulf %157, %153 : vector<4x32xf32>
    %187 = arith.addf %185, %186 : vector<4x32xf32>
    %188 = arith.mulf %184, %156 : vector<4x32xf32>
    %189 = vector.extract_strided_slice %49 {offsets = [16, 0], sizes = [4, 128], strides = [1, 1]} : vector<32x128xf32> to vector<4x128xf32>
    %190 = vector.extract_strided_slice %24 {offsets = [16, 0], sizes = [4, 32], strides = [1, 1]} : vector<32x32xf32> to vector<4x32xf32>
    %191 = vector.extract_strided_slice %26 {offsets = [16, 0], sizes = [4, 32], strides = [1, 1]} : vector<32x32xf32> to vector<4x32xf32>
    %cst_32 = arith.constant dense<0.000000e+00> : vector<4x256xf32>
    %192 = tpu.matmul %184, %50, %cst_32 {dimension_numbers = #tpu.dot_dimension_numbers<[1], [0], [0], [1], [0, 0, 1, 1], [], []>} : vector<4x32xf32>, vector<32x256xf32>, vector<4x256xf32> -> vector<4x256xf32>
    %193 = vector.extract_strided_slice %192 {offsets = [0, 0], sizes = [4, 128], strides = [1, 1]} : vector<4x256xf32> to vector<4x128xf32>
    %194 = vector.extract_strided_slice %192 {offsets = [0, 128], sizes = [4, 128], strides = [1, 1]} : vector<4x256xf32> to vector<4x128xf32>
    %195 = arith.select %4, %193, %194 : vector<4x128xi1>, vector<4x128xf32>
    %196 = arith.addf %189, %195 : vector<4x128xf32>
    %cst_33 = arith.constant 0.000000e+00 : f32
    %197 = vector.broadcast %cst_33 : f32 to vector<4x128xf32>
    %198 = arith.subf %197, %196 : vector<4x128xf32>
    %199 = math.exp %198 : vector<4x128xf32>
    %cst_34 = arith.constant 1.000000e+00 : f32
    %200 = vector.broadcast %cst_34 : f32 to vector<4x128xf32>
    %201 = arith.addf %200, %199 : vector<4x128xf32>
    %202 = tpu.reciprocal %201 {approx = true} : vector<4x128xf32> -> vector<4x128xf32>
    %203 = vector.extract_strided_slice %202 {offsets = [0, 0], sizes = [4, 32], strides = [1, 1]} : vector<4x128xf32> to vector<4x32xf32>
    %204 = vector.extract_strided_slice %202 {offsets = [0, 32], sizes = [4, 32], strides = [1, 1]} : vector<4x128xf32> to vector<4x32xf32>
    %205 = vector.extract_strided_slice %202 {offsets = [0, 64], sizes = [4, 32], strides = [1, 1]} : vector<4x128xf32> to vector<4x32xf32>
    %206 = vector.extract_strided_slice %202 {offsets = [0, 96], sizes = [4, 32], strides = [1, 1]} : vector<4x128xf32> to vector<4x32xf32>
    %cst_35 = arith.constant 2.000000e+00 : f32
    %207 = vector.broadcast %cst_35 : f32 to vector<4x32xf32>
    %208 = arith.mulf %207, %206 : vector<4x32xf32>
    %cst_36 = arith.constant 1.000000e+00 : f32
    %209 = vector.broadcast %cst_36 : f32 to vector<4x32xf32>
    %210 = arith.subf %208, %209 : vector<4x32xf32>
    %211 = arith.mulf %204, %187 : vector<4x32xf32>
    %212 = arith.mulf %203, %210 : vector<4x32xf32>
    %213 = arith.addf %211, %212 : vector<4x32xf32>
    %214 = math.tanh %213 : vector<4x32xf32>
    %215 = arith.mulf %205, %214 : vector<4x32xf32>
    %216 = arith.mulf %190, %215 : vector<4x32xf32>
    %217 = arith.mulf %191, %184 : vector<4x32xf32>
    %218 = arith.addf %216, %217 : vector<4x32xf32>
    %219 = arith.mulf %190, %213 : vector<4x32xf32>
    %220 = arith.mulf %191, %187 : vector<4x32xf32>
    %221 = arith.addf %219, %220 : vector<4x32xf32>
    %222 = arith.mulf %218, %190 : vector<4x32xf32>
    %223 = vector.extract_strided_slice %49 {offsets = [20, 0], sizes = [4, 128], strides = [1, 1]} : vector<32x128xf32> to vector<4x128xf32>
    %224 = vector.extract_strided_slice %24 {offsets = [20, 0], sizes = [4, 32], strides = [1, 1]} : vector<32x32xf32> to vector<4x32xf32>
    %225 = vector.extract_strided_slice %26 {offsets = [20, 0], sizes = [4, 32], strides = [1, 1]} : vector<32x32xf32> to vector<4x32xf32>
    %cst_37 = arith.constant dense<0.000000e+00> : vector<4x256xf32>
    %226 = tpu.matmul %218, %50, %cst_37 {dimension_numbers = #tpu.dot_dimension_numbers<[1], [0], [0], [1], [0, 0, 1, 1], [], []>} : vector<4x32xf32>, vector<32x256xf32>, vector<4x256xf32> -> vector<4x256xf32>
    %227 = vector.extract_strided_slice %226 {offsets = [0, 0], sizes = [4, 128], strides = [1, 1]} : vector<4x256xf32> to vector<4x128xf32>
    %228 = vector.extract_strided_slice %226 {offsets = [0, 128], sizes = [4, 128], strides = [1, 1]} : vector<4x256xf32> to vector<4x128xf32>
    %229 = arith.select %4, %227, %228 : vector<4x128xi1>, vector<4x128xf32>
    %230 = arith.addf %223, %229 : vector<4x128xf32>
    %cst_38 = arith.constant 0.000000e+00 : f32
    %231 = vector.broadcast %cst_38 : f32 to vector<4x128xf32>
    %232 = arith.subf %231, %230 : vector<4x128xf32>
    %233 = math.exp %232 : vector<4x128xf32>
    %cst_39 = arith.constant 1.000000e+00 : f32
    %234 = vector.broadcast %cst_39 : f32 to vector<4x128xf32>
    %235 = arith.addf %234, %233 : vector<4x128xf32>
    %236 = tpu.reciprocal %235 {approx = true} : vector<4x128xf32> -> vector<4x128xf32>
    %237 = vector.extract_strided_slice %236 {offsets = [0, 0], sizes = [4, 32], strides = [1, 1]} : vector<4x128xf32> to vector<4x32xf32>
    %238 = vector.extract_strided_slice %236 {offsets = [0, 32], sizes = [4, 32], strides = [1, 1]} : vector<4x128xf32> to vector<4x32xf32>
    %239 = vector.extract_strided_slice %236 {offsets = [0, 64], sizes = [4, 32], strides = [1, 1]} : vector<4x128xf32> to vector<4x32xf32>
    %240 = vector.extract_strided_slice %236 {offsets = [0, 96], sizes = [4, 32], strides = [1, 1]} : vector<4x128xf32> to vector<4x32xf32>
    %cst_40 = arith.constant 2.000000e+00 : f32
    %241 = vector.broadcast %cst_40 : f32 to vector<4x32xf32>
    %242 = arith.mulf %241, %240 : vector<4x32xf32>
    %cst_41 = arith.constant 1.000000e+00 : f32
    %243 = vector.broadcast %cst_41 : f32 to vector<4x32xf32>
    %244 = arith.subf %242, %243 : vector<4x32xf32>
    %245 = arith.mulf %238, %221 : vector<4x32xf32>
    %246 = arith.mulf %237, %244 : vector<4x32xf32>
    %247 = arith.addf %245, %246 : vector<4x32xf32>
    %248 = math.tanh %247 : vector<4x32xf32>
    %249 = arith.mulf %239, %248 : vector<4x32xf32>
    %250 = arith.mulf %224, %249 : vector<4x32xf32>
    %251 = arith.mulf %225, %218 : vector<4x32xf32>
    %252 = arith.addf %250, %251 : vector<4x32xf32>
    %253 = arith.mulf %224, %247 : vector<4x32xf32>
    %254 = arith.mulf %225, %221 : vector<4x32xf32>
    %255 = arith.addf %253, %254 : vector<4x32xf32>
    %256 = arith.mulf %252, %224 : vector<4x32xf32>
    %257 = vector.extract_strided_slice %49 {offsets = [24, 0], sizes = [4, 128], strides = [1, 1]} : vector<32x128xf32> to vector<4x128xf32>
    %258 = vector.extract_strided_slice %24 {offsets = [24, 0], sizes = [4, 32], strides = [1, 1]} : vector<32x32xf32> to vector<4x32xf32>
    %259 = vector.extract_strided_slice %26 {offsets = [24, 0], sizes = [4, 32], strides = [1, 1]} : vector<32x32xf32> to vector<4x32xf32>
    %cst_42 = arith.constant dense<0.000000e+00> : vector<4x256xf32>
    %260 = tpu.matmul %252, %50, %cst_42 {dimension_numbers = #tpu.dot_dimension_numbers<[1], [0], [0], [1], [0, 0, 1, 1], [], []>} : vector<4x32xf32>, vector<32x256xf32>, vector<4x256xf32> -> vector<4x256xf32>
    %261 = vector.extract_strided_slice %260 {offsets = [0, 0], sizes = [4, 128], strides = [1, 1]} : vector<4x256xf32> to vector<4x128xf32>
    %262 = vector.extract_strided_slice %260 {offsets = [0, 128], sizes = [4, 128], strides = [1, 1]} : vector<4x256xf32> to vector<4x128xf32>
    %263 = arith.select %4, %261, %262 : vector<4x128xi1>, vector<4x128xf32>
    %264 = arith.addf %257, %263 : vector<4x128xf32>
    %cst_43 = arith.constant 0.000000e+00 : f32
    %265 = vector.broadcast %cst_43 : f32 to vector<4x128xf32>
    %266 = arith.subf %265, %264 : vector<4x128xf32>
    %267 = math.exp %266 : vector<4x128xf32>
    %cst_44 = arith.constant 1.000000e+00 : f32
    %268 = vector.broadcast %cst_44 : f32 to vector<4x128xf32>
    %269 = arith.addf %268, %267 : vector<4x128xf32>
    %270 = tpu.reciprocal %269 {approx = true} : vector<4x128xf32> -> vector<4x128xf32>
    %271 = vector.extract_strided_slice %270 {offsets = [0, 0], sizes = [4, 32], strides = [1, 1]} : vector<4x128xf32> to vector<4x32xf32>
    %272 = vector.extract_strided_slice %270 {offsets = [0, 32], sizes = [4, 32], strides = [1, 1]} : vector<4x128xf32> to vector<4x32xf32>
    %273 = vector.extract_strided_slice %270 {offsets = [0, 64], sizes = [4, 32], strides = [1, 1]} : vector<4x128xf32> to vector<4x32xf32>
    %274 = vector.extract_strided_slice %270 {offsets = [0, 96], sizes = [4, 32], strides = [1, 1]} : vector<4x128xf32> to vector<4x32xf32>
    %cst_45 = arith.constant 2.000000e+00 : f32
    %275 = vector.broadcast %cst_45 : f32 to vector<4x32xf32>
    %276 = arith.mulf %275, %274 : vector<4x32xf32>
    %cst_46 = arith.constant 1.000000e+00 : f32
    %277 = vector.broadcast %cst_46 : f32 to vector<4x32xf32>
    %278 = arith.subf %276, %277 : vector<4x32xf32>
    %279 = arith.mulf %272, %255 : vector<4x32xf32>
    %280 = arith.mulf %271, %278 : vector<4x32xf32>
    %281 = arith.addf %279, %280 : vector<4x32xf32>
    %282 = math.tanh %281 : vector<4x32xf32>
    %283 = arith.mulf %273, %282 : vector<4x32xf32>
    %284 = arith.mulf %258, %283 : vector<4x32xf32>
    %285 = arith.mulf %259, %252 : vector<4x32xf32>
    %286 = arith.addf %284, %285 : vector<4x32xf32>
    %287 = arith.mulf %258, %281 : vector<4x32xf32>
    %288 = arith.mulf %259, %255 : vector<4x32xf32>
    %289 = arith.addf %287, %288 : vector<4x32xf32>
    %290 = arith.mulf %286, %258 : vector<4x32xf32>
    %291 = vector.extract_strided_slice %49 {offsets = [28, 0], sizes = [4, 128], strides = [1, 1]} : vector<32x128xf32> to vector<4x128xf32>
    %292 = vector.extract_strided_slice %24 {offsets = [28, 0], sizes = [4, 32], strides = [1, 1]} : vector<32x32xf32> to vector<4x32xf32>
    %293 = vector.extract_strided_slice %26 {offsets = [28, 0], sizes = [4, 32], strides = [1, 1]} : vector<32x32xf32> to vector<4x32xf32>
    %cst_47 = arith.constant dense<0.000000e+00> : vector<4x256xf32>
    %294 = tpu.matmul %286, %50, %cst_47 {dimension_numbers = #tpu.dot_dimension_numbers<[1], [0], [0], [1], [0, 0, 1, 1], [], []>} : vector<4x32xf32>, vector<32x256xf32>, vector<4x256xf32> -> vector<4x256xf32>
    %295 = vector.extract_strided_slice %294 {offsets = [0, 0], sizes = [4, 128], strides = [1, 1]} : vector<4x256xf32> to vector<4x128xf32>
    %296 = vector.extract_strided_slice %294 {offsets = [0, 128], sizes = [4, 128], strides = [1, 1]} : vector<4x256xf32> to vector<4x128xf32>
    %297 = arith.select %4, %295, %296 : vector<4x128xi1>, vector<4x128xf32>
    %298 = arith.addf %291, %297 : vector<4x128xf32>
    %cst_48 = arith.constant 0.000000e+00 : f32
    %299 = vector.broadcast %cst_48 : f32 to vector<4x128xf32>
    %300 = arith.subf %299, %298 : vector<4x128xf32>
    %301 = math.exp %300 : vector<4x128xf32>
    %cst_49 = arith.constant 1.000000e+00 : f32
    %302 = vector.broadcast %cst_49 : f32 to vector<4x128xf32>
    %303 = arith.addf %302, %301 : vector<4x128xf32>
    %304 = tpu.reciprocal %303 {approx = true} : vector<4x128xf32> -> vector<4x128xf32>
    %305 = vector.extract_strided_slice %304 {offsets = [0, 0], sizes = [4, 32], strides = [1, 1]} : vector<4x128xf32> to vector<4x32xf32>
    %306 = vector.extract_strided_slice %304 {offsets = [0, 32], sizes = [4, 32], strides = [1, 1]} : vector<4x128xf32> to vector<4x32xf32>
    %307 = vector.extract_strided_slice %304 {offsets = [0, 64], sizes = [4, 32], strides = [1, 1]} : vector<4x128xf32> to vector<4x32xf32>
    %308 = vector.extract_strided_slice %304 {offsets = [0, 96], sizes = [4, 32], strides = [1, 1]} : vector<4x128xf32> to vector<4x32xf32>
    %cst_50 = arith.constant 2.000000e+00 : f32
    %309 = vector.broadcast %cst_50 : f32 to vector<4x32xf32>
    %310 = arith.mulf %309, %308 : vector<4x32xf32>
    %cst_51 = arith.constant 1.000000e+00 : f32
    %311 = vector.broadcast %cst_51 : f32 to vector<4x32xf32>
    %312 = arith.subf %310, %311 : vector<4x32xf32>
    %313 = arith.mulf %306, %289 : vector<4x32xf32>
    %314 = arith.mulf %305, %312 : vector<4x32xf32>
    %315 = arith.addf %313, %314 : vector<4x32xf32>
    %316 = math.tanh %315 : vector<4x32xf32>
    %317 = arith.mulf %307, %316 : vector<4x32xf32>
    %318 = arith.mulf %292, %317 : vector<4x32xf32>
    %319 = arith.mulf %293, %286 : vector<4x32xf32>
    %320 = arith.addf %318, %319 : vector<4x32xf32>
    %321 = arith.mulf %320, %292 : vector<4x32xf32>
    %322 = vector.extract_strided_slice %86 {offsets = [0, 0], sizes = [2, 32], strides = [1, 1]} : vector<4x32xf32> to vector<2x32xf32>
    %323 = vector.extract_strided_slice %321 {offsets = [2, 0], sizes = [2, 32], strides = [1, 1]} : vector<4x32xf32> to vector<2x32xf32>
    %324 = tpu.concatenate %322, %323 in 1 : vector<2x32xf32>, vector<2x32xf32> -> vector<2x64xf32>
    %325 = vector.extract_strided_slice %120 {offsets = [0, 0], sizes = [2, 32], strides = [1, 1]} : vector<4x32xf32> to vector<2x32xf32>
    %326 = vector.extract_strided_slice %290 {offsets = [2, 0], sizes = [2, 32], strides = [1, 1]} : vector<4x32xf32> to vector<2x32xf32>
    %327 = tpu.concatenate %325, %326 in 1 : vector<2x32xf32>, vector<2x32xf32> -> vector<2x64xf32>
    %328 = vector.extract_strided_slice %154 {offsets = [0, 0], sizes = [2, 32], strides = [1, 1]} : vector<4x32xf32> to vector<2x32xf32>
    %329 = vector.extract_strided_slice %256 {offsets = [2, 0], sizes = [2, 32], strides = [1, 1]} : vector<4x32xf32> to vector<2x32xf32>
    %330 = tpu.concatenate %328, %329 in 1 : vector<2x32xf32>, vector<2x32xf32> -> vector<2x64xf32>
    %331 = vector.extract_strided_slice %188 {offsets = [0, 0], sizes = [2, 32], strides = [1, 1]} : vector<4x32xf32> to vector<2x32xf32>
    %332 = vector.extract_strided_slice %222 {offsets = [2, 0], sizes = [2, 32], strides = [1, 1]} : vector<4x32xf32> to vector<2x32xf32>
    %333 = tpu.concatenate %331, %332 in 1 : vector<2x32xf32>, vector<2x32xf32> -> vector<2x64xf32>
    %334 = vector.extract_strided_slice %222 {offsets = [0, 0], sizes = [2, 32], strides = [1, 1]} : vector<4x32xf32> to vector<2x32xf32>
    %335 = vector.extract_strided_slice %188 {offsets = [2, 0], sizes = [2, 32], strides = [1, 1]} : vector<4x32xf32> to vector<2x32xf32>
    %336 = tpu.concatenate %334, %335 in 1 : vector<2x32xf32>, vector<2x32xf32> -> vector<2x64xf32>
    %337 = vector.extract_strided_slice %256 {offsets = [0, 0], sizes = [2, 32], strides = [1, 1]} : vector<4x32xf32> to vector<2x32xf32>
    %338 = vector.extract_strided_slice %154 {offsets = [2, 0], sizes = [2, 32], strides = [1, 1]} : vector<4x32xf32> to vector<2x32xf32>
    %339 = tpu.concatenate %337, %338 in 1 : vector<2x32xf32>, vector<2x32xf32> -> vector<2x64xf32>
    %340 = vector.extract_strided_slice %290 {offsets = [0, 0], sizes = [2, 32], strides = [1, 1]} : vector<4x32xf32> to vector<2x32xf32>
    %341 = vector.extract_strided_slice %120 {offsets = [2, 0], sizes = [2, 32], strides = [1, 1]} : vector<4x32xf32> to vector<2x32xf32>
    %342 = tpu.concatenate %340, %341 in 1 : vector<2x32xf32>, vector<2x32xf32> -> vector<2x64xf32>
    %343 = vector.extract_strided_slice %321 {offsets = [0, 0], sizes = [2, 32], strides = [1, 1]} : vector<4x32xf32> to vector<2x32xf32>
    %344 = vector.extract_strided_slice %86 {offsets = [2, 0], sizes = [2, 32], strides = [1, 1]} : vector<4x32xf32> to vector<2x32xf32>
    %345 = tpu.concatenate %343, %344 in 1 : vector<2x32xf32>, vector<2x32xf32> -> vector<2x64xf32>
    %346 = tpu.concatenate %324, %327, %330, %333, %336, %339, %342, %345 in 0 : vector<2x64xf32>, vector<2x64xf32>, vector<2x64xf32>, vector<2x64xf32>, vector<2x64xf32>, vector<2x64xf32>, vector<2x64xf32>, vector<2x64xf32> -> vector<16x64xf32>
    %c0_52 = arith.constant 0 : index
    %c0_53 = arith.constant 0 : index
    %347 = vector.load %arg5[%c0_52, %c0_53] : memref<64x2xf32, #tpu.memory_space<vmem>>, vector<64x2xf32>
    %cst_54 = arith.constant dense<0.000000e+00> : vector<16x2xf32>
    %348 = tpu.matmul %346, %347, %cst_54 {dimension_numbers = #tpu.dot_dimension_numbers<[1], [0], [0], [1], [0, 0, 1, 1], [], []>} : vector<16x64xf32>, vector<64x2xf32>, vector<16x2xf32> -> vector<16x2xf32>
    %c0_55 = arith.constant 0 : index
    %c0_56 = arith.constant 0 : index
    %349 = vector.load %arg6[%c0_55, %c0_56] : memref<1x2xf32, #tpu.memory_space<vmem>>, vector<1x2xf32>
    %350 = vector.broadcast %349 : vector<1x2xf32> to vector<16x2xf32>
    %351 = arith.addf %348, %350 : vector<16x2xf32>
    %cst_57 = arith.constant 2.000000e+01 : f32
    %352 = vector.broadcast %cst_57 : f32 to vector<16x2xf32>
    %353 = arith.cmpf ogt, %351, %352 : vector<16x2xf32>
    %cst_58 = arith.constant 2.000000e+01 : f32
    %354 = vector.broadcast %cst_58 : f32 to vector<16x2xf32>
    %355 = arith.minimumf %351, %354 : vector<16x2xf32>
    %356 = math.exp %355 : vector<16x2xf32>
    %cst_59 = arith.constant 1.000000e+00 : f32
    %357 = vector.broadcast %cst_59 : f32 to vector<16x2xf32>
    %358 = arith.addf %357, %356 : vector<16x2xf32>
    %359 = math.log %358 : vector<16x2xf32>
    %360 = arith.select %353, %351, %359 : vector<16x2xi1>, vector<16x2xf32>
    %cst_60 = arith.constant 9.99999997E-7 : f32
    %cst_61 = arith.constant 1.000000e+02 : f32
    %361 = vector.broadcast %cst_60 : f32 to vector<16x2xf32>
    %362 = arith.maximumf %361, %360 : vector<16x2xf32>
    %363 = vector.broadcast %cst_61 : f32 to vector<16x2xf32>
    %364 = arith.minimumf %363, %362 : vector<16x2xf32>
    %365 = vector.extract_strided_slice %364 {offsets = [0, 0], sizes = [16, 1], strides = [1, 1]} : vector<16x2xf32> to vector<16x1xf32>
    %366 = vector.extract_strided_slice %364 {offsets = [0, 1], sizes = [16, 1], strides = [1, 1]} : vector<16x2xf32> to vector<16x1xf32>
    %cst_62 = arith.constant -2.48490667 : f32
    %367 = vector.broadcast %cst_62 : f32 to vector<16x1xf32>
    %368 = arith.mulf %365, %367 : vector<16x1xf32>
    %369 = math.exp %368 : vector<16x1xf32>
    %cst_63 = arith.constant 1.000000e+00 : f32
    %370 = vector.broadcast %cst_63 : f32 to vector<16x1xf32>
    %371 = arith.subf %370, %369 : vector<16x1xf32>
    %cst_64 = arith.constant 1.000000e-30 : f32
    %372 = vector.broadcast %cst_64 : f32 to vector<16x1xf32>
    %373 = arith.maximumf %371, %372 : vector<16x1xf32>
    %374 = math.log %373 : vector<16x1xf32>
    %375 = arith.mulf %366, %374 : vector<16x1xf32>
    %376 = math.exp %375 : vector<16x1xf32>
    %cst_65 = arith.constant -0.0870113745 : f32
    %377 = vector.broadcast %cst_65 : f32 to vector<16x1xf32>
    %378 = arith.mulf %365, %377 : vector<16x1xf32>
    %379 = math.exp %378 : vector<16x1xf32>
    %cst_66 = arith.constant 1.000000e+00 : f32
    %380 = vector.broadcast %cst_66 : f32 to vector<16x1xf32>
    %381 = arith.subf %380, %379 : vector<16x1xf32>
    %cst_67 = arith.constant 1.000000e-30 : f32
    %382 = vector.broadcast %cst_67 : f32 to vector<16x1xf32>
    %383 = arith.maximumf %381, %382 : vector<16x1xf32>
    %384 = math.log %383 : vector<16x1xf32>
    %385 = arith.mulf %366, %384 : vector<16x1xf32>
    %386 = math.exp %385 : vector<16x1xf32>
    %cst_68 = arith.constant 1.000000e+00 : f32
    %387 = vector.broadcast %cst_68 : f32 to vector<16x1xf32>
    %388 = arith.subf %387, %376 : vector<16x1xf32>
    %389 = arith.subf %376, %386 : vector<16x1xf32>
    %cst_69 = arith.constant 0.000000e+00 : f32
    %390 = vector.broadcast %cst_69 : f32 to vector<16x1xf32>
    %391 = arith.maximumf %389, %390 : vector<16x1xf32>
    %cst_70 = arith.constant 1.000000e+00 : f32
    %392 = vector.broadcast %cst_70 : f32 to vector<16x1xf32>
    %393 = arith.divf %392, %365 : vector<16x1xf32>
    %cst_71 = arith.constant 1.000000e+00 : f32
    %394 = vector.broadcast %cst_71 : f32 to vector<16x1xf32>
    %395 = arith.addf %394, %393 : vector<16x1xf32>
    %396 = arith.addf %395, %366 : vector<16x1xf32>
    %397 = tpu.concatenate %395, %366, %396 in 1 : vector<16x1xf32>, vector<16x1xf32>, vector<16x1xf32> -> vector<16x3xf32>
    %cst_72 = arith.constant 5.000000e-01 : f32
    %398 = vector.broadcast %cst_72 : f32 to vector<16x3xf32>
    %399 = arith.cmpf olt, %397, %398 : vector<16x3xf32>
    %cst_73 = arith.constant 1.000000e+00 : f32
    %400 = vector.broadcast %cst_73 : f32 to vector<16x3xf32>
    %401 = arith.addf %397, %400 : vector<16x3xf32>
    %402 = arith.select %399, %401, %397 : vector<16x3xi1>, vector<16x3xf32>
    %cst_74 = arith.constant 1.000000e+00 : f32
    %403 = vector.broadcast %cst_74 : f32 to vector<16x3xf32>
    %404 = arith.subf %402, %403 : vector<16x3xf32>
    %cst_75 = arith.constant 1.000000e+00 : f32
    %405 = vector.broadcast %cst_75 : f32 to vector<16x3xf32>
    %cst_76 = arith.constant 1.000000e+00 : f32
    %406 = vector.broadcast %cst_76 : f32 to vector<16x3xf32>
    %407 = arith.addf %404, %406 : vector<16x3xf32>
    %cst_77 = arith.constant 676.520386 : f32
    %408 = vector.broadcast %cst_77 : f32 to vector<16x3xf32>
    %409 = arith.divf %408, %407 : vector<16x3xf32>
    %410 = arith.addf %405, %409 : vector<16x3xf32>
    %cst_78 = arith.constant 2.000000e+00 : f32
    %411 = vector.broadcast %cst_78 : f32 to vector<16x3xf32>
    %412 = arith.addf %404, %411 : vector<16x3xf32>
    %cst_79 = arith.constant -1259.13916 : f32
    %413 = vector.broadcast %cst_79 : f32 to vector<16x3xf32>
    %414 = arith.divf %413, %412 : vector<16x3xf32>
    %415 = arith.addf %410, %414 : vector<16x3xf32>
    %cst_80 = arith.constant 3.000000e+00 : f32
    %416 = vector.broadcast %cst_80 : f32 to vector<16x3xf32>
    %417 = arith.addf %404, %416 : vector<16x3xf32>
    %cst_81 = arith.constant 771.323425 : f32
    %418 = vector.broadcast %cst_81 : f32 to vector<16x3xf32>
    %419 = arith.divf %418, %417 : vector<16x3xf32>
    %420 = arith.addf %415, %419 : vector<16x3xf32>
    %cst_82 = arith.constant 4.000000e+00 : f32
    %421 = vector.broadcast %cst_82 : f32 to vector<16x3xf32>
    %422 = arith.addf %404, %421 : vector<16x3xf32>
    %cst_83 = arith.constant -176.615036 : f32
    %423 = vector.broadcast %cst_83 : f32 to vector<16x3xf32>
    %424 = arith.divf %423, %422 : vector<16x3xf32>
    %425 = arith.addf %420, %424 : vector<16x3xf32>
    %cst_84 = arith.constant 5.000000e+00 : f32
    %426 = vector.broadcast %cst_84 : f32 to vector<16x3xf32>
    %427 = arith.addf %404, %426 : vector<16x3xf32>
    %cst_85 = arith.constant 12.5073433 : f32
    %428 = vector.broadcast %cst_85 : f32 to vector<16x3xf32>
    %429 = arith.divf %428, %427 : vector<16x3xf32>
    %430 = arith.addf %425, %429 : vector<16x3xf32>
    %cst_86 = arith.constant 6.000000e+00 : f32
    %431 = vector.broadcast %cst_86 : f32 to vector<16x3xf32>
    %432 = arith.addf %404, %431 : vector<16x3xf32>
    %cst_87 = arith.constant -0.138571098 : f32
    %433 = vector.broadcast %cst_87 : f32 to vector<16x3xf32>
    %434 = arith.divf %433, %432 : vector<16x3xf32>
    %435 = arith.addf %430, %434 : vector<16x3xf32>
    %cst_88 = arith.constant 7.000000e+00 : f32
    %436 = vector.broadcast %cst_88 : f32 to vector<16x3xf32>
    %437 = arith.addf %404, %436 : vector<16x3xf32>
    %cst_89 = arith.constant 9.98436917E-6 : f32
    %438 = vector.broadcast %cst_89 : f32 to vector<16x3xf32>
    %439 = arith.divf %438, %437 : vector<16x3xf32>
    %440 = arith.addf %435, %439 : vector<16x3xf32>
    %cst_90 = arith.constant 8.000000e+00 : f32
    %441 = vector.broadcast %cst_90 : f32 to vector<16x3xf32>
    %442 = arith.addf %404, %441 : vector<16x3xf32>
    %cst_91 = arith.constant 1.50563267E-7 : f32
    %443 = vector.broadcast %cst_91 : f32 to vector<16x3xf32>
    %444 = arith.divf %443, %442 : vector<16x3xf32>
    %445 = arith.addf %440, %444 : vector<16x3xf32>
    %cst_92 = arith.constant 7.000000e+00 : f32
    %446 = vector.broadcast %cst_92 : f32 to vector<16x3xf32>
    %447 = arith.addf %404, %446 : vector<16x3xf32>
    %cst_93 = arith.constant 5.000000e-01 : f32
    %448 = vector.broadcast %cst_93 : f32 to vector<16x3xf32>
    %449 = arith.addf %447, %448 : vector<16x3xf32>
    %cst_94 = arith.constant 5.000000e-01 : f32
    %450 = vector.broadcast %cst_94 : f32 to vector<16x3xf32>
    %451 = arith.addf %404, %450 : vector<16x3xf32>
    %452 = math.log %449 : vector<16x3xf32>
    %453 = arith.mulf %451, %452 : vector<16x3xf32>
    %cst_95 = arith.constant 0.918938517 : f32
    %454 = vector.broadcast %cst_95 : f32 to vector<16x3xf32>
    %455 = arith.addf %454, %453 : vector<16x3xf32>
    %456 = arith.subf %455, %449 : vector<16x3xf32>
    %457 = math.log %445 : vector<16x3xf32>
    %458 = arith.addf %456, %457 : vector<16x3xf32>
    %459 = math.log %397 : vector<16x3xf32>
    %460 = arith.subf %458, %459 : vector<16x3xf32>
    %461 = arith.select %399, %460, %458 : vector<16x3xi1>, vector<16x3xf32>
    %462 = vector.extract_strided_slice %461 {offsets = [0, 0], sizes = [16, 1], strides = [1, 1]} : vector<16x3xf32> to vector<16x1xf32>
    %463 = vector.extract_strided_slice %461 {offsets = [0, 1], sizes = [16, 1], strides = [1, 1]} : vector<16x3xf32> to vector<16x1xf32>
    %464 = arith.addf %462, %463 : vector<16x1xf32>
    %465 = vector.extract_strided_slice %461 {offsets = [0, 2], sizes = [16, 1], strides = [1, 1]} : vector<16x3xf32> to vector<16x1xf32>
    %466 = arith.subf %464, %465 : vector<16x1xf32>
    %467 = math.exp %466 : vector<16x1xf32>
    %468 = arith.mulf %366, %467 : vector<16x1xf32>
    %cst_96 = arith.constant 1.200000e+00 : f32
    %469 = vector.broadcast %cst_96 : f32 to vector<16x1xf32>
    %470 = arith.mulf %468, %469 : vector<16x1xf32>
    %cst_97 = arith.constant -1.000000e-01 : f32
    %471 = vector.broadcast %cst_97 : f32 to vector<16x1xf32>
    %472 = arith.addf %470, %471 : vector<16x1xf32>
    %cst_98 = arith.constant 0.000000e+00 : f32
    %cst_99 = arith.constant 1.000000e+00 : f32
    %473 = vector.broadcast %cst_98 : f32 to vector<16x1xf32>
    %474 = arith.maximumf %473, %472 : vector<16x1xf32>
    %475 = vector.broadcast %cst_99 : f32 to vector<16x1xf32>
    %476 = arith.minimumf %475, %474 : vector<16x1xf32>
    %477 = arith.cmpf ogt, %388, %386 : vector<16x1xf32>
    %cst_100 = arith.constant 0.000000e+00 : f32
    %cst_101 = arith.constant 1.000000e+00 : f32
    %478 = vector.broadcast %cst_100 : f32 to vector<16x1xf32>
    %479 = vector.broadcast %cst_101 : f32 to vector<16x1xf32>
    %480 = arith.select %477, %478, %479 : vector<16x1xi1>, vector<16x1xf32>
    %481 = arith.cmpf ogt, %391, %388 : vector<16x1xf32>
    %482 = arith.cmpf ogt, %391, %386 : vector<16x1xf32>
    %483 = arith.andi %481, %482 : vector<16x1xi1>
    %484 = arith.select %483, %476, %480 : vector<16x1xi1>, vector<16x1xf32>
    %cst_102 = arith.constant 5.000000e-01 : f32
    %485 = vector.broadcast %cst_102 : f32 to vector<16x1xf32>
    %486 = arith.cmpf ogt, %1, %485 : vector<16x1xf32>
    %cst_103 = arith.constant 0.000000e+00 : f32
    %487 = vector.broadcast %cst_103 : f32 to vector<16x1xf32>
    %488 = arith.select %486, %484, %487 : vector<16x1xi1>, vector<16x1xf32>
    %c0_104 = arith.constant 0 : index
    %c0_105 = arith.constant 0 : index
    %489 = vector.load %arg12[%c0_104, %c0_105] : memref<16x1xf32, #tpu.memory_space<vmem>>, vector<16x1xf32>
    tpu.vector_store %arg12[%c0_104, %c0_105], %488 {strides = array<i32>} : memref<16x1xf32, #tpu.memory_space<vmem>>, vector<16x1xf32>,
    %490 = arith.mulf %1, %488 : vector<16x1xf32>
    %491 = vector.extract_strided_slice %28 {offsets = [0, 256], sizes = [16, 256], strides = [1, 1]} : vector<16x512xf32> to vector<16x256xf32>
    %492 = vector.broadcast %490 : vector<16x1xf32> to vector<16x256xf32>
    %493 = arith.mulf %491, %492 : vector<16x256xf32>
    %c0_106 = arith.constant 0 : index
    %c0_107 = arith.constant 0 : index
    %494 = vector.load %arg8[%c0_106, %c0_107] : memref<1x256xf32, #tpu.memory_space<vmem>>, vector<1x256xf32>
    %495 = vector.broadcast %494 : vector<1x256xf32> to vector<16x256xf32>
    %496 = arith.addf %493, %495 : vector<16x256xf32>
    %497 = vector.extract_strided_slice %496 {offsets = [0, 0], sizes = [2, 128], strides = [1, 1]} : vector<16x256xf32> to vector<2x128xf32>
    %498 = vector.extract_strided_slice %496 {offsets = [14, 128], sizes = [2, 128], strides = [1, 1]} : vector<16x256xf32> to vector<2x128xf32>
    %499 = vector.extract_strided_slice %496 {offsets = [2, 0], sizes = [2, 128], strides = [1, 1]} : vector<16x256xf32> to vector<2x128xf32>
    %500 = vector.extract_strided_slice %496 {offsets = [12, 128], sizes = [2, 128], strides = [1, 1]} : vector<16x256xf32> to vector<2x128xf32>
    %501 = vector.extract_strided_slice %496 {offsets = [4, 0], sizes = [2, 128], strides = [1, 1]} : vector<16x256xf32> to vector<2x128xf32>
    %502 = vector.extract_strided_slice %496 {offsets = [10, 128], sizes = [2, 128], strides = [1, 1]} : vector<16x256xf32> to vector<2x128xf32>
    %503 = vector.extract_strided_slice %496 {offsets = [6, 0], sizes = [2, 128], strides = [1, 1]} : vector<16x256xf32> to vector<2x128xf32>
    %504 = vector.extract_strided_slice %496 {offsets = [8, 128], sizes = [2, 128], strides = [1, 1]} : vector<16x256xf32> to vector<2x128xf32>
    %505 = vector.extract_strided_slice %496 {offsets = [8, 0], sizes = [2, 128], strides = [1, 1]} : vector<16x256xf32> to vector<2x128xf32>
    %506 = vector.extract_strided_slice %496 {offsets = [6, 128], sizes = [2, 128], strides = [1, 1]} : vector<16x256xf32> to vector<2x128xf32>
    %507 = vector.extract_strided_slice %496 {offsets = [10, 0], sizes = [2, 128], strides = [1, 1]} : vector<16x256xf32> to vector<2x128xf32>
    %508 = vector.extract_strided_slice %496 {offsets = [4, 128], sizes = [2, 128], strides = [1, 1]} : vector<16x256xf32> to vector<2x128xf32>
    %509 = vector.extract_strided_slice %496 {offsets = [12, 0], sizes = [2, 128], strides = [1, 1]} : vector<16x256xf32> to vector<2x128xf32>
    %510 = vector.extract_strided_slice %496 {offsets = [2, 128], sizes = [2, 128], strides = [1, 1]} : vector<16x256xf32> to vector<2x128xf32>
    %511 = vector.extract_strided_slice %496 {offsets = [14, 0], sizes = [2, 128], strides = [1, 1]} : vector<16x256xf32> to vector<2x128xf32>
    %512 = vector.extract_strided_slice %496 {offsets = [0, 128], sizes = [2, 128], strides = [1, 1]} : vector<16x256xf32> to vector<2x128xf32>
    %513 = tpu.concatenate %497, %498, %499, %500, %501, %502, %503, %504, %505, %506, %507, %508, %509, %510, %511, %512 in 0 : vector<2x128xf32>, vector<2x128xf32>, vector<2x128xf32>, vector<2x128xf32>, vector<2x128xf32>, vector<2x128xf32>, vector<2x128xf32>, vector<2x128xf32>, vector<2x128xf32>, vector<2x128xf32>, vector<2x128xf32>, vector<2x128xf32>, vector<2x128xf32>, vector<2x128xf32>, vector<2x128xf32>, vector<2x128xf32> -> vector<32x128xf32>
    %c0_108 = arith.constant 0 : index
    %c0_109 = arith.constant 0 : index
    %514 = vector.load %arg7[%c0_108, %c0_109] : memref<32x256xf32, #tpu.memory_space<vmem>>, vector<32x256xf32>
    %cst_110 = arith.constant 0.000000e+00 : f32
    %515 = vector.broadcast %cst_110 : f32 to vector<4x32xf32>
    %cst_111 = arith.constant 0.000000e+00 : f32
    %516 = vector.broadcast %cst_111 : f32 to vector<4x32xf32>
    %517 = vector.extract_strided_slice %513 {offsets = [0, 0], sizes = [4, 128], strides = [1, 1]} : vector<32x128xf32> to vector<4x128xf32>
    %518 = vector.extract_strided_slice %24 {offsets = [0, 0], sizes = [4, 32], strides = [1, 1]} : vector<32x32xf32> to vector<4x32xf32>
    %519 = vector.extract_strided_slice %26 {offsets = [0, 0], sizes = [4, 32], strides = [1, 1]} : vector<32x32xf32> to vector<4x32xf32>
    %cst_112 = arith.constant dense<0.000000e+00> : vector<4x256xf32>
    %520 = tpu.matmul %515, %514, %cst_112 {dimension_numbers = #tpu.dot_dimension_numbers<[1], [0], [0], [1], [0, 0, 1, 1], [], []>} : vector<4x32xf32>, vector<32x256xf32>, vector<4x256xf32> -> vector<4x256xf32>
    %521 = vector.extract_strided_slice %520 {offsets = [0, 0], sizes = [4, 128], strides = [1, 1]} : vector<4x256xf32> to vector<4x128xf32>
    %522 = vector.extract_strided_slice %520 {offsets = [0, 128], sizes = [4, 128], strides = [1, 1]} : vector<4x256xf32> to vector<4x128xf32>
    %523 = arith.select %4, %521, %522 : vector<4x128xi1>, vector<4x128xf32>
    %524 = arith.addf %517, %523 : vector<4x128xf32>
    %cst_113 = arith.constant 0.000000e+00 : f32
    %525 = vector.broadcast %cst_113 : f32 to vector<4x128xf32>
    %526 = arith.subf %525, %524 : vector<4x128xf32>
    %527 = math.exp %526 : vector<4x128xf32>
    %cst_114 = arith.constant 1.000000e+00 : f32
    %528 = vector.broadcast %cst_114 : f32 to vector<4x128xf32>
    %529 = arith.addf %528, %527 : vector<4x128xf32>
    %530 = tpu.reciprocal %529 {approx = true} : vector<4x128xf32> -> vector<4x128xf32>
    %531 = vector.extract_strided_slice %530 {offsets = [0, 0], sizes = [4, 32], strides = [1, 1]} : vector<4x128xf32> to vector<4x32xf32>
    %532 = vector.extract_strided_slice %530 {offsets = [0, 32], sizes = [4, 32], strides = [1, 1]} : vector<4x128xf32> to vector<4x32xf32>
    %533 = vector.extract_strided_slice %530 {offsets = [0, 64], sizes = [4, 32], strides = [1, 1]} : vector<4x128xf32> to vector<4x32xf32>
    %534 = vector.extract_strided_slice %530 {offsets = [0, 96], sizes = [4, 32], strides = [1, 1]} : vector<4x128xf32> to vector<4x32xf32>
    %cst_115 = arith.constant 2.000000e+00 : f32
    %535 = vector.broadcast %cst_115 : f32 to vector<4x32xf32>
    %536 = arith.mulf %535, %534 : vector<4x32xf32>
    %cst_116 = arith.constant 1.000000e+00 : f32
    %537 = vector.broadcast %cst_116 : f32 to vector<4x32xf32>
    %538 = arith.subf %536, %537 : vector<4x32xf32>
    %539 = arith.mulf %532, %516 : vector<4x32xf32>
    %540 = arith.mulf %531, %538 : vector<4x32xf32>
    %541 = arith.addf %539, %540 : vector<4x32xf32>
    %542 = math.tanh %541 : vector<4x32xf32>
    %543 = arith.mulf %533, %542 : vector<4x32xf32>
    %544 = arith.mulf %518, %543 : vector<4x32xf32>
    %545 = arith.mulf %519, %515 : vector<4x32xf32>
    %546 = arith.addf %544, %545 : vector<4x32xf32>
    %547 = arith.mulf %518, %541 : vector<4x32xf32>
    %548 = arith.mulf %519, %516 : vector<4x32xf32>
    %549 = arith.addf %547, %548 : vector<4x32xf32>
    %550 = vector.extract_strided_slice %513 {offsets = [4, 0], sizes = [4, 128], strides = [1, 1]} : vector<32x128xf32> to vector<4x128xf32>
    %551 = vector.extract_strided_slice %24 {offsets = [4, 0], sizes = [4, 32], strides = [1, 1]} : vector<32x32xf32> to vector<4x32xf32>
    %552 = vector.extract_strided_slice %26 {offsets = [4, 0], sizes = [4, 32], strides = [1, 1]} : vector<32x32xf32> to vector<4x32xf32>
    %cst_117 = arith.constant dense<0.000000e+00> : vector<4x256xf32>
    %553 = tpu.matmul %546, %514, %cst_117 {dimension_numbers = #tpu.dot_dimension_numbers<[1], [0], [0], [1], [0, 0, 1, 1], [], []>} : vector<4x32xf32>, vector<32x256xf32>, vector<4x256xf32> -> vector<4x256xf32>
    %554 = vector.extract_strided_slice %553 {offsets = [0, 0], sizes = [4, 128], strides = [1, 1]} : vector<4x256xf32> to vector<4x128xf32>
    %555 = vector.extract_strided_slice %553 {offsets = [0, 128], sizes = [4, 128], strides = [1, 1]} : vector<4x256xf32> to vector<4x128xf32>
    %556 = arith.select %4, %554, %555 : vector<4x128xi1>, vector<4x128xf32>
    %557 = arith.addf %550, %556 : vector<4x128xf32>
    %cst_118 = arith.constant 0.000000e+00 : f32
    %558 = vector.broadcast %cst_118 : f32 to vector<4x128xf32>
    %559 = arith.subf %558, %557 : vector<4x128xf32>
    %560 = math.exp %559 : vector<4x128xf32>
    %cst_119 = arith.constant 1.000000e+00 : f32
    %561 = vector.broadcast %cst_119 : f32 to vector<4x128xf32>
    %562 = arith.addf %561, %560 : vector<4x128xf32>
    %563 = tpu.reciprocal %562 {approx = true} : vector<4x128xf32> -> vector<4x128xf32>
    %564 = vector.extract_strided_slice %563 {offsets = [0, 0], sizes = [4, 32], strides = [1, 1]} : vector<4x128xf32> to vector<4x32xf32>
    %565 = vector.extract_strided_slice %563 {offsets = [0, 32], sizes = [4, 32], strides = [1, 1]} : vector<4x128xf32> to vector<4x32xf32>
    %566 = vector.extract_strided_slice %563 {offsets = [0, 64], sizes = [4, 32], strides = [1, 1]} : vector<4x128xf32> to vector<4x32xf32>
    %567 = vector.extract_strided_slice %563 {offsets = [0, 96], sizes = [4, 32], strides = [1, 1]} : vector<4x128xf32> to vector<4x32xf32>
    %cst_120 = arith.constant 2.000000e+00 : f32
    %568 = vector.broadcast %cst_120 : f32 to vector<4x32xf32>
    %569 = arith.mulf %568, %567 : vector<4x32xf32>
    %cst_121 = arith.constant 1.000000e+00 : f32
    %570 = vector.broadcast %cst_121 : f32 to vector<4x32xf32>
    %571 = arith.subf %569, %570 : vector<4x32xf32>
    %572 = arith.mulf %565, %549 : vector<4x32xf32>
    %573 = arith.mulf %564, %571 : vector<4x32xf32>
    %574 = arith.addf %572, %573 : vector<4x32xf32>
    %575 = math.tanh %574 : vector<4x32xf32>
    %576 = arith.mulf %566, %575 : vector<4x32xf32>
    %577 = arith.mulf %551, %576 : vector<4x32xf32>
    %578 = arith.mulf %552, %546 : vector<4x32xf32>
    %579 = arith.addf %577, %578 : vector<4x32xf32>
    %580 = arith.mulf %551, %574 : vector<4x32xf32>
    %581 = arith.mulf %552, %549 : vector<4x32xf32>
    %582 = arith.addf %580, %581 : vector<4x32xf32>
    %583 = vector.extract_strided_slice %513 {offsets = [8, 0], sizes = [4, 128], strides = [1, 1]} : vector<32x128xf32> to vector<4x128xf32>
    %584 = vector.extract_strided_slice %24 {offsets = [8, 0], sizes = [4, 32], strides = [1, 1]} : vector<32x32xf32> to vector<4x32xf32>
    %585 = vector.extract_strided_slice %26 {offsets = [8, 0], sizes = [4, 32], strides = [1, 1]} : vector<32x32xf32> to vector<4x32xf32>
    %cst_122 = arith.constant dense<0.000000e+00> : vector<4x256xf32>
    %586 = tpu.matmul %579, %514, %cst_122 {dimension_numbers = #tpu.dot_dimension_numbers<[1], [0], [0], [1], [0, 0, 1, 1], [], []>} : vector<4x32xf32>, vector<32x256xf32>, vector<4x256xf32> -> vector<4x256xf32>
    %587 = vector.extract_strided_slice %586 {offsets = [0, 0], sizes = [4, 128], strides = [1, 1]} : vector<4x256xf32> to vector<4x128xf32>
    %588 = vector.extract_strided_slice %586 {offsets = [0, 128], sizes = [4, 128], strides = [1, 1]} : vector<4x256xf32> to vector<4x128xf32>
    %589 = arith.select %4, %587, %588 : vector<4x128xi1>, vector<4x128xf32>
    %590 = arith.addf %583, %589 : vector<4x128xf32>
    %cst_123 = arith.constant 0.000000e+00 : f32
    %591 = vector.broadcast %cst_123 : f32 to vector<4x128xf32>
    %592 = arith.subf %591, %590 : vector<4x128xf32>
    %593 = math.exp %592 : vector<4x128xf32>
    %cst_124 = arith.constant 1.000000e+00 : f32
    %594 = vector.broadcast %cst_124 : f32 to vector<4x128xf32>
    %595 = arith.addf %594, %593 : vector<4x128xf32>
    %596 = tpu.reciprocal %595 {approx = true} : vector<4x128xf32> -> vector<4x128xf32>
    %597 = vector.extract_strided_slice %596 {offsets = [0, 0], sizes = [4, 32], strides = [1, 1]} : vector<4x128xf32> to vector<4x32xf32>
    %598 = vector.extract_strided_slice %596 {offsets = [0, 32], sizes = [4, 32], strides = [1, 1]} : vector<4x128xf32> to vector<4x32xf32>
    %599 = vector.extract_strided_slice %596 {offsets = [0, 64], sizes = [4, 32], strides = [1, 1]} : vector<4x128xf32> to vector<4x32xf32>
    %600 = vector.extract_strided_slice %596 {offsets = [0, 96], sizes = [4, 32], strides = [1, 1]} : vector<4x128xf32> to vector<4x32xf32>
    %cst_125 = arith.constant 2.000000e+00 : f32
    %601 = vector.broadcast %cst_125 : f32 to vector<4x32xf32>
    %602 = arith.mulf %601, %600 : vector<4x32xf32>
    %cst_126 = arith.constant 1.000000e+00 : f32
    %603 = vector.broadcast %cst_126 : f32 to vector<4x32xf32>
    %604 = arith.subf %602, %603 : vector<4x32xf32>
    %605 = arith.mulf %598, %582 : vector<4x32xf32>
    %606 = arith.mulf %597, %604 : vector<4x32xf32>
    %607 = arith.addf %605, %606 : vector<4x32xf32>
    %608 = math.tanh %607 : vector<4x32xf32>
    %609 = arith.mulf %599, %608 : vector<4x32xf32>
    %610 = arith.mulf %584, %609 : vector<4x32xf32>
    %611 = arith.mulf %585, %579 : vector<4x32xf32>
    %612 = arith.addf %610, %611 : vector<4x32xf32>
    %613 = arith.mulf %584, %607 : vector<4x32xf32>
    %614 = arith.mulf %585, %582 : vector<4x32xf32>
    %615 = arith.addf %613, %614 : vector<4x32xf32>
    %616 = vector.extract_strided_slice %513 {offsets = [12, 0], sizes = [4, 128], strides = [1, 1]} : vector<32x128xf32> to vector<4x128xf32>
    %617 = vector.extract_strided_slice %24 {offsets = [12, 0], sizes = [4, 32], strides = [1, 1]} : vector<32x32xf32> to vector<4x32xf32>
    %618 = vector.extract_strided_slice %26 {offsets = [12, 0], sizes = [4, 32], strides = [1, 1]} : vector<32x32xf32> to vector<4x32xf32>
    %cst_127 = arith.constant dense<0.000000e+00> : vector<4x256xf32>
    %619 = tpu.matmul %612, %514, %cst_127 {dimension_numbers = #tpu.dot_dimension_numbers<[1], [0], [0], [1], [0, 0, 1, 1], [], []>} : vector<4x32xf32>, vector<32x256xf32>, vector<4x256xf32> -> vector<4x256xf32>
    %620 = vector.extract_strided_slice %619 {offsets = [0, 0], sizes = [4, 128], strides = [1, 1]} : vector<4x256xf32> to vector<4x128xf32>
    %621 = vector.extract_strided_slice %619 {offsets = [0, 128], sizes = [4, 128], strides = [1, 1]} : vector<4x256xf32> to vector<4x128xf32>
    %622 = arith.select %4, %620, %621 : vector<4x128xi1>, vector<4x128xf32>
    %623 = arith.addf %616, %622 : vector<4x128xf32>
    %cst_128 = arith.constant 0.000000e+00 : f32
    %624 = vector.broadcast %cst_128 : f32 to vector<4x128xf32>
    %625 = arith.subf %624, %623 : vector<4x128xf32>
    %626 = math.exp %625 : vector<4x128xf32>
    %cst_129 = arith.constant 1.000000e+00 : f32
    %627 = vector.broadcast %cst_129 : f32 to vector<4x128xf32>
    %628 = arith.addf %627, %626 : vector<4x128xf32>
    %629 = tpu.reciprocal %628 {approx = true} : vector<4x128xf32> -> vector<4x128xf32>
    %630 = vector.extract_strided_slice %629 {offsets = [0, 0], sizes = [4, 32], strides = [1, 1]} : vector<4x128xf32> to vector<4x32xf32>
    %631 = vector.extract_strided_slice %629 {offsets = [0, 32], sizes = [4, 32], strides = [1, 1]} : vector<4x128xf32> to vector<4x32xf32>
    %632 = vector.extract_strided_slice %629 {offsets = [0, 64], sizes = [4, 32], strides = [1, 1]} : vector<4x128xf32> to vector<4x32xf32>
    %633 = vector.extract_strided_slice %629 {offsets = [0, 96], sizes = [4, 32], strides = [1, 1]} : vector<4x128xf32> to vector<4x32xf32>
    %cst_130 = arith.constant 2.000000e+00 : f32
    %634 = vector.broadcast %cst_130 : f32 to vector<4x32xf32>
    %635 = arith.mulf %634, %633 : vector<4x32xf32>
    %cst_131 = arith.constant 1.000000e+00 : f32
    %636 = vector.broadcast %cst_131 : f32 to vector<4x32xf32>
    %637 = arith.subf %635, %636 : vector<4x32xf32>
    %638 = arith.mulf %631, %615 : vector<4x32xf32>
    %639 = arith.mulf %630, %637 : vector<4x32xf32>
    %640 = arith.addf %638, %639 : vector<4x32xf32>
    %641 = math.tanh %640 : vector<4x32xf32>
    %642 = arith.mulf %632, %641 : vector<4x32xf32>
    %643 = arith.mulf %617, %642 : vector<4x32xf32>
    %644 = arith.mulf %618, %612 : vector<4x32xf32>
    %645 = arith.addf %643, %644 : vector<4x32xf32>
    %646 = arith.mulf %617, %640 : vector<4x32xf32>
    %647 = arith.mulf %618, %615 : vector<4x32xf32>
    %648 = arith.addf %646, %647 : vector<4x32xf32>
    %649 = vector.extract_strided_slice %513 {offsets = [16, 0], sizes = [4, 128], strides = [1, 1]} : vector<32x128xf32> to vector<4x128xf32>
    %650 = vector.extract_strided_slice %24 {offsets = [16, 0], sizes = [4, 32], strides = [1, 1]} : vector<32x32xf32> to vector<4x32xf32>
    %651 = vector.extract_strided_slice %26 {offsets = [16, 0], sizes = [4, 32], strides = [1, 1]} : vector<32x32xf32> to vector<4x32xf32>
    %cst_132 = arith.constant dense<0.000000e+00> : vector<4x256xf32>
    %652 = tpu.matmul %645, %514, %cst_132 {dimension_numbers = #tpu.dot_dimension_numbers<[1], [0], [0], [1], [0, 0, 1, 1], [], []>} : vector<4x32xf32>, vector<32x256xf32>, vector<4x256xf32> -> vector<4x256xf32>
    %653 = vector.extract_strided_slice %652 {offsets = [0, 0], sizes = [4, 128], strides = [1, 1]} : vector<4x256xf32> to vector<4x128xf32>
    %654 = vector.extract_strided_slice %652 {offsets = [0, 128], sizes = [4, 128], strides = [1, 1]} : vector<4x256xf32> to vector<4x128xf32>
    %655 = arith.select %4, %653, %654 : vector<4x128xi1>, vector<4x128xf32>
    %656 = arith.addf %649, %655 : vector<4x128xf32>
    %cst_133 = arith.constant 0.000000e+00 : f32
    %657 = vector.broadcast %cst_133 : f32 to vector<4x128xf32>
    %658 = arith.subf %657, %656 : vector<4x128xf32>
    %659 = math.exp %658 : vector<4x128xf32>
    %cst_134 = arith.constant 1.000000e+00 : f32
    %660 = vector.broadcast %cst_134 : f32 to vector<4x128xf32>
    %661 = arith.addf %660, %659 : vector<4x128xf32>
    %662 = tpu.reciprocal %661 {approx = true} : vector<4x128xf32> -> vector<4x128xf32>
    %663 = vector.extract_strided_slice %662 {offsets = [0, 0], sizes = [4, 32], strides = [1, 1]} : vector<4x128xf32> to vector<4x32xf32>
    %664 = vector.extract_strided_slice %662 {offsets = [0, 32], sizes = [4, 32], strides = [1, 1]} : vector<4x128xf32> to vector<4x32xf32>
    %665 = vector.extract_strided_slice %662 {offsets = [0, 64], sizes = [4, 32], strides = [1, 1]} : vector<4x128xf32> to vector<4x32xf32>
    %666 = vector.extract_strided_slice %662 {offsets = [0, 96], sizes = [4, 32], strides = [1, 1]} : vector<4x128xf32> to vector<4x32xf32>
    %cst_135 = arith.constant 2.000000e+00 : f32
    %667 = vector.broadcast %cst_135 : f32 to vector<4x32xf32>
    %668 = arith.mulf %667, %666 : vector<4x32xf32>
    %cst_136 = arith.constant 1.000000e+00 : f32
    %669 = vector.broadcast %cst_136 : f32 to vector<4x32xf32>
    %670 = arith.subf %668, %669 : vector<4x32xf32>
    %671 = arith.mulf %664, %648 : vector<4x32xf32>
    %672 = arith.mulf %663, %670 : vector<4x32xf32>
    %673 = arith.addf %671, %672 : vector<4x32xf32>
    %674 = math.tanh %673 : vector<4x32xf32>
    %675 = arith.mulf %665, %674 : vector<4x32xf32>
    %676 = arith.mulf %650, %675 : vector<4x32xf32>
    %677 = arith.mulf %651, %645 : vector<4x32xf32>
    %678 = arith.addf %676, %677 : vector<4x32xf32>
    %679 = arith.mulf %650, %673 : vector<4x32xf32>
    %680 = arith.mulf %651, %648 : vector<4x32xf32>
    %681 = arith.addf %679, %680 : vector<4x32xf32>
    %682 = vector.extract_strided_slice %513 {offsets = [20, 0], sizes = [4, 128], strides = [1, 1]} : vector<32x128xf32> to vector<4x128xf32>
    %683 = vector.extract_strided_slice %24 {offsets = [20, 0], sizes = [4, 32], strides = [1, 1]} : vector<32x32xf32> to vector<4x32xf32>
    %684 = vector.extract_strided_slice %26 {offsets = [20, 0], sizes = [4, 32], strides = [1, 1]} : vector<32x32xf32> to vector<4x32xf32>
    %cst_137 = arith.constant dense<0.000000e+00> : vector<4x256xf32>
    %685 = tpu.matmul %678, %514, %cst_137 {dimension_numbers = #tpu.dot_dimension_numbers<[1], [0], [0], [1], [0, 0, 1, 1], [], []>} : vector<4x32xf32>, vector<32x256xf32>, vector<4x256xf32> -> vector<4x256xf32>
    %686 = vector.extract_strided_slice %685 {offsets = [0, 0], sizes = [4, 128], strides = [1, 1]} : vector<4x256xf32> to vector<4x128xf32>
    %687 = vector.extract_strided_slice %685 {offsets = [0, 128], sizes = [4, 128], strides = [1, 1]} : vector<4x256xf32> to vector<4x128xf32>
    %688 = arith.select %4, %686, %687 : vector<4x128xi1>, vector<4x128xf32>
    %689 = arith.addf %682, %688 : vector<4x128xf32>
    %cst_138 = arith.constant 0.000000e+00 : f32
    %690 = vector.broadcast %cst_138 : f32 to vector<4x128xf32>
    %691 = arith.subf %690, %689 : vector<4x128xf32>
    %692 = math.exp %691 : vector<4x128xf32>
    %cst_139 = arith.constant 1.000000e+00 : f32
    %693 = vector.broadcast %cst_139 : f32 to vector<4x128xf32>
    %694 = arith.addf %693, %692 : vector<4x128xf32>
    %695 = tpu.reciprocal %694 {approx = true} : vector<4x128xf32> -> vector<4x128xf32>
    %696 = vector.extract_strided_slice %695 {offsets = [0, 0], sizes = [4, 32], strides = [1, 1]} : vector<4x128xf32> to vector<4x32xf32>
    %697 = vector.extract_strided_slice %695 {offsets = [0, 32], sizes = [4, 32], strides = [1, 1]} : vector<4x128xf32> to vector<4x32xf32>
    %698 = vector.extract_strided_slice %695 {offsets = [0, 64], sizes = [4, 32], strides = [1, 1]} : vector<4x128xf32> to vector<4x32xf32>
    %699 = vector.extract_strided_slice %695 {offsets = [0, 96], sizes = [4, 32], strides = [1, 1]} : vector<4x128xf32> to vector<4x32xf32>
    %cst_140 = arith.constant 2.000000e+00 : f32
    %700 = vector.broadcast %cst_140 : f32 to vector<4x32xf32>
    %701 = arith.mulf %700, %699 : vector<4x32xf32>
    %cst_141 = arith.constant 1.000000e+00 : f32
    %702 = vector.broadcast %cst_141 : f32 to vector<4x32xf32>
    %703 = arith.subf %701, %702 : vector<4x32xf32>
    %704 = arith.mulf %697, %681 : vector<4x32xf32>
    %705 = arith.mulf %696, %703 : vector<4x32xf32>
    %706 = arith.addf %704, %705 : vector<4x32xf32>
    %707 = math.tanh %706 : vector<4x32xf32>
    %708 = arith.mulf %698, %707 : vector<4x32xf32>
    %709 = arith.mulf %683, %708 : vector<4x32xf32>
    %710 = arith.mulf %684, %678 : vector<4x32xf32>
    %711 = arith.addf %709, %710 : vector<4x32xf32>
    %712 = arith.mulf %683, %706 : vector<4x32xf32>
    %713 = arith.mulf %684, %681 : vector<4x32xf32>
    %714 = arith.addf %712, %713 : vector<4x32xf32>
    %715 = vector.extract_strided_slice %513 {offsets = [24, 0], sizes = [4, 128], strides = [1, 1]} : vector<32x128xf32> to vector<4x128xf32>
    %716 = vector.extract_strided_slice %24 {offsets = [24, 0], sizes = [4, 32], strides = [1, 1]} : vector<32x32xf32> to vector<4x32xf32>
    %717 = vector.extract_strided_slice %26 {offsets = [24, 0], sizes = [4, 32], strides = [1, 1]} : vector<32x32xf32> to vector<4x32xf32>
    %cst_142 = arith.constant dense<0.000000e+00> : vector<4x256xf32>
    %718 = tpu.matmul %711, %514, %cst_142 {dimension_numbers = #tpu.dot_dimension_numbers<[1], [0], [0], [1], [0, 0, 1, 1], [], []>} : vector<4x32xf32>, vector<32x256xf32>, vector<4x256xf32> -> vector<4x256xf32>
    %719 = vector.extract_strided_slice %718 {offsets = [0, 0], sizes = [4, 128], strides = [1, 1]} : vector<4x256xf32> to vector<4x128xf32>
    %720 = vector.extract_strided_slice %718 {offsets = [0, 128], sizes = [4, 128], strides = [1, 1]} : vector<4x256xf32> to vector<4x128xf32>
    %721 = arith.select %4, %719, %720 : vector<4x128xi1>, vector<4x128xf32>
    %722 = arith.addf %715, %721 : vector<4x128xf32>
    %cst_143 = arith.constant 0.000000e+00 : f32
    %723 = vector.broadcast %cst_143 : f32 to vector<4x128xf32>
    %724 = arith.subf %723, %722 : vector<4x128xf32>
    %725 = math.exp %724 : vector<4x128xf32>
    %cst_144 = arith.constant 1.000000e+00 : f32
    %726 = vector.broadcast %cst_144 : f32 to vector<4x128xf32>
    %727 = arith.addf %726, %725 : vector<4x128xf32>
    %728 = tpu.reciprocal %727 {approx = true} : vector<4x128xf32> -> vector<4x128xf32>
    %729 = vector.extract_strided_slice %728 {offsets = [0, 0], sizes = [4, 32], strides = [1, 1]} : vector<4x128xf32> to vector<4x32xf32>
    %730 = vector.extract_strided_slice %728 {offsets = [0, 32], sizes = [4, 32], strides = [1, 1]} : vector<4x128xf32> to vector<4x32xf32>
    %731 = vector.extract_strided_slice %728 {offsets = [0, 64], sizes = [4, 32], strides = [1, 1]} : vector<4x128xf32> to vector<4x32xf32>
    %732 = vector.extract_strided_slice %728 {offsets = [0, 96], sizes = [4, 32], strides = [1, 1]} : vector<4x128xf32> to vector<4x32xf32>
    %cst_145 = arith.constant 2.000000e+00 : f32
    %733 = vector.broadcast %cst_145 : f32 to vector<4x32xf32>
    %734 = arith.mulf %733, %732 : vector<4x32xf32>
    %cst_146 = arith.constant 1.000000e+00 : f32
    %735 = vector.broadcast %cst_146 : f32 to vector<4x32xf32>
    %736 = arith.subf %734, %735 : vector<4x32xf32>
    %737 = arith.mulf %730, %714 : vector<4x32xf32>
    %738 = arith.mulf %729, %736 : vector<4x32xf32>
    %739 = arith.addf %737, %738 : vector<4x32xf32>
    %740 = math.tanh %739 : vector<4x32xf32>
    %741 = arith.mulf %731, %740 : vector<4x32xf32>
    %742 = arith.mulf %716, %741 : vector<4x32xf32>
    %743 = arith.mulf %717, %711 : vector<4x32xf32>
    %744 = arith.addf %742, %743 : vector<4x32xf32>
    %745 = arith.mulf %716, %739 : vector<4x32xf32>
    %746 = arith.mulf %717, %714 : vector<4x32xf32>
    %747 = arith.addf %745, %746 : vector<4x32xf32>
    %748 = vector.extract_strided_slice %513 {offsets = [28, 0], sizes = [4, 128], strides = [1, 1]} : vector<32x128xf32> to vector<4x128xf32>
    %749 = vector.extract_strided_slice %24 {offsets = [28, 0], sizes = [4, 32], strides = [1, 1]} : vector<32x32xf32> to vector<4x32xf32>
    %750 = vector.extract_strided_slice %26 {offsets = [28, 0], sizes = [4, 32], strides = [1, 1]} : vector<32x32xf32> to vector<4x32xf32>
    %cst_147 = arith.constant dense<0.000000e+00> : vector<4x256xf32>
    %751 = tpu.matmul %744, %514, %cst_147 {dimension_numbers = #tpu.dot_dimension_numbers<[1], [0], [0], [1], [0, 0, 1, 1], [], []>} : vector<4x32xf32>, vector<32x256xf32>, vector<4x256xf32> -> vector<4x256xf32>
    %752 = vector.extract_strided_slice %751 {offsets = [0, 0], sizes = [4, 128], strides = [1, 1]} : vector<4x256xf32> to vector<4x128xf32>
    %753 = vector.extract_strided_slice %751 {offsets = [0, 128], sizes = [4, 128], strides = [1, 1]} : vector<4x256xf32> to vector<4x128xf32>
    %754 = arith.select %4, %752, %753 : vector<4x128xi1>, vector<4x128xf32>
    %755 = arith.addf %748, %754 : vector<4x128xf32>
    %cst_148 = arith.constant 0.000000e+00 : f32
    %756 = vector.broadcast %cst_148 : f32 to vector<4x128xf32>
    %757 = arith.subf %756, %755 : vector<4x128xf32>
    %758 = math.exp %757 : vector<4x128xf32>
    %cst_149 = arith.constant 1.000000e+00 : f32
    %759 = vector.broadcast %cst_149 : f32 to vector<4x128xf32>
    %760 = arith.addf %759, %758 : vector<4x128xf32>
    %761 = tpu.reciprocal %760 {approx = true} : vector<4x128xf32> -> vector<4x128xf32>
    %762 = vector.extract_strided_slice %761 {offsets = [0, 0], sizes = [4, 32], strides = [1, 1]} : vector<4x128xf32> to vector<4x32xf32>
    %763 = vector.extract_strided_slice %761 {offsets = [0, 32], sizes = [4, 32], strides = [1, 1]} : vector<4x128xf32> to vector<4x32xf32>
    %764 = vector.extract_strided_slice %761 {offsets = [0, 64], sizes = [4, 32], strides = [1, 1]} : vector<4x128xf32> to vector<4x32xf32>
    %765 = vector.extract_strided_slice %761 {offsets = [0, 96], sizes = [4, 32], strides = [1, 1]} : vector<4x128xf32> to vector<4x32xf32>
    %cst_150 = arith.constant 2.000000e+00 : f32
    %766 = vector.broadcast %cst_150 : f32 to vector<4x32xf32>
    %767 = arith.mulf %766, %765 : vector<4x32xf32>
    %cst_151 = arith.constant 1.000000e+00 : f32
    %768 = vector.broadcast %cst_151 : f32 to vector<4x32xf32>
    %769 = arith.subf %767, %768 : vector<4x32xf32>
    %770 = arith.mulf %763, %747 : vector<4x32xf32>
    %771 = arith.mulf %762, %769 : vector<4x32xf32>
    %772 = arith.addf %770, %771 : vector<4x32xf32>
    %773 = math.tanh %772 : vector<4x32xf32>
    %774 = arith.mulf %764, %773 : vector<4x32xf32>
    %775 = arith.mulf %749, %774 : vector<4x32xf32>
    %776 = arith.mulf %750, %744 : vector<4x32xf32>
    %777 = arith.addf %775, %776 : vector<4x32xf32>
    %778 = vector.extract_strided_slice %777 {offsets = [0, 0], sizes = [2, 32], strides = [1, 1]} : vector<4x32xf32> to vector<2x32xf32>
    %779 = vector.extract_strided_slice %777 {offsets = [2, 0], sizes = [2, 32], strides = [1, 1]} : vector<4x32xf32> to vector<2x32xf32>
    %780 = tpu.concatenate %778, %779 in 1 : vector<2x32xf32>, vector<2x32xf32> -> vector<2x64xf32>
    %c0_152 = arith.constant 0 : index
    %c0_153 = arith.constant 0 : index
    %781 = vector.load %arg9[%c0_152, %c0_153] : memref<64x5xf32, #tpu.memory_space<vmem>>, vector<64x5xf32>
    %cst_154 = arith.constant dense<0.000000e+00> : vector<2x5xf32>
    %782 = tpu.matmul %780, %781, %cst_154 {dimension_numbers = #tpu.dot_dimension_numbers<[1], [0], [0], [1], [0, 0, 1, 1], [], []>} : vector<2x64xf32>, vector<64x5xf32>, vector<2x5xf32> -> vector<2x5xf32>
    %c0_155 = arith.constant 0 : index
    %c0_156 = arith.constant 0 : index
    %783 = vector.load %arg10[%c0_155, %c0_156] : memref<1x5xf32, #tpu.memory_space<vmem>>, vector<1x5xf32>
    %784 = vector.broadcast %783 : vector<1x5xf32> to vector<2x5xf32>
    %785 = arith.addf %782, %784 : vector<2x5xf32>
    %cst_157 = arith.constant dense<0xFF800000> : vector<2xf32>
    %786 = vector.multi_reduction <maximumf>, %785, %cst_157 [1] : vector<2x5xf32> to vector<2xf32>
    %787 = vector.shape_cast %786 : vector<2xf32> to vector<2x1xf32>
    %788 = vector.broadcast %787 : vector<2x1xf32> to vector<2x5xf32>
    %789 = arith.subf %785, %788 : vector<2x5xf32>
    %790 = math.exp %789 : vector<2x5xf32>
    %cst_158 = arith.constant dense<0.000000e+00> : vector<2xf32>
    %791 = vector.multi_reduction <add>, %790, %cst_158 [1] : vector<2x5xf32> to vector<2xf32>
    %792 = vector.shape_cast %791 : vector<2xf32> to vector<2x1xf32>
    %793 = math.log %792 : vector<2x1xf32>
    %794 = vector.broadcast %793 : vector<2x1xf32> to vector<2x5xf32>
    %795 = arith.subf %789, %794 : vector<2x5xf32>
    %c0_159 = arith.constant 0 : index
    %c0_160 = arith.constant 0 : index
    %796 = vector.load %arg11[%c0_159, %c0_160] : memref<2x5xf32, #tpu.memory_space<vmem>>, vector<2x5xf32>
    tpu.vector_store %arg11[%c0_159, %c0_160], %795 {strides = array<i32>} : memref<2x5xf32, #tpu.memory_space<vmem>>, vector<2x5xf32>,
    return
  }
}

</mosaic_0001>

<bundles_post_ra>
// kernel: latent_rationale_forward.1
= control target key start
LH: loop header
LB: loop body
LE: loop exit
PB: predicated region body
PF: predicated region fallthrough
CT: control target
= control target key end

     0   :  { %v3522_v7 = vmov 0.0   ;;  %s4449_s0 = inlined_call_operand.vmem [shape: f32[16,32], index: 0, kind: input, shape index: {}]   ;;  %s4450_s1 = inlined_call_operand.vmem [shape: f32[16,1], index: 1, kind: input, shape index: {}]   ;;  %s4451_s2 = inlined_call_operand.vmem [shape: f32[32,512], index: 2, kind: input, shape index: {}]   ;;  %s4452_s3 = inlined_call_operand.vmem [shape: f32[32,256], index: 3, kind: input, shape index: {}]   ;;  %s4453_s4 = inlined_call_operand.vmem [shape: f32[1,256], index: 4, kind: input, shape index: {}]   ;;  %s4454_s5 = inlined_call_operand.vmem [shape: f32[64,2], index: 5, kind: input, shape index: {}]   ;;  %s4455_s6 = inlined_call_operand.vmem [shape: f32[1,2], index: 6, kind: input, shape index: {}]   ;;  %s4456_s7 = inlined_call_operand.vmem [shape: f32[32,256], index: 7, kind: input, shape index: {}]   ;;  %s4457_s8 = inlined_call_operand.vmem [shape: f32[1,256], index: 8, kind: input, shape index: {}]   ;;  %s4458_s9 = inlined_call_operand.vmem [shape: f32[64,5], index: 9, kind: input, shape index: {}]   ;;  %s4459_s10 = inlined_call_operand.vmem [shape: f32[1,5], index: 10, kind: input, shape index: {}]   ;;  %s4460_s11 = inlined_call_operand.hbm [shape: f32[2,5], index: 11, kind: output, shape index: {0}]   ;;  %s4461_s12 = inlined_call_operand.vmem [shape: f32[16,1], index: 12, kind: output, shape index: {1}]  }
   0x1   :  { %v137_v0 = vld [vmem:[%s4451_s2 + $0x8] sm:$0xff]  ;;  %v136_v2 = vld [vmem:[%s4451_s2] sm:$0xff]  ;;  %223 = vmatprep.mubr.f32.mxu1 %v3522_v7  ;;  %444 = vmatprep.mubr.f32.mxu0 %v3522_v7  ;;  %v372_v13 = vld [vmem:[%s4452_s3 + $0x18] sm:$0xff] }
   0x2   :  { %v141_v1 = vld [vmem:[%s4451_s2 + $0x28] sm:$0xff]  ;;  %v140_v4 = vld [vmem:[%s4451_s2 + $0x20] sm:$0xff]  ;;  %v371_v17 = vld [vmem:[%s4452_s3 + $0x10] sm:$0xff] }
   0x3   :  { %v3125_v3 = vpack.c.bf16 %v141_v1, %v137_v0  ;;  %v145_v5 = vld [vmem:[%s4451_s2 + $0x48] sm:$0xff]  ;;  %v3127_v8 = vpack.c.bf16 %v140_v4, %v136_v2  ;;  %v144_v10 = vld [vmem:[%s4451_s2 + $0x40] sm:$0xff]  ;;  %v376_v20 = vld [vmem:[%s4452_s3 + $0x38] sm:$0xff] }
   0x4   :  { %v149_v6 = vld [vmem:[%s4451_s2 + $0x68] sm:$0xff]  ;;  %v148_v11 = vld [vmem:[%s4451_s2 + $0x60] sm:$0xff]  ;;  %v375_v22 = vld [vmem:[%s4452_s3 + $0x30] sm:$0xff] }
   0x5   :  { %v3129_v9 = vpack.c.bf16 %v149_v6, %v145_v5  ;;  %3126 = vmatprep.subr.bf16.mxu1 %v3125_v3  ;;  %v370_v12 = vld [vmem:[%s4452_s3 + $0x8] sm:$0xff]  ;;  %v369_v14 = vld [vmem:[%s4452_s3] sm:$0xff]  ;;  %v3131_v15 = vpack.c.bf16 %v148_v11, %v144_v10 }
   0x6   :  { %3128 = vmatpush1.bf16.msra.mxu1 %v3127_v8  ;;  %v3635_v16 = vpack.c.bf16 %v372_v13, %v370_v12  ;;  %v374_v18 = vld [vmem:[%s4452_s3 + $0x28] sm:$0xff]  ;;  %v3643_v19 = vpack.c.bf16 %v371_v17, %v369_v14  ;;  %v373_v21 = vld [vmem:[%s4452_s3 + $0x20] sm:$0xff] }
   0x7   :  { %3130 = vmatprep.subr.bf16.mxu1 %v3129_v9  ;;  %v3655_v23 = vpack.c.bf16 %v376_v20, %v374_v18 }
   0x8   :  { %3142 = vmatprep.subr.bf16.mxu0 %v3635_v16 }
   0x9   :  { %18 = vsyncpa [#allocation3], 0  ;;  %3144 = vmatpush1.bf16.msra.mxu0 %v3643_v19  ;;  %v3658_v24 = vpack.c.bf16 %v375_v22, %v373_v21  ;;  %v3663_v25 = vld [vmem:[%s4449_s0] sm:$0xff]  ;;  %vm152_vm0 = vcmask 261120   ;;  %v3673_v26 = vld [vmem:[%s4449_s0 + $0x8] sm:$0xff]  ;;  %v45_v27 = vlaneseq  ;;  %vm97_vm2 = vcmask 1041408  }
   0xa   :  { %3132 = vmatpush1.bf16.msra.mxu1 %v3131_v15  ;;  %3146 = vmatprep.subr.bf16.mxu0 %v3655_v23  ;;  %v313_v30 = vld [vmem:[%s4453_s4] sm:$0x3]  ;;  %vm99_vm3 = vcmask 1043456   ;;  %vm101_vm4 = vcmask 1045504   ;;  %s3523_s4 = smov 32   ;;  %v44_v14 = vld [vmem:[%s4450_s1 + $0x8] sm:$0xff] }
   0xb   :  { %v3685_v28 = vshrl.u32 %v45_v27, 7  ;;  %s3524_s23 = smov 1   ;;  %v3525_v15 = vmov 0   ;;  %vm56_vm5 = vcmask 7168   ;;  %v43_v21 = vld [vmem:[%s4450_s1] sm:$0xff]  ;;  %s3526_s26 = smov 127  }
   0xc   :  { %3310 = vset.pattern.permute.xlu0 %v3525_v15  ;;  %3311 = vset.pattern.permute.xlu1 %v3525_v15  ;;  %s3528_s24 = smov 96   ;;  %vm1479_vm6 = vcmask 523264   ;;  %vm1669_vm9 = vcmask 15360   ;;  %s3530_s25 = smov 126  }
   0xd   :  { %3027 = vmatmul.mubr.msk.f32.vlgmr.msra.gmra.mrb[0].mxu1 %vm152_vm0, %v3663_v25  ;;  %3148 = vmatpush1.bf16.msra.mxu0 %v3658_v24  ;;  %v317_v29 = vsub.s32 0, %v3685_v28  ;;  %v321_v31 = vsub.s32 1, %v3685_v28  ;;  %vm47_vm1 = vcmp.lt.s32.totalorder %v3685_v28, 2 }
   0xe   :  { %229 = vmatprep.mubr.f32.mxu1 %v3522_v7  ;;  %3158 = vmatprep.subr.bf16.mxu0 %v3635_v16 }
   0xf   :  { %v318_v32 = vrot.slane %v313_v30, %v317_v29  ;;  %v322_v33 = vrot.slane %v313_v30, %v321_v31 }
  0x10   :  { %445 = vmatmul.mubr.f32.vlgmr.msra.gmra.mrb[0].mxu0 %v3522_v7 }
  0x11   :  { %3028 = vmatmul.mubr.msk.f32.gmra.mrb[2].mxu1 %vm152_vm0, %v3673_v26  ;;  %3160 = vmatpush1.bf16.msra.mxu0 %v3643_v19 }
  0x12   :  { %300 = vmatprep.mubr.f32.mxu1 %v3522_v7  ;;  %3162 = vmatprep.subr.bf16.mxu0 %v3655_v23 }
  0x13   :  { %683 = vmatprep.mubr.f32.mxu0 %v3522_v7 }
  0x15   :  { %3164 = vmatpush1.bf16.msra.mxu0 %v3658_v24 }
  0x16   :  { %3174 = vmatprep.subr.bf16.mxu0 %v3635_v16 }
  0xe0   :  { %v225_v34 = vpop.f32.mrb[0].mxu1 }
  0xe1   :  { %v325_v35 = vadd.f32 %v318_v32, %v225_v34  ;;  %v227_v36 = vpop.f32.mrb[1].mxu1 }
  0xe2   :  { %v326_v37 = vadd.f32 %v322_v33, %v227_v36 }
  0xe3   :  { %v446_v38 = vpop.f32.mrb[0].mxu0  ;;  %v333_v42 = vrot.slane %v325_v35, 6  ;;  %v337_v46 = vrot.slane %v325_v35, 4  ;;  %v339_v47 = vrot.slane %v325_v35, 2 }
  0xe4   :  { %v344_v39 = vrot.slane %v326_v37, 4  ;;  %v231_v40 = vpop.f32.mrb[2].mxu1  ;;  %v448_v41 = vpop.f32.mrb[1].mxu0  ;;  %v349_v49 = vrot.slane %v326_v37, 6  ;;  %v355_v57 = vrot.slane %v326_v37, 2 }
  0xe5   :  { %v327_v43 = vadd.f32 %v318_v32, %v231_v40  ;;  %v233_v44 = vpop.f32.mrb[3].mxu1  ;;  %v451_v45 = vsel %vm47_vm1, %v446_v38, %v448_v41 }
  0xe6   :  { %v328_v48 = vadd.f32 %v322_v33, %v233_v44  ;;  %v139_v44 = vld [vmem:[%s4451_s2 + $0x18] sm:$0xff] }
  0xe7   :  { %v347_v50 = vrot.slane %v327_v43, 6  ;;  %v351_v51 = vrot.slane %v327_v43, 4  ;;  %v353_v52 = vrot.slane %v327_v43, 2  ;;  %v363_v53 = vsel %vm97_vm2, %v327_v43, %v344_v39 }
  0xe8   :  { %v330_v54 = vrot.slane %v328_v48, 4  ;;  %v341_v55 = vrot.slane %v328_v48, 2  ;;  %v360_v56 = vsel %vm97_vm2, %v337_v46, %v328_v48  ;;  %v335_v58 = vrot.slane %v328_v48, 6  ;;  %v138_v46 = vld [vmem:[%s4451_s2 + $0x10] sm:$0xff] }
  0xe9   :  { %v361_v59 = vsel %vm99_vm3, %v360_v56, %v339_v47  ;;  %v364_v60 = vsel %vm99_vm3, %v363_v53, %v347_v50  ;;  %v366_v61 = vsel %vm97_vm2, %v351_v51, %v326_v37  ;;  %v142_v48 = vld [vmem:[%s4451_s2 + $0x30] sm:$0xff]  ;;  %v151_v50 = vld [vmem:[%s4451_s2 + $0x78] sm:$0xff] }
  0xea   :  { %v357_v62 = vsel %vm97_vm2, %v325_v35, %v330_v54  ;;  %v3706_v63 = vsel %vm101_vm4, %v361_v59, %v341_v55  ;;  %v3709_v0 = vsel %vm101_vm4, %v364_v60, %v349_v49  ;;  %v367_v1 = vsel %vm99_vm3, %v366_v61, %v353_v52  ;;  %v147_v49 = vld [vmem:[%s4451_s2 + $0x58] sm:$0xff]  ;;  %v146_v53 = vld [vmem:[%s4451_s2 + $0x50] sm:$0xff] }
  0xeb   :  { %v358_v2 = vsel %vm99_vm3, %v357_v62, %v333_v42  ;;  %v3714_v3 = vsel %vm101_vm4, %v367_v1, %v355_v57  ;;  %v3135_v51 = vpack.c.bf16 %v142_v48, %v138_v46  ;;  %v3137_v52 = vpack.c.bf16 %v151_v50, %v147_v49  ;;  %v150_v54 = vld [vmem:[%s4451_s2 + $0x70] sm:$0xff] }
  0xec   :  { %v3717_v4 = vsel %vm101_vm4, %v358_v2, %v335_v58  ;;  %v3139_v55 = vpack.c.bf16 %v150_v54, %v146_v53 }
  0xed   :  { %v452_v5 = vadd.f32 %v451_v45, %v3717_v4  ;;  %v143_v45 = vld [vmem:[%s4451_s2 + $0x38] sm:$0xff]  ;;  %s3527_s2 = smov 64  }
  0xee   :  { %v3133_v47 = vpack.c.bf16 %v143_v45, %v139_v44 }
  0xef   :  { %v453_v6 = vsub.f32 0.0, %v452_v5 }
  0xf0   :  { %3134 = vmatprep.subr.bf16.mxu1 %v3133_v47 }
  0xf1   :  { %v454_v8 = vmul.f32 1.442695, %v453_v6  ;;  %3136 = vmatpush1.bf16.msra.mxu1 %v3135_v51 }
  0xf2   :  { %3138 = vmatprep.subr.bf16.mxu1 %v3137_v52 }
  0xf3   :  { %3312 = vpow2.f32 %v454_v8 }
  0xf5   :  { %3140 = vmatpush1.bf16.msra.mxu1 %v3139_v55 }
  0xf6   :  { %3150 = vmatprep.subr.bf16.mxu1 %v3635_v16 }
  0xf8   :  { %3029 = vmatmul.mubr.msk.f32.vlgmr.msra.gmra.mrb[4].mxu1 %vm152_vm0, %v3663_v25 }
  0xf9   :  { %3152 = vmatpush1.bf16.msra.mxu1 %v3643_v19  ;;  %306 = vmatprep.mubr.f32.mxu1 %v3522_v7 }
  0xfa   :  { %3154 = vmatprep.subr.bf16.mxu1 %v3655_v23 }
  0xfc   :  { %3030 = vmatmul.mubr.msk.f32.gmra.mrb[6].mxu1 %vm152_vm0, %v3673_v26 }
  0xfd   :  { %v3313_v9 = vpop.eup %3312  ;;  %3156 = vmatpush1.bf16.msra.mxu1 %v3658_v24  ;;  %552 = vmatprep.mubr.f32.mxu1 %v3522_v7 }
  0xfe   :  { %v456_v10 = vadd.f32 1.0, %v3313_v9  ;;  %3166 = vmatprep.subr.bf16.mxu1 %v3635_v16 }
 0x100   :  { %3314 = vrcp.f32 %v456_v10 }
 0x10a   :  { %v3720_v11 = vpop.eup %3314 }
 0x10b   :  { %v458_v12 = vmul.f32 2.0, %v3720_v11  ;;  %v460_v32 = vmul.f32 0.0, %v3720_v11 }
 0x10d   :  { %v3031_v13 = vadd.f32 -1.0, %v458_v12 }
 0x10f   :  { %462 = vrot.lane.b32.xlu0 %v3031_v13, %s3523_s4 }
 0x113   :  { %52 = vrot.lane.b32.xlu0 %v44_v14, %s3524_s23 }
 0x181   :  { %v463_v17 = vpop.permute.xlu0 %462 }
 0x182   :  { %v465_v18 = vmul.f32 %v3720_v11, %v463_v17 }
 0x184   :  { %467 = vrot.lane.b32.xlu1 %v465_v18, %s3523_s4 }
 0x185   :  { %v53_v20 = vpop.permute.xlu0 %52 }
 0x186   :  { %v3734_v22 = vsel %vm56_vm5, %v44_v14, %v53_v20 }
 0x187   :  { %v60_v27 = vrot.slane %v3734_v22, 4  ;;  %v67_v30 = vrot.slane %v3734_v22, 6 }
 0x188   :  { %50 = vrot.lane.b32.xlu1 %v43_v21, %s3524_s23 }
 0x189   :  { %61 = vrot.lane.b32.xlu0 %v60_v27, %s3526_s26 }
 0x18c   :  { %68 = vrot.lane.b32.xlu1 %v67_v30, %s3526_s26 }
 0x1cb   :  { %v3810_v61 = vpop.f32.mrb[4].mxu1 }
 0x1cc   :  { %v3812_v62 = vpop.f32.mrb[5].mxu1 }
 0x1cf   :  { %v3814_v1 = vpop.f32.mrb[6].mxu1 }
 0x1d0   :  { %v3816_v2 = vpop.f32.mrb[7].mxu1 }
 0x1f6   :  { %v468_v33 = vpop.permute.xlu1 %467 }
 0x1f7   :  { %v3746_v34 = vadd.f32 %v468_v33, %v460_v32 }
 0x1f9   :  { %3316 = vtanh.f32 %v3746_v34 }
 0x1fa   :  { %v51_v35 = vpop.permute.xlu1 %50 }
 0x1fb   :  { %v3750_v36 = vsel %vm56_vm5, %v43_v21, %v51_v35  ;;  %v62_v37 = vpop.permute.xlu0 %61 }
 0x1fc   :  { %v65_v38 = vrot.slane %v3750_v36, 6  ;;  %v98_v39 = vsel %vm97_vm2, %v3750_v36, %v62_v37 }
 0x1fe   :  { %v69_v40 = vpop.permute.xlu1 %68  ;;  %v100_v41 = vsel %vm99_vm3, %v98_v39, %v65_v38 }
 0x1ff   :  { %v102_v42 = vsel %vm101_vm4, %v100_v41, %v69_v40 }
 0x200   :  { %114 = vperm.xlu0 %3310, %v102_v42  }
 0x203   :  { %v3317_v43 = vpop.eup %3316 }
 0x204   :  { %473 = vrot.lane.b32.xlu1 %v3317_v43, %s3523_s4 }
 0x276   :  { %v474_v56 = vpop.permute.xlu1 %473 }
 0x277   :  { %v476_v25 = vmul.f32 %v3720_v11, %v474_v56 }
 0x27f   :  { %v3795_v57 = vpop.permute.xlu0 %114 }
 0x280   :  { %v3799_v58 = vsub.f32 1.0, %v3795_v57  ;;  %v477_v59 = vmul.f32 %v476_v25, %v3795_v57 }
 0x282   :  { %v3803_v60 = vmul.f32 0.0, %v3799_v58 }
 0x284   :  { %v3806_v26 = vadd.f32 %v3803_v60, %v477_v59 }
 0x286   :  { %484 = vrot.lane.b32.xlu1 %v3806_v26, %s3527_s2  ;;  %v592_v21 = vrot.slane %v3806_v26, 4 }
 0x2f8   :  { %v485_v5 = vpop.permute.xlu1 %484 }
 0x2f9   :  { %3032 = vmatmul.mubr.msk.f32.vlgmr.msra.gmra.mrb[8].mxu1 %vm152_vm0, %v485_v5 }
 0x2fa   :  { %3168 = vmatpush1.bf16.msra.mxu1 %v3643_v19  ;;  %807 = vmatprep.mubr.f32.mxu1 %v3522_v7 }
 0x2fb   :  { %3170 = vmatprep.subr.bf16.mxu1 %v3655_v23 }
 0x2fe   :  { %3172 = vmatpush1.bf16.msra.mxu1 %v3658_v24 }
 0x2ff   :  { %3182 = vmatprep.subr.bf16.mxu1 %v3635_v16 }
 0x3cc   :  { %v554_v6 = vpop.f32.mrb[8].mxu1 }
 0x3cd   :  { %v556_v8 = vpop.f32.mrb[9].mxu1 }
 0x3ce   :  { %v559_v9 = vsel %vm47_vm1, %v554_v6, %v556_v8 }
 0x3cf   :  { %v561_v10 = vrot.slane %v559_v9, 4 }
 0x3d1   :  { %v563_v11 = vadd.f32 %v561_v10, %v3717_v4  ;;  %v480_v4 = vmul.f32 %v3746_v34, %v3795_v57 }
 0x3d3   :  { %v564_v12 = vsub.f32 0.0, %v563_v11  ;;  %v481_v39 = vadd.f32 %v480_v4, %v3803_v60  ;;  %v78_v11 = vrot.slane %v3734_v22, 2 }
 0x3d5   :  { %v565_v13 = vmul.f32 1.442695, %v564_v12  ;;  %v572_v40 = vrot.slane %v481_v39, 4 }
 0x3d7   :  { %3318 = vpow2.f32 %v565_v13  ;;  %v71_v13 = vrot.slane %v3750_v36, 4 }
 0x3e1   :  { %v3319_v14 = vpop.eup %3318 }
 0x3e2   :  { %v567_v15 = vadd.f32 1.0, %v3319_v14 }
 0x3e4   :  { %3320 = vrcp.f32 %v567_v15 }
 0x3ee   :  { %v3321_v17 = vpop.eup %3320 }
 0x3ef   :  { %v569_v18 = vmul.f32 2.0, %v3321_v17  ;;  %v574_v41 = vmul.f32 %v3321_v17, %v572_v40 }
 0x3f1   :  { %v3033_v20 = vadd.f32 -1.0, %v569_v18  ;;  %v76_v18 = vrot.slane %v3750_v36, 2 }
 0x3f3   :  { %576 = vrot.lane.b32.xlu0 %v3033_v20, %s3523_s4 }
 0x3f7   :  { %593 = vrot.lane.b32.xlu0 %v592_v21, %s3527_s2 }
 0x465   :  { %v577_v32 = vpop.permute.xlu0 %576 }
 0x466   :  { %v579_v33 = vmul.f32 %v3321_v17, %v577_v32 }
 0x468   :  { %581 = vrot.lane.b32.xlu1 %v579_v33, %s3523_s4 }
 0x469   :  { %v594_v35 = vpop.permute.xlu0 %593 }
 0x46a   :  { %v596_v37 = vmul.f32 %v594_v35, %v3799_v58 }
 0x46c   :  { %598 = vrot.lane.b32.xlu0 %v596_v37, %s3527_s2 }
 0x470   :  { %603 = vrot.lane.b32.xlu0 %v572_v40, %s3528_s24 }
 0x474   :  { %73 = vrot.lane.b32.xlu0 %v3734_v22, %s3526_s26 }
 0x4da   :  { %v582_v42 = vpop.permute.xlu1 %581 }
 0x4db   :  { %v584_v43 = vadd.f32 %v582_v42, %v574_v41 }
 0x4dd   :  { %3322 = vtanh.f32 %v584_v43  ;;  %v602_v4 = vmul.f32 %v584_v43, %v3795_v57 }
 0x4de   :  { %v599_v44 = vpop.permute.xlu0 %598 }
 0x4e2   :  { %v604_v34 = vpop.permute.xlu0 %603 }
 0x4e3   :  { %v606_v45 = vmul.f32 %v604_v34, %v3799_v58 }
 0x4e5   :  { %608 = vrot.lane.b32.xlu0 %v606_v45, %s3523_s4 }
 0x4e6   :  { %v74_v12 = vpop.permute.xlu0 %73 }
 0x4e7   :  { %v3323_v46 = vpop.eup %3322  ;;  %v103_v15 = vsel %vm97_vm2, %v71_v13, %v74_v12 }
 0x4e8   :  { %587 = vrot.lane.b32.xlu1 %v3323_v46, %s3523_s4  ;;  %v104_v21 = vsel %vm99_vm3, %v103_v15, %v76_v18 }
 0x557   :  { %v609_v33 = vpop.permute.xlu0 %608 }
 0x558   :  { %v611_v35 = vadd.f32 %v609_v33, %v602_v4 }
 0x55a   :  { %v588_v47 = vpop.permute.xlu1 %587  ;;  %v700_v37 = vrot.slane %v611_v35, 4 }
 0x55b   :  { %v590_v48 = vmul.f32 %v3321_v17, %v588_v47 }
 0x55d   :  { %v591_v49 = vmul.f32 %v590_v48, %v3795_v57 }
 0x55f   :  { %v3843_v50 = vadd.f32 %v599_v44, %v591_v49 }
 0x561   :  { %v614_v51 = vrot.slane %v3843_v50, 4 }
 0x563   :  { %615 = vrot.lane.b32.xlu1 %v614_v51, %s3527_s2 }
 0x5d5   :  { %v616_v52 = vpop.permute.xlu1 %615 }
 0x5d6   :  { %3034 = vmatmul.mubr.msk.f32.vlgmr.msra.gmra.mrb[2].mxu0 %vm152_vm0, %v616_v52 }
 0x5d7   :  { %3176 = vmatpush1.bf16.msra.mxu0 %v3643_v19  ;;  %938 = vmatprep.mubr.f32.mxu0 %v3522_v7 }
 0x5d8   :  { %3178 = vmatprep.subr.bf16.mxu0 %v3655_v23 }
 0x5db   :  { %3180 = vmatpush1.bf16.msra.mxu0 %v3658_v24 }
 0x5dc   :  { %3190 = vmatprep.subr.bf16.mxu0 %v3635_v16 }
 0x6a9   :  { %v685_v53 = vpop.f32.mrb[2].mxu0 }
 0x6aa   :  { %v687_v54 = vpop.f32.mrb[3].mxu0 }
 0x6ab   :  { %v690_v55 = vsel %vm47_vm1, %v685_v53, %v687_v54 }
 0x6ac   :  { %v691_v56 = vadd.f32 %v690_v55, %v3706_v63 }
 0x6ae   :  { %v692_v25 = vsub.f32 0.0, %v691_v56 }
 0x6b0   :  { %v693_v59 = vmul.f32 1.442695, %v692_v25 }
 0x6b2   :  { %3324 = vpow2.f32 %v693_v59 }
 0x6bc   :  { %v3325_v5 = vpop.eup %3324 }
 0x6bd   :  { %v695_v6 = vadd.f32 1.0, %v3325_v5 }
 0x6bf   :  { %3326 = vrcp.f32 %v695_v6 }
 0x6c9   :  { %v3327_v8 = vpop.eup %3326 }
 0x6ca   :  { %v697_v9 = vmul.f32 2.0, %v3327_v8  ;;  %v702_v39 = vmul.f32 %v3327_v8, %v700_v37 }
 0x6cc   :  { %v3035_v10 = vadd.f32 -1.0, %v697_v9 }
 0x6ce   :  { %704 = vrot.lane.b32.xlu1 %v3035_v10, %s3523_s4 }
 0x6d2   :  { %79 = vrot.lane.b32.xlu1 %v78_v11, %s3526_s26 }
 0x740   :  { %v705_v14 = vpop.permute.xlu1 %704 }
 0x741   :  { %v707_v17 = vmul.f32 %v3327_v8, %v705_v14 }
 0x743   :  { %709 = vrot.lane.b32.xlu1 %v707_v17, %s3523_s4 }
 0x744   :  { %v80_v20 = vpop.permute.xlu1 %79 }
 0x745   :  { %v105_v32 = vsel %vm101_vm4, %v104_v21, %v80_v20 }
 0x746   :  { %119 = vperm.xlu0 %3310, %v105_v32  }
 0x7b5   :  { %v710_v40 = vpop.permute.xlu1 %709 }
 0x7b6   :  { %v712_v41 = vadd.f32 %v710_v40, %v702_v39 }
 0x7b8   :  { %3328 = vtanh.f32 %v712_v41 }
 0x7c2   :  { %v3329_v42 = vpop.eup %3328 }
 0x7c3   :  { %715 = vrot.lane.b32.xlu1 %v3329_v42, %s3523_s4 }
 0x7c5   :  { %v3871_v44 = vpop.permute.xlu0 %119 }
 0x7c6   :  { %v3874_v34 = vsub.f32 1.0, %v3871_v44  ;;  %v727_v56 = vmul.f32 %v712_v41, %v3871_v44 }
 0x7c8   :  { %v721_v45 = vmul.f32 %v616_v52, %v3874_v34 }
 0x7ca   :  { %723 = vrot.lane.b32.xlu0 %v721_v45, %s3527_s2 }
 0x7ce   :  { %728 = vrot.lane.b32.xlu0 %v700_v37, %s3528_s24 }
 0x835   :  { %v716_v43 = vpop.permute.xlu1 %715 }
 0x836   :  { %v718_v46 = vmul.f32 %v3327_v8, %v716_v43 }
 0x838   :  { %v719_v47 = vmul.f32 %v718_v46, %v3871_v44 }
 0x83c   :  { %v724_v48 = vpop.permute.xlu0 %723 }
 0x83d   :  { %v3880_v49 = vadd.f32 %v724_v48, %v719_v47 }
 0x83f   :  { %739 = vrot.lane.b32.xlu1 %v3880_v49, %s3527_s2  ;;  %v847_v52 = vrot.slane %v3880_v49, 4 }
 0x840   :  { %v729_v51 = vpop.permute.xlu0 %728 }
 0x841   :  { %v731_v53 = vmul.f32 %v729_v51, %v3874_v34 }
 0x843   :  { %733 = vrot.lane.b32.xlu0 %v731_v53, %s3523_s4 }
 0x847   :  { %848 = vrot.lane.b32.xlu0 %v847_v52, %s3527_s2 }
 0x8b1   :  { %v740_v54 = vpop.permute.xlu1 %739 }
 0x8b2   :  { %3036 = vmatmul.mubr.msk.f32.vlgmr.msra.gmra.mrb[10].mxu1 %vm152_vm0, %v740_v54 }
 0x8b3   :  { %3184 = vmatpush1.bf16.msra.mxu1 %v3643_v19  ;;  %1062 = vmatprep.mubr.f32.mxu1 %v3522_v7 }
 0x8b4   :  { %3186 = vmatprep.subr.bf16.mxu1 %v3655_v23 }
 0x8b5   :  { %v734_v55 = vpop.permute.xlu0 %733 }
 0x8b6   :  { %v736_v59 = vadd.f32 %v734_v55, %v727_v56 }
 0x8b7   :  { %3188 = vmatpush1.bf16.msra.mxu1 %v3658_v24 }
 0x8b8   :  { %3198 = vmatprep.subr.bf16.mxu1 %v3635_v16  ;;  %v827_v6 = vrot.slane %v736_v59, 4 }
 0x8b9   :  { %v849_v25 = vpop.permute.xlu0 %848 }
 0x8ba   :  { %v851_v5 = vmul.f32 %v849_v25, %v3874_v34 }
 0x8bc   :  { %853 = vrot.lane.b32.xlu0 %v851_v5, %s3527_s2 }
 0x8c0   :  { %858 = vrot.lane.b32.xlu0 %v827_v6, %s3528_s24 }
 0x8c4   :  { %82 = vrot.lane.b32.xlu0 %v71_v13, %s3526_s26 }
 0x92e   :  { %v854_v8 = vpop.permute.xlu0 %853 }
 0x932   :  { %v859_v9 = vpop.permute.xlu0 %858 }
 0x933   :  { %v861_v10 = vmul.f32 %v859_v9, %v3874_v34 }
 0x935   :  { %863 = vrot.lane.b32.xlu0 %v861_v10, %s3523_s4 }
 0x936   :  { %v83_v10 = vpop.permute.xlu0 %82 }
 0x985   :  { %v809_v12 = vpop.f32.mrb[10].mxu1 }
 0x986   :  { %v811_v14 = vpop.f32.mrb[11].mxu1 }
 0x987   :  { %v814_v16 = vsel %vm47_vm1, %v809_v12, %v811_v14  ;;  %v106_v14 = vsel %vm97_vm2, %v3734_v22, %v83_v10 }
 0x988   :  { %v816_v15 = vrot.slane %v814_v16, 4 }
 0x98a   :  { %v818_v17 = vadd.f32 %v816_v15, %v3706_v63 }
 0x98c   :  { %v819_v20 = vsub.f32 0.0, %v818_v17  ;;  %v107_v17 = vsel %vm99_vm3, %v106_v14, %v67_v30 }
 0x98e   :  { %v820_v21 = vmul.f32 1.442695, %v819_v20 }
 0x990   :  { %3330 = vpow2.f32 %v820_v21 }
 0x99a   :  { %v3331_v32 = vpop.eup %3330 }
 0x99b   :  { %v822_v33 = vadd.f32 1.0, %v3331_v32 }
 0x99d   :  { %3332 = vrcp.f32 %v822_v33 }
 0x9a7   :  { %v3333_v13 = vpop.eup %3332  ;;  %v864_v32 = vpop.permute.xlu0 %863 }
 0x9a8   :  { %v824_v4 = vmul.f32 2.0, %v3333_v13  ;;  %v829_v40 = vmul.f32 %v3333_v13, %v827_v6 }
 0x9aa   :  { %v3037_v35 = vadd.f32 -1.0, %v824_v4 }
 0x9ac   :  { %831 = vrot.lane.b32.xlu1 %v3037_v35, %s3523_s4 }
 0xa1e   :  { %v832_v37 = vpop.permute.xlu1 %831 }
 0xa1f   :  { %v834_v39 = vmul.f32 %v3333_v13, %v832_v37 }
 0xa21   :  { %836 = vrot.lane.b32.xlu1 %v834_v39, %s3523_s4 }
 0xa93   :  { %v837_v41 = vpop.permute.xlu1 %836 }
 0xa94   :  { %v839_v42 = vadd.f32 %v837_v41, %v829_v40 }
 0xa96   :  { %3334 = vtanh.f32 %v839_v42  ;;  %v857_v21 = vmul.f32 %v839_v42, %v3871_v44 }
 0xaa0   :  { %v3335_v63 = vpop.eup %3334 }
 0xaa1   :  { %842 = vrot.lane.b32.xlu1 %v3335_v63, %s3523_s4 }
 0xb13   :  { %v843_v45 = vpop.permute.xlu1 %842 }
 0xb14   :  { %v845_v43 = vmul.f32 %v3333_v13, %v843_v45 }
 0xb16   :  { %v846_v46 = vmul.f32 %v845_v43, %v3871_v44 }
 0xb18   :  { %v3908_v47 = vadd.f32 %v854_v8, %v846_v46 }
 0xb1a   :  { %v869_v48 = vrot.slane %v3908_v47, 4 }
 0xb1c   :  { %870 = vrot.lane.b32.xlu1 %v869_v48, %s3527_s2 }
 0xb8e   :  { %v871_v51 = vpop.permute.xlu1 %870 }
 0xb8f   :  { %3038 = vmatmul.mubr.msk.f32.vlgmr.msra.gmra.mrb[4].mxu0 %vm152_vm0, %v871_v51 }
 0xb90   :  { %3192 = vmatpush1.bf16.msra.mxu0 %v3643_v19  ;;  %1193 = vmatprep.mubr.f32.mxu0 %v3522_v7 }
 0xb91   :  { %3194 = vmatprep.subr.bf16.mxu0 %v3655_v23 }
 0xb94   :  { %3196 = vmatpush1.bf16.msra.mxu0 %v3658_v24 }
 0xc62   :  { %v940_v53 = vpop.f32.mrb[4].mxu0 }
 0xc63   :  { %v942_v52 = vpop.f32.mrb[5].mxu0 }
 0xc64   :  { %v945_v54 = vsel %vm47_vm1, %v940_v53, %v942_v52 }
 0xc65   :  { %v946_v55 = vadd.f32 %v945_v54, %v3709_v0 }
 0xc67   :  { %v947_v56 = vsub.f32 0.0, %v946_v55 }
 0xc69   :  { %v948_v25 = vmul.f32 1.442695, %v947_v56 }
 0xc6b   :  { %3336 = vpow2.f32 %v948_v25 }
 0xc75   :  { %v3337_v59 = vpop.eup %3336 }
 0xc76   :  { %v950_v5 = vadd.f32 1.0, %v3337_v59 }
 0xc78   :  { %3338 = vrcp.f32 %v950_v5 }
 0xc82   :  { %v3339_v6 = vpop.eup %3338 }
 0xc83   :  { %v952_v8 = vmul.f32 2.0, %v3339_v6 }
 0xc85   :  { %v3039_v9 = vadd.f32 -1.0, %v952_v8 }
 0xc87   :  { %959 = vrot.lane.b32.xlu1 %v3039_v9, %s3523_s4 }
 0xc8b   :  { %86 = vrot.lane.b32.xlu1 %v65_v38, %s3526_s26  ;;  %v866_v38 = vadd.f32 %v864_v32, %v857_v21 }
 0xc8d   :  { %v955_v33 = vrot.slane %v866_v38, 4 }
 0xc8f   :  { %v957_v13 = vmul.f32 %v3339_v6, %v955_v33 }
 0xcf9   :  { %v960_v12 = vpop.permute.xlu1 %959 }
 0xcfa   :  { %v962_v16 = vmul.f32 %v3339_v6, %v960_v12 }
 0xcfc   :  { %964 = vrot.lane.b32.xlu1 %v962_v16, %s3523_s4 }
 0xcfd   :  { %v87_v15 = vpop.permute.xlu1 %86 }
 0xcfe   :  { %v108_v20 = vsel %vm101_vm4, %v107_v17, %v87_v15 }
 0xcff   :  { %124 = vperm.xlu0 %3310, %v108_v20  }
 0xd6e   :  { %v965_v4 = vpop.permute.xlu1 %964 }
 0xd6f   :  { %v967_v35 = vadd.f32 %v965_v4, %v957_v13 }
 0xd71   :  { %3340 = vtanh.f32 %v967_v35 }
 0xd7b   :  { %v3341_v37 = vpop.eup %3340 }
 0xd7c   :  { %970 = vrot.lane.b32.xlu1 %v3341_v37, %s3523_s4 }
 0xd7e   :  { %v3933_v39 = vpop.permute.xlu0 %124 }
 0xd7f   :  { %v3936_v40 = vsub.f32 1.0, %v3933_v39  ;;  %v982_v54 = vmul.f32 %v967_v35, %v3933_v39 }
 0xd81   :  { %v976_v30 = vmul.f32 %v871_v51, %v3936_v40 }
 0xd83   :  { %978 = vrot.lane.b32.xlu0 %v976_v30, %s3527_s2 }
 0xd87   :  { %983 = vrot.lane.b32.xlu0 %v955_v33, %s3528_s24 }
 0xdee   :  { %v971_v41 = vpop.permute.xlu1 %970 }
 0xdef   :  { %v973_v42 = vmul.f32 %v3339_v6, %v971_v41 }
 0xdf1   :  { %v974_v63 = vmul.f32 %v973_v42, %v3933_v39 }
 0xdf5   :  { %v979_v45 = vpop.permute.xlu0 %978 }
 0xdf6   :  { %v3942_v43 = vadd.f32 %v979_v45, %v974_v63 }
 0xdf8   :  { %994 = vrot.lane.b32.xlu1 %v3942_v43, %s3527_s2  ;;  %v1102_v51 = vrot.slane %v3942_v43, 4 }
 0xdf9   :  { %v984_v46 = vpop.permute.xlu0 %983 }
 0xdfa   :  { %v986_v48 = vmul.f32 %v984_v46, %v3936_v40 }
 0xdfc   :  { %988 = vrot.lane.b32.xlu0 %v986_v48, %s3523_s4 }
 0xe00   :  { %1103 = vrot.lane.b32.xlu0 %v1102_v51, %s3527_s2 }
 0xe6a   :  { %v995_v53 = vpop.permute.xlu1 %994 }
 0xe6b   :  { %3040 = vmatmul.mubr.msk.f32.vlgmr.msra.gmra.mrb[12].mxu1 %vm152_vm0, %v995_v53 }
 0xe6c   :  { %3200 = vmatpush1.bf16.msra.mxu1 %v3643_v19  ;;  %1317 = vmatprep.mubr.f32.mxu1 %v3522_v7 }
 0xe6d   :  { %3202 = vmatprep.subr.bf16.mxu1 %v3655_v23 }
 0xe6e   :  { %v989_v52 = vpop.permute.xlu0 %988 }
 0xe6f   :  { %v991_v56 = vadd.f32 %v989_v52, %v982_v54 }
 0xe70   :  { %3204 = vmatpush1.bf16.msra.mxu1 %v3658_v24 }
 0xe71   :  { %v1082_v59 = vrot.slane %v991_v56, 4 }
 0xe72   :  { %v1104_v55 = vpop.permute.xlu0 %1103 }
 0xe73   :  { %v1106_v25 = vmul.f32 %v1104_v55, %v3936_v40 }
 0xe75   :  { %1108 = vrot.lane.b32.xlu0 %v1106_v25, %s3527_s2 }
 0xe79   :  { %1113 = vrot.lane.b32.xlu0 %v1082_v59, %s3528_s24 }
 0xe7d   :  { %90 = vrot.lane.b32.xlu0 %v3750_v36, %s3526_s26 }
 0xee7   :  { %v1109_v19 = vpop.permute.xlu0 %1108 }
 0xeeb   :  { %v1114_v5 = vpop.permute.xlu0 %1113 }
 0xeec   :  { %v1116_v23 = vmul.f32 %v1114_v5, %v3936_v40 }
 0xeee   :  { %1118 = vrot.lane.b32.xlu0 %v1116_v23, %s3523_s4 }
 0xf3e   :  { %v1064_v24 = vpop.f32.mrb[12].mxu1 }
 0xf3f   :  { %v1066_v6 = vpop.f32.mrb[13].mxu1 }
 0xf40   :  { %v1069_v8 = vsel %vm47_vm1, %v1064_v24, %v1066_v6 }
 0xf41   :  { %v1071_v9 = vrot.slane %v1069_v8, 4 }
 0xf43   :  { %v1073_v10 = vadd.f32 %v1071_v9, %v3709_v0 }
 0xf45   :  { %v1074_v12 = vsub.f32 0.0, %v1073_v10 }
 0xf47   :  { %v1075_v14 = vmul.f32 1.442695, %v1074_v12 }
 0xf49   :  { %3342 = vpow2.f32 %v1075_v14 }
 0xf53   :  { %v3343_v16 = vpop.eup %3342 }
 0xf54   :  { %v1077_v15 = vadd.f32 1.0, %v3343_v16 }
 0xf56   :  { %3344 = vrcp.f32 %v1077_v15 }
 0xf60   :  { %v3345_v17 = vpop.eup %3344 }
 0xf61   :  { %v1079_v20 = vmul.f32 2.0, %v3345_v17  ;;  %v1084_v33 = vmul.f32 %v3345_v17, %v1082_v59 }
 0xf63   :  { %v3041_v21 = vadd.f32 -1.0, %v1079_v20 }
 0xf65   :  { %1086 = vrot.lane.b32.xlu1 %v3041_v21, %s3523_s4 }
 0xfd7   :  { %v1087_v32 = vpop.permute.xlu1 %1086 }
 0xfd8   :  { %v1089_v38 = vmul.f32 %v3345_v17, %v1087_v32 }
 0xfda   :  { %1091 = vrot.lane.b32.xlu1 %v1089_v38, %s3523_s4 }
0x104c   :  { %v1092_v13 = vpop.permute.xlu1 %1091 }
0x104d   :  { %v1094_v4 = vadd.f32 %v1092_v13, %v1084_v33 }
0x104f   :  { %3346 = vtanh.f32 %v1094_v4  ;;  %v1112_v36 = vmul.f32 %v1094_v4, %v3933_v39 }
0x1059   :  { %v3347_v0 = vpop.eup %3346 }
0x105a   :  { %1097 = vrot.lane.b32.xlu1 %v3347_v0, %s3523_s4 }
0x10cc   :  { %v1098_v35 = vpop.permute.xlu1 %1097 }
0x10cd   :  { %v1100_v37 = vmul.f32 %v3345_v17, %v1098_v35 }
0x10cf   :  { %v1101_v30 = vmul.f32 %v1100_v37, %v3933_v39 }
0x10d1   :  { %v3970_v41 = vadd.f32 %v1109_v19, %v1101_v30  ;;  %v91_v19 = vpop.permute.xlu0 %90 }
0x10d2   :  { %v109_v23 = vsel %vm97_vm2, %v60_v27, %v91_v19 }
0x10d3   :  { %v1124_v42 = vrot.slane %v3970_v41, 4  ;;  %v110_v8 = vsel %vm99_vm3, %v109_v23, %v78_v11 }
0x10d5   :  { %1125 = vrot.lane.b32.xlu1 %v1124_v42, %s3527_s2 }
0x1147   :  { %v1126_v63 = vpop.permute.xlu1 %1125 }
0x1148   :  { %3042 = vmatmul.mubr.msk.f32.vlgmr.msra.gmra.mrb[6].mxu0 %vm152_vm0, %v1126_v63 }
0x121b   :  { %v1195_v45 = vpop.f32.mrb[6].mxu0 }
0x121c   :  { %v1197_v46 = vpop.f32.mrb[7].mxu0 }
0x121d   :  { %v1200_v48 = vsel %vm47_vm1, %v1195_v45, %v1197_v46 }
0x121e   :  { %v1201_v51 = vadd.f32 %v1200_v48, %v3714_v3 }
0x1220   :  { %v1202_v53 = vsub.f32 0.0, %v1201_v51  ;;  %v1122_v51 = vmul.f32 %v3970_v41, %v3933_v39 }
0x1222   :  { %v1203_v52 = vmul.f32 1.442695, %v1202_v53  ;;  %v1393_v53 = vrot.slane %v1122_v51, 6 }
0x1224   :  { %3348 = vpow2.f32 %v1203_v52  ;;  %v737_v52 = vmul.f32 %v3880_v49, %v3871_v44 }
0x122e   :  { %v3349_v54 = vpop.eup %3348 }
0x122f   :  { %v1205_v55 = vadd.f32 1.0, %v3349_v54  ;;  %v1419_v54 = vrot.slane %v737_v52, 6 }
0x1231   :  { %3350 = vrcp.f32 %v1205_v55  ;;  %v992_v55 = vmul.f32 %v3942_v43, %v3933_v39 }
0x123b   :  { %v3351_v56 = vpop.eup %3350 }
0x123c   :  { %v1207_v25 = vmul.f32 2.0, %v3351_v56 }
0x123e   :  { %v3043_v59 = vadd.f32 -1.0, %v1207_v25  ;;  %v612_v25 = vmul.f32 %v3843_v50, %v3795_v57 }
0x1240   :  { %1214 = vrot.lane.b32.xlu1 %v3043_v59, %s3523_s4  ;;  %v1427_v41 = vrot.slane %v612_v25, 6  ;;  %v867_v59 = vmul.f32 %v3908_v47, %v3871_v44 }
0x1242   :  { %v1411_v49 = vrot.slane %v867_v59, 6 }
0x1244   :  { %94 = vrot.lane.b32.xlu1 %v76_v18, %s3526_s26  ;;  %v1119_v18 = vpop.permute.xlu0 %1118 }
0x1245   :  { %v1121_v10 = vadd.f32 %v1119_v18, %v1112_v36 }
0x1247   :  { %v1210_v12 = vrot.slane %v1121_v10, 4 }
0x1249   :  { %v1212_v14 = vmul.f32 %v3351_v56, %v1210_v12 }
0x12b2   :  { %v1215_v5 = vpop.permute.xlu1 %1214 }
0x12b3   :  { %v1217_v24 = vmul.f32 %v3351_v56, %v1215_v5 }
0x12b5   :  { %1219 = vrot.lane.b32.xlu1 %v1217_v24, %s3523_s4 }
0x12b6   :  { %v95_v6 = vpop.permute.xlu1 %94 }
0x12b7   :  { %v111_v9 = vsel %vm101_vm4, %v110_v8, %v95_v6 }
0x12b8   :  { %129 = vperm.xlu0 %3310, %v111_v9  }
0x1327   :  { %v1220_v16 = vpop.permute.xlu1 %1219 }
0x1328   :  { %v1222_v15 = vadd.f32 %v1220_v16, %v1212_v14 }
0x132a   :  { %3352 = vtanh.f32 %v1222_v15 }
0x1334   :  { %v3353_v27 = vpop.eup %3352 }
0x1335   :  { %1225 = vrot.lane.b32.xlu1 %v3353_v27, %s3523_s4 }
0x1337   :  { %v3992_v17 = vpop.permute.xlu0 %129 }
0x1338   :  { %v3995_v22 = vsub.f32 1.0, %v3992_v17  ;;  %v1237_v37 = vmul.f32 %v1222_v15, %v3992_v17 }
0x133a   :  { %v1231_v11 = vmul.f32 %v1126_v63, %v3995_v22 }
0x133c   :  { %1233 = vrot.lane.b32.xlu0 %v1231_v11, %s3527_s2  ;;  %v482_v11 = vmul.f32 %v3806_v26, %v3795_v57 }
0x1340   :  { %1238 = vrot.lane.b32.xlu0 %v1210_v12, %s3528_s24 }
0x13a7   :  { %v1226_v20 = vpop.permute.xlu1 %1225 }
0x13a8   :  { %v1228_v21 = vmul.f32 %v3351_v56, %v1226_v20  ;;  %v1403_v56 = vrot.slane %v992_v55, 6  ;;  %v1464_v20 = vld [vmem:[%s4454_s5] sm:$0xff] }
0x13aa   :  { %v1229_v32 = vmul.f32 %v1228_v21, %v3992_v17  ;;  %v1465_v21 = vld [vmem:[%s4454_s5 + $0x8] sm:$0xff] }
0x13ae   :  { %v1234_v38 = vpop.permute.xlu0 %1233 }
0x13af   :  { %v1236_v33 = vadd.f32 %v1234_v38, %v1229_v32  ;;  %v1466_v32 = vld [vmem:[%s4454_s5 + $0x10] sm:$0xff]  ;;  %v3205_v38 = vpack.c.bf16 %v1465_v21, %v1464_v20 }
0x13b1   :  { %1249 = vrot.lane.b32.xlu1 %v1236_v33, %s3527_s2  ;;  %v1357_v0 = vrot.slane %v1236_v33, 4  ;;  %v1247_v46 = vmul.f32 %v1236_v33, %v3992_v17  ;;  %v1467_v33 = vld [vmem:[%s4454_s5 + $0x18] sm:$0xff]  ;;  %3206 = vmatprep.subr.bf16.mxu0 %v3205_v38 }
0x13b2   :  { %v1239_v13 = vpop.permute.xlu0 %1238  ;;  %v3209_v26 = vpack.c.bf16 %v1467_v33, %v1466_v32  ;;  %3208 = vmatpush3.bf16.msra.mxu0 %v3205_v38 }
0x13b3   :  { %v1241_v4 = vmul.f32 %v1239_v13, %v3995_v22  ;;  %v1383_v48 = vrot.slane %v1247_v46, 6  ;;  %v1468_v13 = vld [vmem:[%s4454_s5 + $0x20] sm:$0xff] }
0x13b4   :  { %3210 = vmatprep.subr.bf16.mxu0 %v3209_v26 }
0x13b5   :  { %1243 = vrot.lane.b32.xlu0 %v1241_v4, %s3523_s4  ;;  %v1469_v4 = vld [vmem:[%s4454_s5 + $0x28] sm:$0xff] }
0x13b6   :  { %3212 = vmatpush3.bf16.msra.mxu0 %v3209_v26 }
0x13b9   :  { %1358 = vrot.lane.b32.xlu0 %v1357_v0, %s3527_s2  ;;  %v3213_v0 = vpack.c.bf16 %v1469_v4, %v1468_v13 }
0x13bb   :  { %3214 = vmatprep.subr.bf16.mxu0 %v3213_v0 }
0x13bc   :  { %3216 = vmatpush3.bf16.msra.mxu0 %v3213_v0 }
0x1423   :  { %v1250_v35 = vpop.permute.xlu1 %1249 }
0x1424   :  { %3044 = vmatmul.mubr.msk.f32.vlgmr.msra.gmra.mrb[14].mxu1 %vm152_vm0, %v1250_v35  ;;  %v1470_v35 = vld [vmem:[%s4454_s5 + $0x30] sm:$0xff] }
0x1425   :  { %1982 = vmatprep.mubr.f32.mxu1 %v3522_v7 }
0x1427   :  { %v1244_v30 = vpop.permute.xlu0 %1243 }
0x1428   :  { %v1246_v42 = vadd.f32 %v1244_v30, %v1237_v37  ;;  %v1471_v37 = vld [vmem:[%s4454_s5 + $0x38] sm:$0xff] }
0x142a   :  { %v1337_v14 = vrot.slane %v1246_v42, 4  ;;  %v3217_v42 = vpack.c.bf16 %v1471_v37, %v1470_v35  ;;  %v3046_v35 = vld [vmem:[%s4455_s6] ss:$0 sm:$0xff]  ;;  %s3529_s6 = smov 2  }
0x142b   :  { %v1359_v63 = vpop.permute.xlu0 %1358 }
0x142c   :  { %v1361_v45 = vmul.f32 %v1359_v63, %v3995_v22  ;;  %3218 = vmatprep.subr.bf16.mxu0 %v3217_v42 }
0x142d   :  { %3220 = vmatpush3.bf16.msra.mxu0 %v3217_v42 }
0x142e   :  { %1363 = vrot.lane.b32.xlu0 %v1361_v45, %s3527_s2 }
0x1432   :  { %1384 = vrot.lane.b32.xlu0 %v1383_v48, %s3528_s24 }
0x1436   :  { %1394 = vrot.lane.b32.xlu0 %v1393_v53, %s3528_s24 }
0x143a   :  { %1420 = vrot.lane.b32.xlu0 %v1419_v54, %s3528_s24 }
0x143e   :  { %1404 = vrot.lane.b32.xlu0 %v1403_v56, %s3528_s24 }
0x1442   :  { %1428 = vrot.lane.b32.xlu0 %v1427_v41, %s3528_s24 }
0x1446   :  { %1412 = vrot.lane.b32.xlu0 %v1411_v49, %s3528_s24 }
0x14f7   :  { %v1319_v19 = vpop.f32.mrb[14].mxu1 }
0x14f8   :  { %v1321_v5 = vpop.f32.mrb[15].mxu1 }
0x14f9   :  { %v1324_v43 = vsel %vm47_vm1, %v1319_v19, %v1321_v5 }
0x14fa   :  { %v1326_v23 = vrot.slane %v1324_v43, 4 }
0x14fc   :  { %v1328_v24 = vadd.f32 %v1326_v23, %v3714_v3 }
0x14fe   :  { %v1329_v50 = vsub.f32 0.0, %v1328_v24 }
0x1500   :  { %v1330_v6 = vmul.f32 1.442695, %v1329_v50 }
0x1502   :  { %3354 = vpow2.f32 %v1330_v6 }
0x150c   :  { %v3355_v8 = vpop.eup %3354 }
0x150d   :  { %v1332_v9 = vadd.f32 1.0, %v3355_v8 }
0x150f   :  { %3356 = vrcp.f32 %v1332_v9 }
0x1519   :  { %v3357_v47 = vpop.eup %3356 }
0x151a   :  { %v1334_v36 = vmul.f32 2.0, %v3357_v47  ;;  %v1339_v16 = vmul.f32 %v3357_v47, %v1337_v14 }
0x151c   :  { %v3045_v18 = vadd.f32 -1.0, %v1334_v36 }
0x151e   :  { %1341 = vrot.lane.b32.xlu1 %v3045_v18, %s3523_s4 }
0x1590   :  { %v1342_v10 = vpop.permute.xlu1 %1341 }
0x1591   :  { %v1344_v12 = vmul.f32 %v3357_v47, %v1342_v10 }
0x1593   :  { %1346 = vrot.lane.b32.xlu1 %v1344_v12, %s3523_s4 }
0x1605   :  { %v1347_v15 = vpop.permute.xlu1 %1346 }
0x1606   :  { %v1349_v27 = vadd.f32 %v1347_v15, %v1339_v16 }
0x1608   :  { %3358 = vtanh.f32 %v1349_v27 }
0x1612   :  { %v3359_v3 = vpop.eup %3358 }
0x1613   :  { %1352 = vrot.lane.b32.xlu1 %v3359_v3, %s3523_s4 }
0x1617   :  { %1379 = vrot.lane.b32.xlu1 %v612_v25, %s3527_s2 }
0x161b   :  { %1389 = vrot.lane.b32.xlu1 %v737_v52, %s3527_s2  ;;  %v1435_v52 = vrot.slane %v482_v11, 6 }
0x161f   :  { %1416 = vrot.lane.b32.xlu1 %v1122_v51, %s3527_s2 }
0x1623   :  { %1369 = vrot.lane.b32.xlu1 %v482_v11, %s3527_s2 }
0x1627   :  { %1399 = vrot.lane.b32.xlu1 %v867_v59, %s3527_s2 }
0x162b   :  { %1424 = vrot.lane.b32.xlu1 %v1247_v46, %s3527_s2  ;;  %v1364_v46 = vpop.permute.xlu0 %1363 }
0x162f   :  { %1408 = vrot.lane.b32.xlu1 %v992_v55, %s3527_s2  ;;  %v1385_v55 = vpop.permute.xlu0 %1384 }
0x1633   :  { %v1395_v25 = vpop.permute.xlu0 %1394 }
0x1637   :  { %v1421_v59 = vpop.permute.xlu0 %1420 }
0x163b   :  { %v1405_v19 = vpop.permute.xlu0 %1404 }
0x163f   :  { %v1429_v43 = vpop.permute.xlu0 %1428 }
0x1643   :  { %v1413_v24 = vpop.permute.xlu0 %1412 }
0x1685   :  { %v1353_v30 = vpop.permute.xlu1 %1352 }
0x1686   :  { %v1355_v63 = vmul.f32 %v3357_v47, %v1353_v30 }
0x1688   :  { %v1356_v45 = vmul.f32 %v1355_v63, %v3992_v17 }
0x1689   :  { %v1380_v54 = vpop.permute.xlu1 %1379 }
0x168a   :  { %v1366_v48 = vadd.f32 %v1364_v46, %v1356_v45  ;;  %v1387_v50 = vsel %vm152_vm0, %v1380_v54, %v1385_v55 }
0x168b   :  { %v1441_v36 = vrot.slane %v1387_v50, 2 }
0x168c   :  { %v1367_v51 = vmul.f32 %v1366_v48, %v3992_v17 }
0x168d   :  { %v1390_v56 = vpop.permute.xlu1 %1389 }
0x168e   :  { %1432 = vrot.lane.b32.xlu1 %v1367_v51, %s3527_s2  ;;  %v1373_v53 = vrot.slane %v1367_v51, 6  ;;  %v1397_v6 = vsel %vm152_vm0, %v1390_v56, %v1395_v25 }
0x168f   :  { %v1444_v10 = vrot.slane %v1397_v6, 4 }
0x1690   :  { %1374 = vrot.lane.b32.xlu0 %v1373_v53, %s3528_s24 }
0x1691   :  { %v1417_v41 = vpop.permute.xlu1 %1416 }
0x1692   :  { %v1423_v9 = vsel %vm152_vm0, %v1417_v41, %v1421_v59 }
0x1693   :  { %v1450_v16 = vrot.slane %v1423_v9, 2 }
0x1694   :  { %1436 = vrot.lane.b32.xlu0 %v1435_v52, %s3528_s24 }
0x1695   :  { %v1370_v49 = vpop.permute.xlu1 %1369 }
0x1699   :  { %v1400_v5 = vpop.permute.xlu1 %1399 }
0x169a   :  { %v1407_v47 = vsel %vm152_vm0, %v1400_v5, %v1405_v19 }
0x169b   :  { %v1447_v15 = vrot.slane %v1407_v47, 6 }
0x169d   :  { %v1425_v23 = vpop.permute.xlu1 %1424 }
0x169e   :  { %v1431_v27 = vsel %vm152_vm0, %v1425_v23, %v1429_v43 }
0x169f   :  { %v1453_v33 = vrot.slane %v1431_v27, 4 }
0x16a1   :  { %v1409_v8 = vpop.permute.xlu1 %1408 }
0x16a2   :  { %v1415_v12 = vsel %vm152_vm0, %v1409_v8, %v1413_v24 }
0x16a3   :  { %v1461_v20 = vsel %vm97_vm2, %v1415_v12, %v1450_v16 }
0x16a4   :  { %v1462_v4 = vsel %vm99_vm3, %v1461_v20, %v1453_v33 }
0x1700   :  { %v1433_v21 = vpop.permute.xlu1 %1432 }
0x1702   :  { %v1375_v18 = vpop.permute.xlu0 %1374 }
0x1703   :  { %v1377_v14 = vsel %vm152_vm0, %v1370_v49, %v1375_v18 }
0x1704   :  { %v1458_v3 = vsel %vm97_vm2, %v1377_v14, %v1441_v36 }
0x1705   :  { %v1459_v11 = vsel %vm99_vm3, %v1458_v3, %v1444_v10 }
0x1706   :  { %v1437_v32 = vpop.permute.xlu0 %1436  ;;  %v1460_v38 = vsel %vm101_vm4, %v1459_v11, %v1447_v15 }
0x1707   :  { %v1439_v26 = vsel %vm152_vm0, %v1433_v21, %v1437_v32  ;;  %3103 = vmatprep.mubr.msk.f32.mxu0 %vm1479_vm6, %v1460_v38 }
0x1708   :  { %v1456_v13 = vrot.slane %v1439_v26, 6 }
0x170a   :  { %v1463_v0 = vsel %vm101_vm4, %v1462_v4, %v1456_v13 }
0x170b   :  { %3104 = vmatmul.mubr.msk.f32.vlgmr.msra.gmra.mrb[8].mxu0 %vm1479_vm6, %v1463_v0 }
0x170c   :  { %2218 = vmatprep.mubr.f32.mxu0 %v3522_v7 }
0x17de   :  { %v3105_v37 = vpop.f32.mrb[8].mxu0 }
0x17df   :  { %v1558_v30 = vadd.f32 %v3105_v37, %v3046_v35  ;;  %v1552_v42 = vpop.f32.mrb[9].mxu0 }
0x17e0   :  { %v1553_v63 = vadd.f32 %v3046_v35, %v1552_v42 }
0x17e1   :  { %v1564_v45 = vmin.f32 %v1558_v30, 20.0  ;;  %vm1562_vm7 = vcmp.gt.f32.partialorder %v1558_v30, 20.0 }
0x17e2   :  { %v1563_v46 = vmin.f32 %v1553_v63, 20.0  ;;  %vm1561_vm8 = vcmp.gt.f32.partialorder %v1553_v63, 20.0 }
0x17e3   :  { %v1567_v48 = vmul.f32 1.442695, %v1564_v45 }
0x17e4   :  { %v1565_v51 = vmul.f32 1.442695, %v1563_v46 }
0x17e5   :  { %3360 = vpow2.f32 %v1567_v48 }
0x17e6   :  { %3362 = vpow2.f32 %v1565_v51 }
0x17ef   :  { %v3361_v53 = vpop.eup %3360 }
0x17f0   :  { %v3363_v52 = vpop.eup %3362  ;;  %v1570_v54 = vadd.f32 1.0, %v3361_v53 }
0x17f1   :  { %v1569_v55 = vadd.f32 1.0, %v3363_v52 }
0x17f2   :  { %3364 = vlog2.f32 %v1570_v54 }
0x17f3   :  { %3366 = vlog2.f32 %v1569_v55 }
0x17fc   :  { %v3365_v56 = vpop.eup %3364 }
0x17fd   :  { %v3367_v25 = vpop.eup %3366  ;;  %v1574_v41 = vmul.f32 0.6931472, %v3365_v56 }
0x17fe   :  { %v1572_v59 = vmul.f32 0.6931472, %v3367_v25 }
0x17ff   :  { %v1576_v49 = vsel %vm1562_vm7, %v1558_v30, %v1574_v41 }
0x1800   :  { %v1578_v19 = vmax.f32 %v1576_v49, 1e-06  ;;  %v1575_v5 = vsel %vm1561_vm8, %v1553_v63, %v1572_v59 }
0x1801   :  { %v1577_v43 = vmax.f32 %v1575_v5, 1e-06 }
0x1802   :  { %v4091_v23 = vmin.f32 %v1578_v19, 100.0 }
0x1803   :  { %v4093_v24 = vmin.f32 %v1577_v43, 100.0 }
0x1804   :  { %1653 = vrot.lane.b32.xlu1 %v4091_v23, %s3526_s26  ;;  %3368 = vrcp.f32 %v4091_v23  ;;  %v1582_v52 = vmul.f32 -2.4849067, %v4091_v23 }
0x1805   :  { %1651 = vrot.lane.b32.xlu0 %v4093_v24, %s3526_s26  ;;  %3370 = vrcp.f32 %v4093_v24  ;;  %v1581_v43 = vmul.f32 -2.4849067, %v4093_v24 }
0x1806   :  { %v1585_v5 = vmul.f32 1.442695, %v1582_v52 }
0x180e   :  { %v3369_v50 = vpop.eup %3368 }
0x180f   :  { %v3371_v6 = vpop.eup %3370  ;;  %v1648_v8 = vadd.f32 1.0, %v3369_v50 }
0x1810   :  { %v1647_v47 = vadd.f32 1.0, %v3371_v6 }
0x1811   :  { %v1668_v12 = vsel %vm56_vm5, %v1648_v8, %v4091_v23 }
0x1812   :  { %v1667_v15 = vsel %vm56_vm5, %v1647_v47, %v4093_v24 }
0x1876   :  { %v1654_v9 = vpop.permute.xlu1 %1653 }
0x1877   :  { %v1658_v36 = vadd.f32 %v1654_v9, %v1648_v8  ;;  %v1652_v18 = vpop.permute.xlu0 %1651 }
0x1878   :  { %v1657_v10 = vadd.f32 %v1652_v18, %v1647_v47 }
0x1879   :  { %1663 = vrot.lane.b32.xlu1 %v1658_v36, %s3529_s6 }
0x187a   :  { %1661 = vrot.lane.b32.xlu0 %v1657_v10, %s3529_s6 }
0x18eb   :  { %v1664_v14 = vpop.permute.xlu1 %1663 }
0x18ec   :  { %v4103_v16 = vsel %vm1669_vm9, %v1668_v12, %v1664_v14  ;;  %v1662_v27 = vpop.permute.xlu0 %1661  ;;  %v1610_v14 = vmul.f32 -0.087011375, %v4091_v23 }
0x18ed   :  { %v1675_v3 = vadd.f32 1.0, %v4103_v16  ;;  %v4108_v11 = vsel %vm1669_vm9, %v1667_v15, %v1662_v27  ;;  %vm1673_vm10 = vcmp.lt.f32.partialorder %v4103_v16, 0.5 }
0x18ee   :  { %v1674_v20 = vadd.f32 1.0, %v4108_v11  ;;  %vm1672_vm11 = vcmp.lt.f32.partialorder %v4108_v11, 0.5 }
0x18ef   :  { %v1677_v21 = vsel %vm1673_vm10, %v1675_v3, %v4103_v16 }
0x18f0   :  { %v4116_v32 = vadd.f32 -1.0, %v1677_v21  ;;  %v1676_v13 = vsel %vm1672_vm11, %v1674_v20, %v4108_v11  ;;  %v1583_v20 = vmul.f32 1.442695, %v1581_v43 }
0x18f1   :  { %v4125_v0 = vadd.f32 -1.0, %v1676_v13 }
0x18f2   :  { %v1681_v38 = vadd.f32 1.0, %v4116_v32  ;;  %v1689_v33 = vadd.f32 2.0, %v4116_v32  ;;  %v1697_v26 = vadd.f32 3.0, %v4116_v32  ;;  %v1705_v4 = vadd.f32 4.0, %v4116_v32 }
0x18f3   :  { %v1713_v35 = vadd.f32 5.0, %v4116_v32  ;;  %v1721_v37 = vadd.f32 6.0, %v4116_v32  ;;  %v1729_v30 = vadd.f32 7.0, %v4116_v32  ;;  %v1680_v42 = vadd.f32 1.0, %v4125_v0 }
0x18f4   :  { %3372 = vrcp.f32 %v1681_v38  ;;  %v1688_v63 = vadd.f32 2.0, %v4125_v0  ;;  %v1696_v45 = vadd.f32 3.0, %v4125_v0  ;;  %v1737_v46 = vadd.f32 8.0, %v4116_v32 }
0x18f5   :  { %3374 = vrcp.f32 %v1689_v33  ;;  %v1704_v48 = vadd.f32 4.0, %v4125_v0  ;;  %v4135_v53 = vadd.f32 0.5, %v1729_v30  ;;  %v1712_v56 = vadd.f32 5.0, %v4125_v0 }
0x18f6   :  { %3376 = vrcp.f32 %v1697_v26  ;;  %v1720_v49 = vadd.f32 6.0, %v4125_v0  ;;  %v1728_v8 = vadd.f32 7.0, %v4125_v0  ;;  %v1736_v10 = vadd.f32 8.0, %v4125_v0 }
0x18f7   :  { %3378 = vrcp.f32 %v1705_v4 }
0x18f8   :  { %3380 = vrcp.f32 %v1713_v35  ;;  %v4145_v33 = vadd.f32 0.5, %v1728_v8 }
0x18f9   :  { %3382 = vrcp.f32 %v1721_v37 }
0x18fa   :  { %3384 = vrcp.f32 %v1729_v30 }
0x18fb   :  { %3386 = vrcp.f32 %v1680_v42  ;;  %v1609_v42 = vmul.f32 -0.087011375, %v4093_v24 }
0x18fc   :  { %3388 = vrcp.f32 %v1688_v63 }
0x18fd   :  { %3390 = vrcp.f32 %v1696_v45 }
0x18fe   :  { %v3373_v51 = vpop.eup %3372  ;;  %3392 = vrcp.f32 %v1737_v46 }
0x18ff   :  { %v3375_v54 = vpop.eup %3374  ;;  %v1685_v55 = vmul.f32 676.5204, %v3373_v51  ;;  %3394 = vrcp.f32 %v1704_v48  ;;  %v1613_v48 = vmul.f32 1.442695, %v1610_v14 }
0x1900   :  { %v3377_v25 = vpop.eup %3376  ;;  %v1693_v59 = vmul.f32 -1259.1392, %v3375_v54  ;;  %3396 = vlog2.f32 %v4135_v53 }
0x1901   :  { %v1687_v41 = vadd.f32 1.0, %v1685_v55  ;;  %v3379_v19 = vpop.eup %3378  ;;  %v1701_v6 = vmul.f32 771.3234, %v3377_v25  ;;  %3398 = vrcp.f32 %v1712_v56 }
0x1902   :  { %v3381_v9 = vpop.eup %3380  ;;  %v1709_v18 = vmul.f32 -176.61504, %v3379_v19  ;;  %3400 = vrcp.f32 %v1720_v49 }
0x1903   :  { %v1695_v50 = vadd.f32 %v1693_v59, %v1687_v41  ;;  %v3383_v47 = vpop.eup %3382  ;;  %3402 = vpow2.f32 %v1585_v5  ;;  %v1717_v3 = vmul.f32 12.507343, %v3381_v9  ;;  %v1611_v5 = vmul.f32 1.442695, %v1609_v42 }
0x1904   :  { %v3385_v12 = vpop.eup %3384  ;;  %3404 = vrcp.f32 %v1728_v8  ;;  %v1725_v4 = vmul.f32 -0.1385711, %v3383_v47  ;;  %v1747_v47 = vadd.f32 0.5, %v4116_v32 }
0x1905   :  { %v1703_v36 = vadd.f32 %v1701_v6, %v1695_v50  ;;  %v3387_v15 = vpop.eup %3386  ;;  %3406 = vrcp.f32 %v1736_v10  ;;  %v1733_v46 = vmul.f32 9.984369e-06, %v3385_v12 }
0x1906   :  { %v3389_v21 = vpop.eup %3388  ;;  %v1683_v38 = vmul.f32 676.5204, %v3387_v15  ;;  %3408 = vpow2.f32 %v1583_v20 }
0x1907   :  { %v1711_v27 = vadd.f32 %v1709_v18, %v1703_v36  ;;  %v3391_v26 = vpop.eup %3390  ;;  %v1691_v30 = vmul.f32 -1259.1392, %v3389_v21  ;;  %3410 = vlog2.f32 %v4145_v33 }
0x1908   :  { %v3393_v35 = vpop.eup %3392  ;;  %v1686_v37 = vadd.f32 1.0, %v1683_v38  ;;  %v1699_v54 = vmul.f32 771.3234, %v3391_v26  ;;  %3412 = vpow2.f32 %v1613_v48 }
0x1909   :  { %v1719_v13 = vadd.f32 %v1717_v3, %v1711_v27  ;;  %v3395_v63 = vpop.eup %3394  ;;  %v1741_v25 = vmul.f32 1.5056327e-07, %v3393_v35  ;;  %3414 = vlog2.f32 %v4103_v16 }
0x190a   :  { %v3397_v51 = vpop.eup %3396  ;;  %v1694_v52 = vadd.f32 %v1691_v30, %v1686_v37  ;;  %v1707_v59 = vmul.f32 -176.61504, %v3395_v63  ;;  %v1746_v63 = vadd.f32 0.5, %v4125_v0 }
0x190b   :  { %v1727_v45 = vadd.f32 %v1725_v4, %v1719_v13  ;;  %v3399_v55 = vpop.eup %3398  ;;  %v1751_v50 = vmul.f32 0.6931472, %v3397_v51 }
0x190c   :  { %v1702_v41 = vadd.f32 %v1699_v54, %v1694_v52  ;;  %v3401_v49 = vpop.eup %3400  ;;  %v1715_v8 = vmul.f32 12.507343, %v3399_v55 }
0x190d   :  { %v1735_v56 = vadd.f32 %v1733_v46, %v1727_v45  ;;  %v3403_v43 = vpop.eup %3402  ;;  %v1723_v18 = vmul.f32 -0.1385711, %v3401_v49  ;;  %v1753_v12 = vmul.f32 %v1751_v50, %v1747_v47 }
0x190e   :  { %v1710_v6 = vadd.f32 %v1707_v59, %v1702_v41  ;;  %v3405_v9 = vpop.eup %3404  ;;  %v1588_v27 = vsub.f32 1.0, %v3403_v43 }
0x190f   :  { %v1743_v19 = vadd.f32 %v1741_v25, %v1735_v56  ;;  %v3407_v10 = vpop.eup %3406  ;;  %v1731_v15 = vmul.f32 9.984369e-06, %v3405_v9  ;;  %v1755_v26 = vadd.f32 0.9189385, %v1753_v12 }
0x1910   :  { %v1718_v36 = vadd.f32 %v1715_v8, %v1710_v6  ;;  %v3409_v3 = vpop.eup %3408  ;;  %v1739_v38 = vmul.f32 1.5056327e-07, %v3407_v10  ;;  %v1590_v4 = vmax.f32 %v1588_v27, 1e-30 }
0x1911   :  { %3416 = vlog2.f32 %v1743_v19  ;;  %v3411_v20 = vpop.eup %3410  ;;  %v1587_v35 = vsub.f32 1.0, %v3409_v3  ;;  %v1757_v45 = vsub.f32 %v1755_v26, %v4135_v53 }
0x1912   :  { %3418 = vpow2.f32 %v1611_v5  ;;  %v1726_v14 = vadd.f32 %v1723_v18, %v1718_v36  ;;  %v3413_v37 = vpop.eup %3412  ;;  %v1749_v32 = vmul.f32 0.6931472, %v3411_v20 }
0x1913   :  { %3420 = vlog2.f32 %v4108_v11  ;;  %v3415_v30 = vpop.eup %3414  ;;  %v1589_v48 = vmax.f32 %v1587_v35, 1e-30  ;;  %v1616_v54 = vsub.f32 1.0, %v3413_v37 }
0x1914   :  { %v1734_v21 = vadd.f32 %v1731_v15, %v1726_v14  ;;  %v1752_v52 = vmul.f32 %v1749_v32, %v1746_v63  ;;  %v1767_v56 = vmul.f32 0.6931472, %v3415_v30  ;;  %v1911_v32 = vld [vmem:[%s4456_s7 + $0x8] sm:$0xff]  ;;  %v1913_v30 = vld [vmem:[%s4456_s7 + $0x18] sm:$0xff] }
0x1915   :  { %v1618_v59 = vmax.f32 %v1616_v54, 1e-30 }
0x1916   :  { %v1742_v13 = vadd.f32 %v1739_v38, %v1734_v21  ;;  %v1754_v41 = vadd.f32 0.9189385, %v1752_v52 }
0x1918   :  { %3422 = vlog2.f32 %v1742_v13  ;;  %v1756_v53 = vsub.f32 %v1754_v41, %v4145_v33 }
0x1919   :  { %3424 = vlog2.f32 %v1590_v4 }
0x191a   :  { %3426 = vlog2.f32 %v1589_v48  ;;  %v1915_v48 = vld [vmem:[%s4456_s7 + $0x28] sm:$0xff] }
0x191b   :  { %v3417_v42 = vpop.eup %3416  ;;  %3428 = vlog2.f32 %v1618_v59 }
0x191c   :  { %v1761_v46 = vmul.f32 0.6931472, %v3417_v42  ;;  %v3419_v51 = vpop.eup %3418  ;;  %v1910_v42 = vld [vmem:[%s4456_s7] sm:$0xff] }
0x191d   :  { %v1615_v49 = vsub.f32 1.0, %v3419_v51  ;;  %v3421_v5 = vpop.eup %3420  ;;  %v1917_v51 = vld [vmem:[%s4456_s7 + $0x38] sm:$0xff] }
0x191e   :  { %v1763_v55 = vadd.f32 %v1761_v46, %v1757_v45  ;;  %v1765_v9 = vmul.f32 0.6931472, %v3421_v5  ;;  %v4175_v45 = vpack.c.bf16 %v1913_v30, %v1911_v32  ;;  %v1912_v46 = vld [vmem:[%s4456_s7 + $0x10] sm:$0xff]  ;;  %v4189_v54 = vpack.c.bf16 %v1917_v51, %v1915_v48 }
0x191f   :  { %v1617_v50 = vmax.f32 %v1615_v49, 1e-30  ;;  %v4187_v52 = vpack.c.bf16 %v1912_v46, %v1910_v42 }
0x1920   :  { %v1769_v25 = vsub.f32 %v1763_v55, %v1767_v56  ;;  %v1916_v56 = vld [vmem:[%s4456_s7 + $0x30] sm:$0xff]  ;;  %3222 = vmatprep.subr.bf16.mxu1 %v4175_v45  ;;  %3238 = vmatprep.subr.bf16.mxu0 %v4175_v45 }
0x1921   :  { %3430 = vlog2.f32 %v1617_v50  ;;  %3224 = vmatpush1.bf16.msra.mxu1 %v4187_v52  ;;  %3240 = vmatpush1.bf16.msra.mxu0 %v4187_v52 }
0x1922   :  { %v1771_v19 = vsel %vm1673_vm10, %v1769_v25, %v1763_v55  ;;  %v3423_v0 = vpop.eup %3422  ;;  %v1914_v55 = vld [vmem:[%s4456_s7 + $0x20] sm:$0xff]  ;;  %3226 = vmatprep.subr.bf16.mxu1 %v4189_v54  ;;  %3242 = vmatprep.subr.bf16.mxu0 %v4189_v54 }
0x1923   :  { %1776 = vrot.lane.b32.xlu1 %v1771_v19, %s3526_s26  ;;  %v1759_v43 = vmul.f32 0.6931472, %v3423_v0  ;;  %v3425_v6 = vpop.eup %3424  ;;  %v4200_v25 = vpack.c.bf16 %v1916_v56, %v1914_v55 }
0x1924   :  { %v1594_v36 = vmul.f32 0.6931472, %v3425_v6  ;;  %v3427_v18 = vpop.eup %3426 }
0x1925   :  { %v1762_v8 = vadd.f32 %v1759_v43, %v1756_v53  ;;  %v1592_v33 = vmul.f32 0.6931472, %v3427_v18  ;;  %v3429_v10 = vpop.eup %3428  ;;  %3228 = vmatpush1.bf16.msra.mxu1 %v4200_v25  ;;  %3244 = vmatpush1.bf16.msra.mxu0 %v4200_v25 }
0x1926   :  { %v1622_v12 = vmul.f32 0.6931472, %v3429_v10  ;;  %3230 = vmatprep.subr.bf16.mxu1 %v4175_v45  ;;  %3254 = vmatprep.subr.bf16.mxu0 %v4175_v45 }
0x1927   :  { %1784 = vrot.lane.b32.xlu1 %v1771_v19, %s3530_s25  ;;  %v1768_v47 = vsub.f32 %v1762_v8, %v1765_v9 }
0x1928   :  { %1983 = vmatmul.mubr.f32.vlgmr.msra.gmra.mrb[16].mxu1 %v3522_v7 }
0x1929   :  { %v1770_v16 = vsel %vm1672_vm11, %v1768_v47, %v1762_v8  ;;  %3232 = vmatpush1.bf16.msra.mxu1 %v4187_v52  ;;  %2088 = vmatprep.mubr.f32.mxu1 %v3522_v7 }
0x192a   :  { %1774 = vrot.lane.b32.xlu0 %v1770_v16, %s3526_s26  ;;  %3234 = vmatprep.subr.bf16.mxu1 %v4189_v54 }
0x192b   :  { %1599 = vrot.lane.b32.xlu1 %v1594_v36, %s3524_s23  ;;  %v3431_v14 = vpop.eup %3430 }
0x192c   :  { %v1620_v15 = vmul.f32 0.6931472, %v3431_v14 }
0x192d   :  { %3236 = vmatpush1.bf16.msra.mxu1 %v4200_v25 }
0x192e   :  { %1782 = vrot.lane.b32.xlu0 %v1770_v16, %s3530_s25  ;;  %3246 = vmatprep.subr.bf16.mxu1 %v4175_v45 }
0x192f   :  { %1597 = vrot.lane.b32.xlu1 %v1592_v33, %s3524_s23 }
0x1932   :  { %1627 = vrot.lane.b32.xlu0 %v1622_v12, %s3524_s23 }
0x1936   :  { %1625 = vrot.lane.b32.xlu0 %v1620_v15, %s3524_s23 }
0x1995   :  { %v1777_v27 = vpop.permute.xlu1 %1776 }
0x1996   :  { %v1781_v3 = vadd.f32 %v1777_v27, %v1771_v19 }
0x1999   :  { %v1785_v11 = vpop.permute.xlu1 %1784 }
0x199a   :  { %v1789_v20 = vsub.f32 %v1781_v3, %v1785_v11 }
0x199c   :  { %v1792_v21 = vmul.f32 1.442695, %v1789_v20  ;;  %v1775_v38 = vpop.permute.xlu0 %1774 }
0x199d   :  { %v1780_v26 = vadd.f32 %v1775_v38, %v1770_v16  ;;  %v1600_v41 = vpop.permute.xlu1 %1599 }
0x199e   :  { %3432 = vpow2.f32 %v1792_v21  ;;  %v1604_v49 = vmul.f32 %v1600_v41, %v4091_v23  ;;  %v3497_v41 = vld [vmem:[%s4450_s1] sm:$0xff] }
0x19a0   :  { %v1783_v13 = vpop.permute.xlu0 %1782  ;;  %v1607_v5 = vmul.f32 1.442695, %v1604_v49 }
0x19a1   :  { %v1788_v4 = vsub.f32 %v1780_v26, %v1783_v13  ;;  %v1598_v53 = vpop.permute.xlu1 %1597  ;;  %v3531_v13 = vmov 1.0  }
0x19a2   :  { %v1603_v50 = vmul.f32 %v1598_v53, %v4093_v24 }
0x19a3   :  { %v1790_v35 = vmul.f32 1.442695, %v1788_v4 }
0x19a4   :  { %v1628_v59 = vpop.permute.xlu0 %1627  ;;  %v1605_v8 = vmul.f32 1.442695, %v1603_v50 }
0x19a5   :  { %3434 = vpow2.f32 %v1790_v35  ;;  %v1632_v19 = vmul.f32 %v1628_v59, %v4091_v23 }
0x19a6   :  { %3436 = vpow2.f32 %v1607_v5 }
0x19a7   :  { %v1635_v0 = vmul.f32 1.442695, %v1632_v19 }
0x19a8   :  { %v3433_v37 = vpop.eup %3432  ;;  %v1626_v43 = vpop.permute.xlu0 %1625 }
0x19a9   :  { %1798 = vrot.lane.b32.xlu1 %v3433_v37, %s3524_s23  ;;  %3438 = vpow2.f32 %v1635_v0  ;;  %v1631_v6 = vmul.f32 %v1626_v43, %v4093_v24  ;;  %v1854_v43 = vld [vmem:[%s4457_s8] sm:$0x3] }
0x19aa   :  { %3440 = vpow2.f32 %v1605_v8  ;;  %v1859_v50 = vrot.slane %v1854_v43, %v317_v29 }
0x19ab   :  { %v1633_v9 = vmul.f32 1.442695, %v1631_v6 }
0x19ad   :  { %3442 = vpow2.f32 %v1633_v9  ;;  %v1863_v9 = vrot.slane %v1854_v43, %v321_v31 }
0x19af   :  { %v3435_v63 = vpop.eup %3434 }
0x19b0   :  { %1796 = vrot.lane.b32.xlu0 %v3435_v63, %s3524_s23  ;;  %v3437_v47 = vpop.eup %3436 }
0x19b1   :  { %v1638_v12 = vsub.f32 1.0, %v3437_v47 }
0x19b3   :  { %v3439_v36 = vpop.eup %3438 }
0x19b4   :  { %v1640_v18 = vsub.f32 %v3437_v47, %v3439_v36  ;;  %v3441_v15 = vpop.eup %3440  ;;  %vm1813_vm12 = vcmp.gt.f32.partialorder %v1638_v12, %v3439_v36 }
0x19b5   :  { %v1815_v4 = vsel %vm1813_vm12, 0.0, %v3531_v13  ;;  %v1637_v37 = vsub.f32 1.0, %v3441_v15  ;;  %vm1824_vm12 = vcmp.gt.f32.partialorder %v3497_v41, 0.5 }
0x19b6   :  { %v1642_v14 = vmax.f32 %v1640_v18, 0.0 }
0x19b7   :  { %v3443_v27 = vpop.eup %3442 }
0x19b8   :  { %vm1817_vm13 = vcmp.gt.f32.partialorder %v1642_v14, %v1638_v12  ;;  %vm1819_vm14 = vcmp.gt.f32.partialorder %v1642_v14, %v3439_v36  ;;  %v1639_v20 = vsub.f32 %v3441_v15, %v3443_v27  ;;  %vm1812_vm7 = vcmp.gt.f32.partialorder %v1637_v37, %v3443_v27 }
0x19b9   :  { %vm1821_vm15 = vmand %vm1817_vm13, %vm1819_vm14  ;;  %v1814_v46 = vsel %vm1812_vm7, 0.0, %v3531_v13 }
0x19ba   :  { %v1641_v32 = vmax.f32 %v1639_v20, 0.0 }
0x19bc   :  { %vm1816_vm8 = vcmp.gt.f32.partialorder %v1641_v32, %v1637_v37  ;;  %vm1818_vm9 = vcmp.gt.f32.partialorder %v1641_v32, %v3443_v27 }
0x19bd   :  { %vm1820_vm10 = vmand %vm1816_vm8, %vm1818_vm9 }
0x19fb   :  { %v1984_v5 = vpop.f32.mrb[16].mxu1 }
0x19fc   :  { %v1986_v0 = vpop.f32.mrb[17].mxu1 }
0x19fd   :  { %v1989_v53 = vsel %vm47_vm1, %v1984_v5, %v1986_v0 }
0x1a1b   :  { %v1799_v16 = vpop.permute.xlu1 %1798 }
0x1a1c   :  { %v1803_v33 = vmul.f32 %v1799_v16, %v4091_v23 }
0x1a1e   :  { %v1805_v10 = vmul.f32 1.2, %v1803_v33 }
0x1a20   :  { %v1807_v3 = vadd.f32 -0.1, %v1805_v10 }
0x1a22   :  { %v1809_v11 = vmax.f32 %v1807_v3, 0.0  ;;  %v1797_v38 = vpop.permute.xlu0 %1796 }
0x1a23   :  { %v1802_v26 = vmul.f32 %v1797_v38, %v4093_v24  ;;  %v3496_v24 = vld [vmem:[%s4450_s1 + $0x8] sm:$0xff] }
0x1a24   :  { %v1811_v21 = vmin.f32 %v1809_v11, 1.0  ;;  %vm1825_vm11 = vcmp.gt.f32.partialorder %v3496_v24, 0.5 }
0x1a25   :  { %v1804_v23 = vmul.f32 1.2, %v1802_v26 }
0x1a26   :  { %v1823_v35 = vsel %vm1821_vm15, %v1811_v21, %v1815_v4 }
0x1a27   :  { %1830 = vrot.lane.b32.xlu1 %v1823_v35, %s3526_s26  ;;  %v1806_v30 = vadd.f32 -0.1, %v1804_v23 }
0x1a29   :  { %v1808_v42 = vmax.f32 %v1806_v30, 0.0 }
0x1a2b   :  { %v1810_v63 = vmin.f32 %v1808_v42, 1.0 }
0x1a2d   :  { %v1822_v48 = vsel %vm1820_vm10, %v1810_v63, %v1814_v46 }
0x1a2e   :  { %1828 = vrot.lane.b32.xlu0 %v1822_v48, %s3526_s26 }
0x1a99   :  { %v1831_v51 = vpop.permute.xlu1 %1830 }
0x1a9a   :  { %v1835_v55 = vsel %vm1825_vm11, %v1831_v51, 0.0 }
0x1a9b   :  { %1837 = vst.msk [vmem:[%s4461_s12 + $0x8] sm:$0xff] %vm56_vm5, %v1835_v55  ;;  %v1839_v56 = vmul.f32 %v3496_v24, %v1835_v55 }
0x1a9d   :  { %1847 = vperm.xlu1 %3311, %v1839_v56  }
0x1aa0   :  { %v1829_v59 = vpop.permute.xlu0 %1828 }
0x1aa1   :  { %v1834_v49 = vsel %vm1824_vm12, %v1829_v59, 0.0 }
0x1aa2   :  { %1836 = vst.msk [vmem:[%s4461_s12] sm:$0xff] %vm56_vm5, %v1834_v49  ;;  %v1838_v19 = vmul.f32 %v3497_v41, %v1834_v49 }
0x1aa4   :  { %1842 = vperm.xlu0 %3310, %v1838_v19  }
0x1b1c   :  { %v1848_v6 = vpop.permute.xlu1 %1847 }
0x1b1d   :  { %v1852_v8 = vmul.f32 %v1848_v6, %v3814_v1  ;;  %v1853_v47 = vmul.f32 %v1848_v6, %v3816_v2 }
0x1b1f   :  { %v1868_v36 = vadd.f32 %v1859_v50, %v1852_v8  ;;  %v1869_v18 = vadd.f32 %v1863_v9, %v1853_v47 }
0x1b21   :  { %v1871_v33 = vrot.slane %v1869_v18, 4  ;;  %v1892_v14 = vrot.slane %v1868_v36, 4  ;;  %v1894_v29 = vrot.slane %v1868_v36, 2  ;;  %v1876_v3 = vrot.slane %v1869_v18, 6 }
0x1b22   :  { %v1882_v11 = vrot.slane %v1869_v18, 2  ;;  %v1888_v1 = vrot.slane %v1868_v36, 6 }
0x1b23   :  { %v1843_v16 = vpop.permute.xlu0 %1842 }
0x1b24   :  { %v1850_v10 = vmul.f32 %v1843_v16, %v3810_v61  ;;  %v1851_v12 = vmul.f32 %v1843_v16, %v3812_v62 }
0x1b26   :  { %v1866_v15 = vadd.f32 %v1859_v50, %v1850_v10  ;;  %v1867_v27 = vadd.f32 %v1863_v9, %v1851_v12 }
0x1b28   :  { %v1878_v20 = vrot.slane %v1866_v15, 4  ;;  %v1885_v21 = vrot.slane %v1867_v27, 4  ;;  %v1874_v31 = vrot.slane %v1866_v15, 6  ;;  %v1898_v2 = vsel %vm97_vm2, %v1866_v15, %v1871_v33 }
0x1b29   :  { %v1880_v38 = vrot.slane %v1866_v15, 2  ;;  %v1890_v26 = vrot.slane %v1867_v27, 6  ;;  %v1896_v13 = vrot.slane %v1867_v27, 2  ;;  %v1907_v4 = vsel %vm97_vm2, %v1892_v14, %v1867_v27 }
0x1b2a   :  { %v1899_v61 = vsel %vm99_vm3, %v1898_v2, %v1874_v31  ;;  %v1901_v62 = vsel %vm97_vm2, %v1878_v20, %v1869_v18  ;;  %v1904_v35 = vsel %vm97_vm2, %v1868_v36, %v1885_v21  ;;  %v1908_v23 = vsel %vm99_vm3, %v1907_v4, %v1894_v29 }
0x1b2b   :  { %v1900_v37 = vsel %vm101_vm4, %v1899_v61, %v1876_v3  ;;  %v1902_v32 = vsel %vm99_vm3, %v1901_v62, %v1880_v38  ;;  %v1905_v30 = vsel %vm99_vm3, %v1904_v35, %v1888_v1  ;;  %v4260_v42 = vsel %vm101_vm4, %v1908_v23, %v1896_v13 }
0x1b2c   :  { %v1990_v63 = vadd.f32 %v1989_v53, %v1900_v37  ;;  %v4263_v46 = vsel %vm101_vm4, %v1902_v32, %v1882_v11  ;;  %v4266_v48 = vsel %vm101_vm4, %v1905_v30, %v1890_v26  ;;  %vm2995_vm2 = vcmask 33792  }
0x1b2e   :  { %v1991_v24 = vsub.f32 0.0, %v1990_v63 }
0x1b30   :  { %v1992_v51 = vmul.f32 1.442695, %v1991_v24 }
0x1b32   :  { %3444 = vpow2.f32 %v1992_v51 }
0x1b3c   :  { %v3445_v55 = vpop.eup %3444 }
0x1b3d   :  { %v1994_v56 = vadd.f32 1.0, %v3445_v55 }
0x1b3f   :  { %3446 = vrcp.f32 %v1994_v56 }
0x1b49   :  { %v3447_v41 = vpop.eup %3446 }
0x1b4a   :  { %v1996_v59 = vmul.f32 2.0, %v3447_v41  ;;  %v1998_v0 = vmul.f32 0.0, %v3447_v41 }
0x1b4c   :  { %v3051_v49 = vadd.f32 -1.0, %v1996_v59 }
0x1b4e   :  { %2000 = vrot.lane.b32.xlu1 %v3051_v49, %s3523_s4 }
0x1bc0   :  { %v2001_v19 = vpop.permute.xlu1 %2000 }
0x1bc1   :  { %v2003_v5 = vmul.f32 %v3447_v41, %v2001_v19 }
0x1bc3   :  { %2005 = vrot.lane.b32.xlu0 %v2003_v5, %s3523_s4 }
0x1c35   :  { %v2006_v53 = vpop.permute.xlu0 %2005 }
0x1c36   :  { %v2008_v43 = vadd.f32 %v2006_v53, %v1998_v0 }
0x1c38   :  { %3448 = vtanh.f32 %v2008_v43  ;;  %v2017_v31 = vmul.f32 %v2008_v43, %v3795_v57 }
0x1c3a   :  { %v2018_v26 = vadd.f32 %v2017_v31, %v3803_v60 }
0x1c3c   :  { %v2108_v4 = vrot.slane %v2018_v26, 4 }
0x1c42   :  { %v3449_v50 = vpop.eup %3448 }
0x1c43   :  { %2011 = vrot.lane.b32.xlu1 %v3449_v50, %s3523_s4 }
0x1cb5   :  { %v2012_v6 = vpop.permute.xlu1 %2011 }
0x1cb6   :  { %v2014_v8 = vmul.f32 %v3447_v41, %v2012_v6 }
0x1cb8   :  { %v2015_v9 = vmul.f32 %v2014_v8, %v3795_v57 }
0x1cba   :  { %v2016_v47 = vadd.f32 %v2015_v9, %v3803_v60 }
0x1cbc   :  { %2020 = vrot.lane.b32.xlu0 %v2016_v47, %s3527_s2  ;;  %v2128_v20 = vrot.slane %v2016_v47, 4 }
0x1d2e   :  { %v2021_v36 = vpop.permute.xlu0 %2020 }
0x1d2f   :  { %3052 = vmatmul.mubr.msk.f32.vlgmr.msra.gmra.mrb[18].mxu1 %vm152_vm0, %v2021_v36 }
0x1d30   :  { %3248 = vmatpush1.bf16.msra.mxu1 %v4187_v52  ;;  %2341 = vmatprep.mubr.f32.mxu1 %v3522_v7 }
0x1d31   :  { %3250 = vmatprep.subr.bf16.mxu1 %v4189_v54 }
0x1d34   :  { %3252 = vmatpush1.bf16.msra.mxu1 %v4200_v25 }
0x1d35   :  { %3262 = vmatprep.subr.bf16.mxu1 %v4175_v45 }
0x1e02   :  { %v2090_v18 = vpop.f32.mrb[18].mxu1 }
0x1e03   :  { %v2092_v16 = vpop.f32.mrb[19].mxu1 }
0x1e04   :  { %v2095_v33 = vsel %vm47_vm1, %v2090_v18, %v2092_v16 }
0x1e05   :  { %v2097_v10 = vrot.slane %v2095_v33, 4 }
0x1e07   :  { %v2099_v12 = vadd.f32 %v2097_v10, %v1900_v37 }
0x1e09   :  { %v2100_v14 = vsub.f32 0.0, %v2099_v12 }
0x1e0b   :  { %v2101_v15 = vmul.f32 1.442695, %v2100_v14 }
0x1e0d   :  { %3450 = vpow2.f32 %v2101_v15 }
0x1e17   :  { %v3451_v27 = vpop.eup %3450 }
0x1e18   :  { %v2103_v29 = vadd.f32 1.0, %v3451_v27 }
0x1e1a   :  { %3452 = vrcp.f32 %v2103_v29 }
0x1e24   :  { %v3453_v3 = vpop.eup %3452 }
0x1e25   :  { %v2105_v11 = vmul.f32 2.0, %v3453_v3  ;;  %v2110_v61 = vmul.f32 %v3453_v3, %v2108_v4 }
0x1e27   :  { %v3053_v1 = vadd.f32 -1.0, %v2105_v11 }
0x1e29   :  { %2112 = vrot.lane.b32.xlu1 %v3053_v1, %s3523_s4 }
0x1e2d   :  { %2129 = vrot.lane.b32.xlu1 %v2128_v20, %s3527_s2 }
0x1e9b   :  { %v2113_v21 = vpop.permute.xlu1 %2112 }
0x1e9c   :  { %v2115_v2 = vmul.f32 %v3453_v3, %v2113_v21 }
0x1e9e   :  { %2117 = vrot.lane.b32.xlu0 %v2115_v2, %s3523_s4 }
0x1e9f   :  { %v2130_v38 = vpop.permute.xlu1 %2129 }
0x1ea0   :  { %v2132_v13 = vmul.f32 %v2130_v38, %v3799_v58 }
0x1ea2   :  { %2134 = vrot.lane.b32.xlu1 %v2132_v13, %s3527_s2 }
0x1ea6   :  { %2139 = vrot.lane.b32.xlu1 %v2108_v4, %s3528_s24 }
0x1f10   :  { %v2118_v62 = vpop.permute.xlu0 %2117 }
0x1f11   :  { %v2120_v35 = vadd.f32 %v2118_v62, %v2110_v61 }
0x1f13   :  { %3454 = vtanh.f32 %v2120_v35  ;;  %v2138_v36 = vmul.f32 %v2120_v35, %v3795_v57 }
0x1f14   :  { %v2135_v23 = vpop.permute.xlu1 %2134 }
0x1f18   :  { %v2140_v37 = vpop.permute.xlu1 %2139 }
0x1f19   :  { %v2142_v32 = vmul.f32 %v2140_v37, %v3799_v58 }
0x1f1b   :  { %2144 = vrot.lane.b32.xlu1 %v2142_v32, %s3523_s4 }
0x1f1d   :  { %v3455_v30 = vpop.eup %3454 }
0x1f1e   :  { %2123 = vrot.lane.b32.xlu0 %v3455_v30, %s3523_s4 }
0x1f8d   :  { %v2145_v47 = vpop.permute.xlu1 %2144 }
0x1f8e   :  { %v2147_v18 = vadd.f32 %v2145_v47, %v2138_v36 }
0x1f90   :  { %v2124_v60 = vpop.permute.xlu0 %2123  ;;  %v2235_v33 = vrot.slane %v2147_v18, 4 }
0x1f91   :  { %v2126_v63 = vmul.f32 %v3453_v3, %v2124_v60 }
0x1f93   :  { %v2127_v24 = vmul.f32 %v2126_v63, %v3795_v57 }
0x1f95   :  { %v2137_v51 = vadd.f32 %v2135_v23, %v2127_v24 }
0x1f97   :  { %v2149_v55 = vrot.slane %v2137_v51, 4 }
0x1f99   :  { %2150 = vrot.lane.b32.xlu0 %v2149_v55, %s3527_s2 }
0x200b   :  { %v2151_v56 = vpop.permute.xlu0 %2150 }
0x200c   :  { %3054 = vmatmul.mubr.msk.f32.vlgmr.msra.gmra.mrb[10].mxu0 %vm152_vm0, %v2151_v56  ;;  %v2256_v16 = vmul.f32 %v2151_v56, %v3874_v34 }
0x200d   :  { %3256 = vmatpush1.bf16.msra.mxu0 %v4187_v52  ;;  %2471 = vmatprep.mubr.f32.mxu0 %v3522_v7 }
0x200e   :  { %3258 = vmatprep.subr.bf16.mxu0 %v4189_v54 }
0x2011   :  { %3260 = vmatpush1.bf16.msra.mxu0 %v4200_v25 }
0x2012   :  { %3270 = vmatprep.subr.bf16.mxu0 %v4175_v45 }
0x20df   :  { %v2220_v58 = vpop.f32.mrb[10].mxu0 }
0x20e0   :  { %v2222_v41 = vpop.f32.mrb[11].mxu0 }
0x20e1   :  { %v2225_v59 = vsel %vm47_vm1, %v2220_v58, %v2222_v41 }
0x20e2   :  { %v2226_v49 = vadd.f32 %v2225_v59, %v4263_v46 }
0x20e4   :  { %v2227_v19 = vsub.f32 0.0, %v2226_v49 }
0x20e6   :  { %v2228_v5 = vmul.f32 1.442695, %v2227_v19 }
0x20e8   :  { %3456 = vpow2.f32 %v2228_v5 }
0x20f2   :  { %v3457_v0 = vpop.eup %3456 }
0x20f3   :  { %v2230_v53 = vadd.f32 1.0, %v3457_v0 }
0x20f5   :  { %3458 = vrcp.f32 %v2230_v53 }
0x20ff   :  { %v3459_v43 = vpop.eup %3458 }
0x2100   :  { %v2232_v50 = vmul.f32 2.0, %v3459_v43  ;;  %v2237_v10 = vmul.f32 %v3459_v43, %v2235_v33 }
0x2102   :  { %v3055_v6 = vadd.f32 -1.0, %v2232_v50 }
0x2104   :  { %2239 = vrot.lane.b32.xlu0 %v3055_v6, %s3523_s4 }
0x2176   :  { %v2240_v8 = vpop.permute.xlu0 %2239 }
0x2177   :  { %v2242_v9 = vmul.f32 %v3459_v43, %v2240_v8 }
0x2179   :  { %2244 = vrot.lane.b32.xlu0 %v2242_v9, %s3523_s4 }
0x217d   :  { %2258 = vrot.lane.b32.xlu0 %v2256_v16, %s3527_s2 }
0x2181   :  { %2263 = vrot.lane.b32.xlu0 %v2235_v33, %s3528_s24 }
0x21eb   :  { %v2245_v12 = vpop.permute.xlu0 %2244 }
0x21ec   :  { %v2247_v14 = vadd.f32 %v2245_v12, %v2237_v10 }
0x21ee   :  { %3460 = vtanh.f32 %v2247_v14  ;;  %v2262_v38 = vmul.f32 %v2247_v14, %v3871_v44 }
0x21ef   :  { %v2259_v15 = vpop.permute.xlu0 %2258 }
0x21f3   :  { %v2264_v27 = vpop.permute.xlu0 %2263 }
0x21f4   :  { %v2266_v29 = vmul.f32 %v2264_v27, %v3874_v34 }
0x21f6   :  { %2268 = vrot.lane.b32.xlu0 %v2266_v29, %s3523_s4 }
0x21f8   :  { %v3461_v57 = vpop.eup %3460 }
0x21f9   :  { %2250 = vrot.lane.b32.xlu1 %v3461_v57, %s3523_s4 }
0x2268   :  { %v2269_v31 = vpop.permute.xlu0 %2268 }
0x2269   :  { %v2271_v13 = vadd.f32 %v2269_v31, %v2262_v38 }
0x226b   :  { %v2251_v3 = vpop.permute.xlu1 %2250  ;;  %v2361_v61 = vrot.slane %v2271_v13, 4 }
0x226c   :  { %v2253_v11 = vmul.f32 %v3459_v43, %v2251_v3 }
0x226e   :  { %v2254_v1 = vmul.f32 %v2253_v11, %v3871_v44 }
0x2270   :  { %v2261_v20 = vadd.f32 %v2259_v15, %v2254_v1 }
0x2272   :  { %v2381_v21 = vrot.slane %v2261_v20, 4  ;;  %2273 = vrot.lane.b32.xlu1 %v2261_v20, %s3527_s2 }
0x2274   :  { %2382 = vrot.lane.b32.xlu0 %v2381_v21, %s3527_s2 }
0x22e4   :  { %v2274_v2 = vpop.permute.xlu1 %2273 }
0x22e5   :  { %3056 = vmatmul.mubr.msk.f32.vlgmr.msra.gmra.mrb[20].mxu1 %vm152_vm0, %v2274_v2 }
0x22e6   :  { %v2383_v26 = vpop.permute.xlu0 %2382  ;;  %3264 = vmatpush1.bf16.msra.mxu1 %v4187_v52  ;;  %2594 = vmatprep.mubr.f32.mxu1 %v3522_v7 }
0x22e7   :  { %v2385_v4 = vmul.f32 %v2383_v26, %v3874_v34  ;;  %3266 = vmatprep.subr.bf16.mxu1 %v4189_v54 }
0x22e9   :  { %2387 = vrot.lane.b32.xlu0 %v2385_v4, %s3527_s2 }
0x22ea   :  { %3268 = vmatpush1.bf16.msra.mxu1 %v4200_v25 }
0x22eb   :  { %3278 = vmatprep.subr.bf16.mxu1 %v4175_v45 }
0x22ed   :  { %2392 = vrot.lane.b32.xlu0 %v2361_v61, %s3528_s24 }
0x235b   :  { %v2388_v62 = vpop.permute.xlu0 %2387 }
0x235f   :  { %v2393_v35 = vpop.permute.xlu0 %2392 }
0x2360   :  { %v2395_v23 = vmul.f32 %v2393_v35, %v3874_v34 }
0x2362   :  { %2397 = vrot.lane.b32.xlu0 %v2395_v23, %s3523_s4 }
0x23b8   :  { %v2343_v37 = vpop.f32.mrb[20].mxu1 }
0x23b9   :  { %v2345_v32 = vpop.f32.mrb[21].mxu1 }
0x23ba   :  { %v2348_v30 = vsel %vm47_vm1, %v2343_v37, %v2345_v32 }
0x23bb   :  { %v2350_v60 = vrot.slane %v2348_v30, 4 }
0x23bd   :  { %v2352_v63 = vadd.f32 %v2350_v60, %v4263_v46 }
0x23bf   :  { %v2353_v24 = vsub.f32 0.0, %v2352_v63 }
0x23c1   :  { %v2354_v51 = vmul.f32 1.442695, %v2353_v24 }
0x23c3   :  { %3462 = vpow2.f32 %v2354_v51 }
0x23cd   :  { %v3463_v45 = vpop.eup %3462 }
0x23ce   :  { %v2356_v55 = vadd.f32 1.0, %v3463_v45 }
0x23d0   :  { %3464 = vrcp.f32 %v2356_v55 }
0x23d4   :  { %v2398_v11 = vpop.permute.xlu0 %2397 }
0x23da   :  { %v3465_v56 = vpop.eup %3464 }
0x23db   :  { %v2358_v58 = vmul.f32 2.0, %v3465_v56  ;;  %v2363_v49 = vmul.f32 %v3465_v56, %v2361_v61 }
0x23dd   :  { %v3057_v41 = vadd.f32 -1.0, %v2358_v58 }
0x23df   :  { %2365 = vrot.lane.b32.xlu1 %v3057_v41, %s3523_s4 }
0x2451   :  { %v2366_v34 = vpop.permute.xlu1 %2365 }
0x2452   :  { %v2368_v59 = vmul.f32 %v3465_v56, %v2366_v34 }
0x2454   :  { %2370 = vrot.lane.b32.xlu1 %v2368_v59, %s3523_s4 }
0x24c6   :  { %v2371_v19 = vpop.permute.xlu1 %2370 }
0x24c7   :  { %v2373_v5 = vadd.f32 %v2371_v19, %v2363_v49 }
0x24c9   :  { %3466 = vtanh.f32 %v2373_v5  ;;  %v2391_v57 = vmul.f32 %v2373_v5, %v3871_v44 }
0x24cb   :  { %v2400_v1 = vadd.f32 %v2398_v11, %v2391_v57 }
0x24cd   :  { %v2488_v21 = vrot.slane %v2400_v1, 4 }
0x24d3   :  { %v3467_v46 = vpop.eup %3466 }
0x24d4   :  { %2376 = vrot.lane.b32.xlu1 %v3467_v46, %s3523_s4 }
0x2546   :  { %v2377_v0 = vpop.permute.xlu1 %2376 }
0x2547   :  { %v2379_v53 = vmul.f32 %v3465_v56, %v2377_v0 }
0x2549   :  { %v2380_v43 = vmul.f32 %v2379_v53, %v3871_v44 }
0x254b   :  { %v2390_v50 = vadd.f32 %v2388_v62, %v2380_v43 }
0x254d   :  { %v2402_v6 = vrot.slane %v2390_v50, 4 }
0x254f   :  { %2403 = vrot.lane.b32.xlu1 %v2402_v6, %s3527_s2 }
0x25c1   :  { %v2404_v8 = vpop.permute.xlu1 %2403 }
0x25c2   :  { %3058 = vmatmul.mubr.msk.f32.vlgmr.msra.gmra.mrb[12].mxu0 %vm152_vm0, %v2404_v8  ;;  %v2509_v20 = vmul.f32 %v2404_v8, %v3936_v40 }
0x25c3   :  { %3272 = vmatpush1.bf16.msra.mxu0 %v4187_v52  ;;  %2724 = vmatprep.mubr.f32.mxu0 %v3522_v7 }
0x25c4   :  { %3274 = vmatprep.subr.bf16.mxu0 %v4189_v54 }
0x25c7   :  { %3276 = vmatpush1.bf16.msra.mxu0 %v4200_v25 }
0x2695   :  { %v2473_v9 = vpop.f32.mrb[12].mxu0 }
0x2696   :  { %v2475_v47 = vpop.f32.mrb[13].mxu0 }
0x2697   :  { %v2478_v36 = vsel %vm47_vm1, %v2473_v9, %v2475_v47 }
0x2698   :  { %v2479_v18 = vadd.f32 %v2478_v36, %v4266_v48 }
0x269a   :  { %v2480_v16 = vsub.f32 0.0, %v2479_v18 }
0x269c   :  { %v2481_v33 = vmul.f32 1.442695, %v2480_v16 }
0x269e   :  { %3468 = vpow2.f32 %v2481_v33 }
0x26a8   :  { %v3469_v10 = vpop.eup %3468 }
0x26a9   :  { %v2483_v12 = vadd.f32 1.0, %v3469_v10 }
0x26ab   :  { %3470 = vrcp.f32 %v2483_v12 }
0x26b5   :  { %v3471_v14 = vpop.eup %3470 }
0x26b6   :  { %v2485_v15 = vmul.f32 2.0, %v3471_v14  ;;  %v2490_v31 = vmul.f32 %v3471_v14, %v2488_v21 }
0x26b8   :  { %v3059_v27 = vadd.f32 -1.0, %v2485_v15 }
0x26ba   :  { %2492 = vrot.lane.b32.xlu1 %v3059_v27, %s3523_s4 }
0x272c   :  { %v2493_v29 = vpop.permute.xlu1 %2492 }
0x272d   :  { %v2495_v3 = vmul.f32 %v3471_v14, %v2493_v29 }
0x272f   :  { %2497 = vrot.lane.b32.xlu1 %v2495_v3, %s3523_s4 }
0x2733   :  { %2511 = vrot.lane.b32.xlu1 %v2509_v20, %s3527_s2 }
0x2737   :  { %2516 = vrot.lane.b32.xlu1 %v2488_v21, %s3528_s24 }
0x27a1   :  { %v2498_v2 = vpop.permute.xlu1 %2497 }
0x27a2   :  { %v2500_v38 = vadd.f32 %v2498_v2, %v2490_v31 }
0x27a4   :  { %3472 = vtanh.f32 %v2500_v38  ;;  %v2515_v60 = vmul.f32 %v2500_v38, %v3933_v39 }
0x27a5   :  { %v2512_v26 = vpop.permute.xlu1 %2511 }
0x27a9   :  { %v2517_v13 = vpop.permute.xlu1 %2516 }
0x27aa   :  { %v2519_v44 = vmul.f32 %v2517_v13, %v3936_v40 }
0x27ac   :  { %2521 = vrot.lane.b32.xlu1 %v2519_v44, %s3523_s4 }
0x27ae   :  { %v3473_v4 = vpop.eup %3472 }
0x27af   :  { %2503 = vrot.lane.b32.xlu0 %v3473_v4, %s3523_s4 }
0x281e   :  { %v2522_v32 = vpop.permute.xlu1 %2521 }
0x281f   :  { %v2524_v24 = vadd.f32 %v2522_v32, %v2515_v60 }
0x2821   :  { %v2504_v61 = vpop.permute.xlu0 %2503  ;;  %v2614_v45 = vrot.slane %v2524_v24, 4 }
0x2822   :  { %v2506_v62 = vmul.f32 %v3471_v14, %v2504_v61 }
0x2824   :  { %v2507_v35 = vmul.f32 %v2506_v62, %v3933_v39 }
0x2826   :  { %v2514_v23 = vadd.f32 %v2512_v26, %v2507_v35 }
0x2828   :  { %v2634_v37 = vrot.slane %v2514_v23, 4  ;;  %2526 = vrot.lane.b32.xlu0 %v2514_v23, %s3527_s2 }
0x282a   :  { %2635 = vrot.lane.b32.xlu1 %v2634_v37, %s3527_s2 }
0x289a   :  { %v2527_v30 = vpop.permute.xlu0 %2526 }
0x289b   :  { %3060 = vmatmul.mubr.msk.f32.vlgmr.msra.gmra.mrb[22].mxu1 %vm152_vm0, %v2527_v30 }
0x289c   :  { %v2636_v63 = vpop.permute.xlu1 %2635  ;;  %3280 = vmatpush1.bf16.msra.mxu1 %v4187_v52  ;;  %2847 = vmatprep.mubr.f32.mxu1 %v3522_v7 }
0x289d   :  { %v2638_v51 = vmul.f32 %v2636_v63, %v3936_v40  ;;  %3282 = vmatprep.subr.bf16.mxu1 %v4189_v54 }
0x289f   :  { %2640 = vrot.lane.b32.xlu1 %v2638_v51, %s3527_s2 }
0x28a0   :  { %3284 = vmatpush1.bf16.msra.mxu1 %v4200_v25 }
0x28a3   :  { %2645 = vrot.lane.b32.xlu1 %v2614_v45, %s3528_s24 }
0x2911   :  { %v2641_v55 = vpop.permute.xlu1 %2640 }
0x2915   :  { %v2646_v56 = vpop.permute.xlu1 %2645 }
0x2916   :  { %v2648_v58 = vmul.f32 %v2646_v56, %v3936_v40 }
0x2918   :  { %2650 = vrot.lane.b32.xlu1 %v2648_v58, %s3523_s4 }
0x296e   :  { %v2596_v52 = vpop.f32.mrb[22].mxu1 }
0x296f   :  { %v2598_v41 = vpop.f32.mrb[23].mxu1 }
0x2970   :  { %v2601_v34 = vsel %vm47_vm1, %v2596_v52, %v2598_v41 }
0x2971   :  { %v2603_v59 = vrot.slane %v2601_v34, 4 }
0x2973   :  { %v2605_v54 = vadd.f32 %v2603_v59, %v4266_v48 }
0x2975   :  { %v2606_v49 = vsub.f32 0.0, %v2605_v54 }
0x2977   :  { %v2607_v19 = vmul.f32 1.442695, %v2606_v49 }
0x2979   :  { %3474 = vpow2.f32 %v2607_v19 }
0x2983   :  { %v3475_v25 = vpop.eup %3474 }
0x2984   :  { %v2609_v5 = vadd.f32 1.0, %v3475_v25 }
0x2986   :  { %3476 = vrcp.f32 %v2609_v5 }
0x298a   :  { %v2651_v38 = vpop.permute.xlu1 %2650 }
0x2990   :  { %v3477_v46 = vpop.eup %3476 }
0x2991   :  { %v2611_v0 = vmul.f32 2.0, %v3477_v46  ;;  %v2616_v50 = vmul.f32 %v3477_v46, %v2614_v45 }
0x2993   :  { %v3061_v53 = vadd.f32 -1.0, %v2611_v0 }
0x2995   :  { %2618 = vrot.lane.b32.xlu0 %v3061_v53, %s3523_s4 }
0x2a07   :  { %v2619_v40 = vpop.permute.xlu0 %2618 }
0x2a08   :  { %v2621_v43 = vmul.f32 %v3477_v46, %v2619_v40 }
0x2a0a   :  { %2623 = vrot.lane.b32.xlu0 %v2621_v43, %s3523_s4 }
0x2a7c   :  { %v2624_v6 = vpop.permute.xlu0 %2623 }
0x2a7d   :  { %v2626_v8 = vadd.f32 %v2624_v6, %v2616_v50 }
0x2a7f   :  { %3478 = vtanh.f32 %v2626_v8  ;;  %v2644_v31 = vmul.f32 %v2626_v8, %v3933_v39  ;;  %v2906_v8 = vld [vmem:[%s4458_s9] sm:$0xff] }
0x2a81   :  { %v2653_v26 = vadd.f32 %v2651_v38, %v2644_v31 }
0x2a83   :  { %v2741_v44 = vrot.slane %v2653_v26, 4 }
0x2a89   :  { %v3479_v48 = vpop.eup %3478 }
0x2a8a   :  { %2629 = vrot.lane.b32.xlu0 %v3479_v48, %s3523_s4  ;;  %v2907_v48 = vld [vmem:[%s4458_s9 + $0x8] sm:$0xff] }
0x2afc   :  { %v2630_v9 = vpop.permute.xlu0 %2629 }
0x2afd   :  { %v2632_v47 = vmul.f32 %v3477_v46, %v2630_v9  ;;  %v2908_v9 = vld [vmem:[%s4458_s9 + $0x10] sm:$0xff] }
0x2aff   :  { %v2633_v36 = vmul.f32 %v2632_v47, %v3933_v39  ;;  %v3532_v47 = vmov 0.0|0.0  }
0x2b00   :  { %3285 = vmatprep.subr.bf16.mxu0 %v3532_v47 }
0x2b01   :  { %v2643_v18 = vadd.f32 %v2641_v55, %v2633_v36  ;;  %v3286_v36 = vpack.c.bf16 %v2907_v48, %v2906_v8 }
0x2b03   :  { %v2655_v16 = vrot.slane %v2643_v18, 4  ;;  %v2909_v18 = vld [vmem:[%s4458_s9 + $0x18] sm:$0xff] }
0x2b05   :  { %2656 = vrot.lane.b32.xlu0 %v2655_v16, %s3527_s2  ;;  %v3289_v16 = vpack.c.bf16 %v2909_v18, %v2908_v9 }
0x2b77   :  { %v2657_v33 = vpop.permute.xlu0 %2656 }
0x2b78   :  { %3062 = vmatmul.mubr.msk.f32.vlgmr.msra.gmra.mrb[14].mxu0 %vm152_vm0, %v2657_v33  ;;  %v2762_v13 = vmul.f32 %v2657_v33, %v3995_v22 }
0x2b79   :  { %3287 = vmatpush3.bf16.msra.mxu0 %v3286_v36 }
0x2b7a   :  { %3288 = vmatprep.subr.bf16.mxu0 %v3532_v47 }
0x2b7d   :  { %3290 = vmatpush3.bf16.msra.mxu0 %v3289_v16 }
0x2b7e   :  { %3291 = vmatprep.subr.bf16.mxu0 %v3532_v47 }
0x2c4b   :  { %v2726_v10 = vpop.f32.mrb[14].mxu0 }
0x2c4c   :  { %v2728_v12 = vpop.f32.mrb[15].mxu0 }
0x2c4d   :  { %v2731_v14 = vsel %vm47_vm1, %v2726_v10, %v2728_v12  ;;  %v2910_v10 = vld [vmem:[%s4458_s9 + $0x20] sm:$0xff]  ;;  %v2911_v12 = vld [vmem:[%s4458_s9 + $0x28] sm:$0xff] }
0x2c4e   :  { %v2732_v15 = vadd.f32 %v2731_v14, %v4260_v42  ;;  %v3292_v14 = vpack.c.bf16 %v2911_v12, %v2910_v10 }
0x2c50   :  { %v2733_v27 = vsub.f32 0.0, %v2732_v15  ;;  %3293 = vmatpush3.bf16.msra.mxu0 %v3292_v14  ;;  %v2912_v15 = vld [vmem:[%s4458_s9 + $0x30] sm:$0xff] }
0x2c51   :  { %3294 = vmatprep.subr.bf16.mxu0 %v3532_v47 }
0x2c52   :  { %v2734_v29 = vmul.f32 1.442695, %v2733_v27  ;;  %v2913_v27 = vld [vmem:[%s4458_s9 + $0x38] sm:$0xff] }
0x2c54   :  { %3480 = vpow2.f32 %v2734_v29  ;;  %v3295_v29 = vpack.c.bf16 %v2913_v27, %v2912_v15 }
0x2c56   :  { %3296 = vmatpush3.bf16.msra.mxu0 %v3295_v29 }
0x2c5e   :  { %v3481_v57 = vpop.eup %3480 }
0x2c5f   :  { %v2736_v3 = vadd.f32 1.0, %v3481_v57 }
0x2c61   :  { %3482 = vrcp.f32 %v2736_v3 }
0x2c6b   :  { %v3483_v11 = vpop.eup %3482 }
0x2c6c   :  { %v2738_v1 = vmul.f32 2.0, %v3483_v11  ;;  %v2743_v4 = vmul.f32 %v3483_v11, %v2741_v44 }
0x2c6e   :  { %v3063_v20 = vadd.f32 -1.0, %v2738_v1 }
0x2c70   :  { %2745 = vrot.lane.b32.xlu0 %v3063_v20, %s3523_s4 }
0x2ce2   :  { %v2746_v21 = vpop.permute.xlu0 %2745 }
0x2ce3   :  { %v2748_v2 = vmul.f32 %v3483_v11, %v2746_v21 }
0x2ce5   :  { %2750 = vrot.lane.b32.xlu0 %v2748_v2, %s3523_s4 }
0x2ce9   :  { %2764 = vrot.lane.b32.xlu0 %v2762_v13, %s3527_s2 }
0x2ced   :  { %2769 = vrot.lane.b32.xlu0 %v2741_v44, %s3528_s24 }
0x2d57   :  { %v2751_v61 = vpop.permute.xlu0 %2750 }
0x2d58   :  { %v2753_v62 = vadd.f32 %v2751_v61, %v2743_v4 }
0x2d5a   :  { %3484 = vtanh.f32 %v2753_v62  ;;  %v2768_v28 = vmul.f32 %v2753_v62, %v3992_v17 }
0x2d5b   :  { %v2765_v35 = vpop.permute.xlu0 %2764 }
0x2d5f   :  { %v2770_v23 = vpop.permute.xlu0 %2769 }
0x2d60   :  { %v2772_v39 = vmul.f32 %v2770_v23, %v3995_v22 }
0x2d62   :  { %2774 = vrot.lane.b32.xlu0 %v2772_v39, %s3523_s4 }
0x2d64   :  { %v3485_v37 = vpop.eup %3484 }
0x2d65   :  { %2756 = vrot.lane.b32.xlu1 %v3485_v37, %s3523_s4 }
0x2dd4   :  { %v2775_v51 = vpop.permute.xlu0 %2774 }
0x2dd5   :  { %v2777_v40 = vadd.f32 %v2775_v51, %v2768_v28 }
0x2dd7   :  { %v2757_v32 = vpop.permute.xlu1 %2756  ;;  %v2867_v43 = vrot.slane %v2777_v40, 4 }
0x2dd8   :  { %v2759_v30 = vmul.f32 %v3483_v11, %v2757_v32 }
0x2dda   :  { %v2760_v60 = vmul.f32 %v2759_v30, %v3992_v17 }
0x2ddc   :  { %v2767_v63 = vadd.f32 %v2765_v35, %v2760_v60 }
0x2dde   :  { %v2887_v24 = vrot.slane %v2767_v63, 4  ;;  %2779 = vrot.lane.b32.xlu1 %v2767_v63, %s3527_s2 }
0x2de0   :  { %2888 = vrot.lane.b32.xlu0 %v2887_v24, %s3527_s2 }
0x2e50   :  { %v2780_v45 = vpop.permute.xlu1 %2779 }
0x2e51   :  { %3064 = vmatmul.mubr.msk.f32.vlgmr.msra.gmra.mrb[24].mxu1 %vm152_vm0, %v2780_v45 }
0x2e52   :  { %v2889_v55 = vpop.permute.xlu0 %2888 }
0x2e53   :  { %v2891_v56 = vmul.f32 %v2889_v55, %v3995_v22 }
0x2e55   :  { %2893 = vrot.lane.b32.xlu0 %v2891_v56, %s3527_s2 }
0x2ec7   :  { %v2894_v1 = vpop.permute.xlu0 %2893 }
0x2f24   :  { %v2849_v58 = vpop.f32.mrb[24].mxu1 }
0x2f25   :  { %v2851_v52 = vpop.f32.mrb[25].mxu1 }
0x2f26   :  { %v2854_v41 = vsel %vm47_vm1, %v2849_v58, %v2851_v52  ;;  %vm3533_vm1 = vmmov 0  }
0x2f27   :  { %v2856_v34 = vrot.slane %v2854_v41, 4  ;;  %3122 = vmatprep.mubr.msk.f32.mxu0 %vm3533_vm1, %v3522_v7  ;;  %v3066_v7 = vld [vmem:[%s4459_s10] ss:$0 sm:$0xff] }
0x2f29   :  { %v2858_v59 = vadd.f32 %v2856_v34, %v4260_v42 }
0x2f2b   :  { %v2859_v54 = vsub.f32 0.0, %v2858_v59 }
0x2f2d   :  { %v2860_v49 = vmul.f32 1.442695, %v2859_v54 }
0x2f2f   :  { %3486 = vpow2.f32 %v2860_v49 }
0x2f39   :  { %v3487_v19 = vpop.eup %3486 }
0x2f3a   :  { %v2862_v25 = vadd.f32 1.0, %v3487_v19 }
0x2f3c   :  { %3488 = vrcp.f32 %v2862_v25 }
0x2f46   :  { %v3489_v5 = vpop.eup %3488 }
0x2f47   :  { %v2864_v46 = vmul.f32 2.0, %v3489_v5  ;;  %v2869_v42 = vmul.f32 %v3489_v5, %v2867_v43 }
0x2f49   :  { %v3065_v0 = vadd.f32 -1.0, %v2864_v46 }
0x2f4b   :  { %2871 = vrot.lane.b32.xlu1 %v3065_v0, %s3523_s4 }
0x2fbd   :  { %v2872_v22 = vpop.permute.xlu1 %2871 }
0x2fbe   :  { %v2874_v53 = vmul.f32 %v3489_v5, %v2872_v22 }
0x2fc0   :  { %2876 = vrot.lane.b32.xlu1 %v2874_v53, %s3523_s4 }
0x3032   :  { %v2877_v50 = vpop.permute.xlu1 %2876 }
0x3033   :  { %v2879_v6 = vadd.f32 %v2877_v50, %v2869_v42 }
0x3035   :  { %3490 = vtanh.f32 %v2879_v6 }
0x303f   :  { %v3491_v33 = vpop.eup %3490 }
0x3040   :  { %2882 = vrot.lane.b32.xlu1 %v3491_v33, %s3523_s4 }
0x30b2   :  { %v2883_v57 = vpop.permute.xlu1 %2882 }
0x30b3   :  { %v2885_v3 = vmul.f32 %v3489_v5, %v2883_v57 }
0x30b5   :  { %v2886_v11 = vmul.f32 %v2885_v3, %v3992_v17 }
0x30b7   :  { %v2896_v20 = vadd.f32 %v2894_v1, %v2886_v11 }
0x30b9   :  { %v2901_v21 = vrot.slane %v2896_v20, 2  ;;  %2898 = vrot.lane.b32.xlu1 %v2896_v20, %s3527_s2  ;;  %s3534_s2 = smov [#allocation2]  }
0x30ba   :  { %s3015_s10 = sshll.u32 %s3534_s2, 4  ;;  %s3016_s10 = int_to_ptr.vmem [resolvable:$true] %s3015_s10 }
0x30bb   :  { %2902 = vrot.lane.b32.xlu0 %v2901_v21, %s3528_s24  ;;  %s3498_s24 = scalar_lea.vmem %s3016_s10, 32  ;;  %p3503_p1 = scmp.lt.s32.totalorder %s3016_s10, %s3016_s10 }
0x30bc   :  { %p3499_p0 = scmp.ne.s32.totalorder %s3016_s10, %s3498_s24  ;;  %p3504_p2 = scmp.lt.s32.totalorder %s3498_s24, %s3498_s24 }
0x30be   :  { %p3505_p3 = por %p3504_p2, %p3503_p1 }
0x30c0   :  { %p3506_p4 = pnand %p3505_p3, %p3499_p0 }
0x312b   :  { %v2899_v31 = vpop.permute.xlu1 %2898 }
0x312d   :  { %v2903_v2 = vpop.permute.xlu0 %2902 }
0x312e   :  { %v2905_v38 = vsel %vm152_vm0, %v2899_v31, %v2903_v2 }
0x312f   :  { %v2922_v26 = vrot.slane %v2905_v38, 4 }
0x3131   :  { %3123 = vmatmul.mubr.msk.f32.vlgmr.msra.gmra.mrb[16].mxu0 %vm1479_vm6, %v2922_v26 }
0x3204   :  { %v2991_v13 = vpop.f32.mrb[16].mxu0 }
0x3205   :  { %v2992_v17 = vadd.f32 %v3066_v7, %v2991_v13  ;;  %v3124_v44 = vpop.f32.mrb[17].mxu0 }
0x3207   :  { %v2996_v4 = vsel %vm2995_vm2, %v2992_v17, -inf }
0x3208   :  { %2997 = vmax.xlane.f32.xlu1 %v2996_v4 }
0x3295   :  { %v2998_v61 = vpop.xlane.xlu1 %2997 }
0x3296   :  { %v2999_v62 = vsub.f32 %v2992_v17, %v2998_v61 }
0x3298   :  { %v3000_v35 = vmul.f32 1.442695, %v2999_v62 }
0x329a   :  { %3492 = vpow2.f32 %v3000_v35 }
0x32a4   :  { %v3493_v23 = vpop.eup %3492 }
0x32a5   :  { %v3002_v39 = vsel %vm2995_vm2, %v3493_v23, 0.0 }
0x32a6   :  { %3003 = vadd.xlane.f32.xlu0 %v3002_v39 }
0x3333   :  { %v3004_v37 = vpop.xlane.xlu0 %3003 }
0x3334   :  { %3494 = vlog2.f32 %v3004_v37 }
0x333e   :  { %v3495_v32 = vpop.eup %3494 }
0x333f   :  { %v3006_v30 = vmul.f32 0.6931472, %v3495_v32 }
0x3341   :  { %v3007_v60 = vsub.f32 %v2999_v62, %v3006_v30 }
0x3343   :  { %3008 = vst.msk [vmem:[#allocation2] sm:$0x3] %vm2995_vm2, %v3007_v60 }
0x3344   :  { %3509 = shalt.err (!%p3506_p4)
}
0x3345   :  { %s3510_s6 = scalar_lea.hbm %s4460_s11, 32 }
0x3346   :  { %p3511_p5 = scmp.ne.s32.totalorder %s4460_s11, %s3510_s6  ;;  %p3514_p6 = scmp.lt.u32.totalorder %s3510_s6, %s4460_s11 }
0x3348   :  { %p3516_p7 = pnand %p3514_p6, %p3511_p5 }
0x334a   :  { %3519 = shalt.err (!%p3516_p7)
}
0x334b   :  { %3018 = dma.vmem_to_hbm [thread:$0]  %s3016_s10, 32, %s4460_s11, [#allocation3]  }
0x334c   :  { %3520 = dma.done.wait [#allocation3], 32  }
0x334d   :  { %3521 = vsyncadd [#allocation3], 4294967264 }
0x334e   :  { %3026 = vsyncpa [#allocation3], 1 }

</bundles_post_ra>
